<compile_context>
chip_gen: v6e
topology: v6e:2x2x1
jax: 0.10.0
libtpu: 0.0.40
codegen_flags: <defaults>
</compile_context>

<pallas_src>
import functools

import jax
import jax.numpy as jnp
from jax.experimental import pallas as pl
from jax.experimental.pallas import tpu as pltpu

_LANE = 128


def _head_kernel(x_ref, w_ref, b_ref, o_ref):
    """Fused global-average-pool + linear classification head.

    x_ref: (B_TILE, C, HW)  NCHW features, spatial dims flattened onto lanes
    w_ref: (C, N_pad)       fc weight, pre-scaled by 1/HW (pool folded in)
    b_ref: (1, N_pad)       fc bias (f32), lane-padded
    o_ref: (B_TILE, N_pad)  logits (f32), lane-padded
    """
    # Global average pool: reduce the HW lane axis, accumulating in f32
    # (upcast folded into the reduce; no separate full-tile f32 temp).
    pooled = jnp.sum(x_ref[...], axis=-1, dtype=jnp.float32)      # (B_TILE, C)
    # Replaced fc layer (1/HW already folded into w): MXU matmul, f32 acc.
    # For bf16 features/weights this is a bf16 matmul with f32 accumulation.
    logits = jnp.dot(pooled.astype(w_ref.dtype), w_ref[...],
                     preferred_element_type=jnp.float32)          # (B_TILE, N_pad)
    o_ref[...] = logits + b_ref[...]


def _resident_spec(block_shape, index_map):
    """BlockSpec for a grid-invariant (resident) operand: single-buffered."""
    try:
        return pl.BlockSpec(block_shape, index_map,
                            pipeline_mode=pl.Buffered(1))
    except (TypeError, AttributeError):   # older BlockSpec signature fallback
        return pl.BlockSpec(block_shape, index_map)


def resnet_head_pallas(x_nchw, w, b, *, b_tile=None):
    """Global-avg-pool + replaced-fc head.  x_nchw: [B, C_in, H, W] (f32/bf16)."""
    B, C, H, W_ = x_nchw.shape
    HW = H * W_
    N = w.shape[1]

    # Free reshape (merges trailing contiguous dims): NCHW -> (B, C, HW).
    # No transpose, no pad -> x streams through HBM exactly once.
    x = x_nchw.reshape(B, C, HW)

    # bf16 features -> bf16 weights / bf16 MXU matmul (f32 accumulation).
    compute_dtype = jnp.bfloat16 if x.dtype == jnp.bfloat16 else jnp.float32
    w_itemsize = jnp.dtype(compute_dtype).itemsize
    x_itemsize = jnp.dtype(x.dtype).itemsize

    # Pad class dim to 128 lanes (unmasked stores, dense MXU N); fold the
    # 1/HW pool scale into the weights (division done in f32).
    n_pad = max(_LANE, pl.cdiv(N, _LANE) * _LANE)
    w_p = jnp.zeros((C, n_pad), compute_dtype).at[:, :N].set(
        (w.astype(jnp.float32) / HW).astype(compute_dtype))
    b_p = jnp.zeros((1, n_pad), jnp.float32).at[:, :N].set(
        b.astype(jnp.float32))

    # ---- generation-aware batch tiling ------------------------------------
    try:
        phys_vmem = int(pltpu.get_tpu_info().vmem_capacity_bytes)
    except Exception:                       # conservative fallback = v7x 64 MiB
        phys_vmem = 64 << 20

    # Padded in-VMEM footprint of one batch row of x (lane dim pads to 128,
    # sublane dim to the dtype's packing granule).
    sub = {4: 8, 2: 16, 1: 32}.get(x_itemsize, 8)
    c_pad = pl.cdiv(C, sub) * sub
    hw_pad = pl.cdiv(HW, _LANE) * _LANE
    row_x = c_pad * hw_pad * x_itemsize
    # Worst-case VMEM per batch row: 2 pipelined x buffers + (for sub-f32
    # inputs) a possible full-tile f32 upcast temp + the f32 pooled row.
    row_cost = (2 * row_x
                + (c_pad * hw_pad * 4 if x_itemsize < 4 else 0)
                + c_pad * 4)

    w_bytes = C * n_pad * w_itemsize              # resident, single-buffered
    reserve = w_bytes + (1 << 20) + (4 << 20)     # + bias/out buffers + slack

    if b_tile is None:
        budget = int(phys_vmem * 0.7)
        b_tile = max(1, (budget - reserve) // row_cost)
        b_tile = min(b_tile, max(1, (32 << 20) // row_x))   # soft 32 MiB/buffer cap
        if B >= 16:
            # Keep >= 2 grid tiles so both v7x TensorCores get batch work.
            b_tile = min(b_tile, pl.cdiv(pl.cdiv(B, 2), 8) * 8)
    if b_tile >= B or B <= 8:
        b_tile = B                    # single tile; block == full batch dim
    else:
        # Round DOWN to the output-block sublane granule (never up past the
        # VMEM budget); 8 is the floor required by the (8,128) out tiling.
        b_tile = max(8, (b_tile // 8) * 8)
    num_tiles = pl.cdiv(B, b_tile)

    usage = b_tile * row_cost + reserve
    vmem_limit = int(min(int(phys_vmem * 0.9),
                         max(64 << 20, usage + (16 << 20))))

    cost = pl.CostEstimate(
        flops=2 * B * C * n_pad + B * C * HW,
        transcendentals=0,
        bytes_accessed=(B * C * HW * x_itemsize + C * n_pad * w_itemsize
                        + n_pad * 4 + B * n_pad * 4))

    out = pl.pallas_call(
        _head_kernel,
        out_shape=jax.ShapeDtypeStruct((B, n_pad), jnp.float32),
        grid_spec=pl.GridSpec(
            grid=(num_tiles,),
            in_specs=[
                pl.BlockSpec((b_tile, C, HW), lambda i: (i, 0, 0)),
                _resident_spec((C, n_pad), lambda i: (0, 0)),   # resident weight
                _resident_spec((1, n_pad), lambda i: (0, 0)),   # resident bias
            ],
            out_specs=pl.BlockSpec((b_tile, n_pad), lambda i: (i, 0)),
        ),
        compiler_params=pltpu.CompilerParams(
            dimension_semantics=("parallel",),   # batch tiles -> v7x dual TC
            vmem_limit_bytes=vmem_limit),
        cost_estimate=cost,
    )(x, w_p, b_p)

    return out[:, :N]


def make_temp_module(model_class_num, transfor_learning=True):
    """JAX analogue of MakeTempModule: forward(name, depth, input_channel)
    returns a callable head with a deterministically-initialized replaced fc."""

    def make_resnet(depth=50, input_channel=3):
        if transfor_learning:
            if depth not in (18, 50, 101, 152):
                raise ValueError('The model name is not in the choice.')
            in_features = 512 if depth == 18 else 2048
        else:
            in_features = 2048  # resnet50()
        # Deterministic init for the replaced nn.Linear(in_features, classes),
        # matching PyTorch's uniform(-1/sqrt(fan_in), 1/sqrt(fan_in)) scheme.
        key = jax.random.PRNGKey(0)
        kw, kb = jax.random.split(key)
        bound = 1.0 / jnp.sqrt(in_features)
        w = jax.random.uniform(kw, (in_features, model_class_num),
                               jnp.float32, -bound, bound)
        b = jax.random.uniform(kb, (model_class_num,),
                               jnp.float32, -bound, bound)
        head = jax.jit(functools.partial(resnet_head_pallas, w=w, b=b))
        return head, in_features

    def forward(name, depth, input_channel):
        if name == 'resnet':
            return make_resnet(depth, input_channel)
        raise ValueError('The model name is not in the choice.')

    return forward


if __name__ == "__main__":
    NUM_CLASSES = 4
    factory = make_temp_module(model_class_num=NUM_CLASSES,
                               transfor_learning=True)
    head_fn, in_features = factory('resnet', 50, 3)   # in_features = 2048

    # Small feature-map input consistent with the replaced head:
    # [batch=2, channels=in_features, spatial=4x4], NCHW like the PyTorch model.
    key = jax.random.PRNGKey(0)
    x = jax.random.normal(key, (2, in_features, 4, 4), dtype=jnp.float32)

    out = jax.block_until_ready(head_fn(x))

    # Pure-JAX reference check of the fused avgpool + fc kernel (f32 path).
    kw, kb = jax.random.split(jax.random.PRNGKey(0))
    bound = 1.0 / jnp.sqrt(in_features)
    w_ref = jax.random.uniform(kw, (in_features, NUM_CLASSES),
                               jnp.float32, -bound, bound)
    b_ref = jax.random.uniform(kb, (NUM_CLASSES,), jnp.float32, -bound, bound)
    ref = jnp.mean(x, axis=(2, 3)) @ w_ref + b_ref
    assert out.shape == (2, NUM_CLASSES)
    assert jnp.allclose(out, ref, atol=1e-4, rtol=1e-4)

    # bf16 feature path (halved HBM traffic, bf16 MXU matmul, f32 accumulate).
    out_bf16 = jax.block_until_ready(head_fn(x.astype(jnp.bfloat16)))
    ref_bf16 = (jnp.mean(x.astype(jnp.bfloat16).astype(jnp.float32),
                         axis=(2, 3)) @ w_ref + b_ref)
    assert out_bf16.shape == (2, NUM_CLASSES)
    assert jnp.allclose(out_bf16, ref_bf16, atol=5e-2, rtol=5e-2)

    print("KERNEL_OK")
</pallas_src>

<mosaic_0001>
module attributes {stable_mosaic.version = 11 : i64} {
  func.func @_head_kernel(%arg0: i32, %arg1: memref<2x2048x16xf32, #tpu.memory_space<vmem>>, %arg2: memref<2048x128xf32, #tpu.memory_space<vmem>>, %arg3: memref<1x128xf32, #tpu.memory_space<vmem>>, %arg4: memref<2x128xf32, #tpu.memory_space<vmem>>) attributes {dimension_semantics = [#tpu.dimension_semantics<parallel>], iteration_bounds = array<i64: 1>, scalar_prefetch = 0 : i64, scratch_operands = 0 : i64, tpu.core_type = #tpu.core_type<tc>, window_params = [{transform_indices = @transform_0, window_bounds = array<i64: 2, 2048, 16>}, {pipeline_mode = #tpu.pipeline_mode<synchronous>, transform_indices = @transform_1, window_bounds = array<i64: 2048, 128>}, {pipeline_mode = #tpu.pipeline_mode<synchronous>, transform_indices = @transform_2, window_bounds = array<i64: 1, 128>}, {transform_indices = @transform_3, window_bounds = array<i64: 2, 128>}]} {
    %c0 = arith.constant 0 : index
    %c0_0 = arith.constant 0 : index
    %c0_1 = arith.constant 0 : index
    %0 = vector.load %arg1[%c0, %c0_0, %c0_1] : memref<2x2048x16xf32, #tpu.memory_space<vmem>>, vector<2x2048x16xf32>
    %cst = arith.constant dense<0.000000e+00> : vector<2x2048xf32>
    %1 = vector.multi_reduction <add>, %0, %cst [2] : vector<2x2048x16xf32> to vector<2x2048xf32>
    %c0_2 = arith.constant 0 : index
    %c0_3 = arith.constant 0 : index
    %2 = vector.load %arg2[%c0_2, %c0_3] : memref<2048x128xf32, #tpu.memory_space<vmem>>, vector<2048x128xf32>
    %cst_4 = arith.constant dense<0.000000e+00> : vector<2x128xf32>
    %3 = tpu.matmul %1, %2, %cst_4 {dimension_numbers = #tpu.dot_dimension_numbers<[1], [0], [0], [1], [0, 0, 1, 1], [], []>} : vector<2x2048xf32>, vector<2048x128xf32>, vector<2x128xf32> -> vector<2x128xf32>
    %c0_5 = arith.constant 0 : index
    %c0_6 = arith.constant 0 : index
    %4 = vector.load %arg3[%c0_5, %c0_6] : memref<1x128xf32, #tpu.memory_space<vmem>>, vector<1x128xf32>
    %5 = vector.broadcast %4 : vector<1x128xf32> to vector<2x128xf32>
    %6 = arith.addf %3, %5 : vector<2x128xf32>
    %c0_7 = arith.constant 0 : index
    %c0_8 = arith.constant 0 : index
    %7 = vector.load %arg4[%c0_7, %c0_8] : memref<2x128xf32, #tpu.memory_space<vmem>>, vector<2x128xf32>
    tpu.vector_store %arg4[%c0_7, %c0_8], %6 {strides = array<i32>} : memref<2x128xf32, #tpu.memory_space<vmem>>, vector<2x128xf32>,
    return
  }
  func.func @transform_0(%arg0: i32) -> (i32, i32, i32) {
    %c0_i32 = arith.constant 0 : i32
    %c0_i32_0 = arith.constant 0 : i32
    %c0_i32_1 = arith.constant 0 : i32
    return %arg0, %c0_i32, %c0_i32_0 : i32, i32, i32
  }
  func.func @transform_1(%arg0: i32) -> (i32, i32) {
    %c0_i32 = arith.constant 0 : i32
    %c0_i32_0 = arith.constant 0 : i32
    %c0_i32_1 = arith.constant 0 : i32
    return %c0_i32, %c0_i32_0 : i32, i32
  }
  func.func @transform_2(%arg0: i32) -> (i32, i32) {
    %c0_i32 = arith.constant 0 : i32
    %c0_i32_0 = arith.constant 0 : i32
    %c0_i32_1 = arith.constant 0 : i32
    return %c0_i32, %c0_i32_0 : i32, i32
  }
  func.func @transform_3(%arg0: i32) -> (i32, i32) {
    %c0_i32 = arith.constant 0 : i32
    %c0_i32_0 = arith.constant 0 : i32
    return %arg0, %c0_i32 : i32, i32
  }
}

</mosaic_0001>

<bundles_post_ra>
// kernel: resnet_head_pallas.1
= control target key start
LH: loop header
LB: loop body
LE: loop exit
PB: predicated region body
PF: predicated region fallthrough
CT: control target
= control target key end

     0   :  { %vm527_vm0 = vcmask 130048   ;;  %s10653_s0 = inlined_call_operand.vmem [shape: f32[2,2048,16], index: 0, kind: input, shape index: {}]   ;;  %s10654_s1 = inlined_call_operand.vmem [shape: f32[2048,128], index: 1, kind: input, shape index: {}]   ;;  %s10655_s2 = inlined_call_operand.vmem [shape: f32[1,128], index: 2, kind: input, shape index: {}]   ;;  %s10656_s3 = inlined_call_operand.hbm [shape: f32[2,128], index: 3, kind: output, shape index: {}]  }
   0x1   :  { %v17_v0 = vld [vmem:[%s10653_s0 + $0x10] sm:$0xff]  ;;  %v15_v1 = vld [vmem:[%s10653_s0] sm:$0xff]  ;;  %v18_v2 = vld [vmem:[%s10653_s0 + $0x18] sm:$0xff] }
   0x2   :  { %v534_v3 = vsel %vm527_vm0, %v17_v0, 0.0  ;;  %v528_v4 = vsel %vm527_vm0, %v15_v1, 0.0  ;;  %v16_v5 = vld [vmem:[%s10653_s0 + $0x8] sm:$0xff]  ;;  %v537_v6 = vsel %vm527_vm0, %v18_v2, 0.0  ;;  %v19_v9 = vld [vmem:[%s10653_s0 + $0x20] sm:$0xff]  ;;  %v22_v12 = vld [vmem:[%s10653_s0 + $0x38] sm:$0xff] }
   0x3   :  { %535 = vadd.xlane.f32.xlu1 %v534_v3  ;;  %529 = vadd.xlane.f32.xlu0 %v528_v4  ;;  %v531_v7 = vsel %vm527_vm0, %v16_v5, 0.0  ;;  %v20_v8 = vld [vmem:[%s10653_s0 + $0x28] sm:$0xff]  ;;  %v540_v11 = vsel %vm527_vm0, %v19_v9, 0.0  ;;  %v21_v13 = vld [vmem:[%s10653_s0 + $0x30] sm:$0xff]  ;;  %v549_v14 = vsel %vm527_vm0, %v22_v12, 0.0  ;;  %v23_v17 = vld [vmem:[%s10653_s0 + $0x40] sm:$0xff] }
   0x4   :  { %v543_v10 = vsel %vm527_vm0, %v20_v8, 0.0  ;;  %v546_v15 = vsel %vm527_vm0, %v21_v13, 0.0  ;;  %v24_v16 = vld [vmem:[%s10653_s0 + $0x48] sm:$0xff]  ;;  %v552_v19 = vsel %vm527_vm0, %v23_v17, 0.0  ;;  %v26_v20 = vld [vmem:[%s10653_s0 + $0x58] sm:$0xff]  ;;  %v25_v21 = vld [vmem:[%s10653_s0 + $0x50] sm:$0xff] }
   0x5   :  { %v555_v18 = vsel %vm527_vm0, %v24_v16, 0.0  ;;  %v561_v22 = vsel %vm527_vm0, %v26_v20, 0.0  ;;  %v558_v23 = vsel %vm527_vm0, %v25_v21, 0.0  ;;  %v28_v24 = vld [vmem:[%s10653_s0 + $0x68] sm:$0xff]  ;;  %v27_v25 = vld [vmem:[%s10653_s0 + $0x60] sm:$0xff]  ;;  %v30_v28 = vld [vmem:[%s10653_s0 + $0x78] sm:$0xff] }
   0x6   :  { %v567_v26 = vsel %vm527_vm0, %v28_v24, 0.0  ;;  %v564_v27 = vsel %vm527_vm0, %v27_v25, 0.0  ;;  %v29_v29 = vld [vmem:[%s10653_s0 + $0x70] sm:$0xff]  ;;  %v573_v30 = vsel %vm527_vm0, %v30_v28, 0.0 }
   0x7   :  { %538 = vadd.xlane.f32.xlu1 %v537_v6  ;;  %532 = vadd.xlane.f32.xlu0 %v531_v7  ;;  %v570_v31 = vsel %vm527_vm0, %v29_v29, 0.0 }
   0xb   :  { %544 = vadd.xlane.f32.xlu1 %v543_v10  ;;  %541 = vadd.xlane.f32.xlu0 %v540_v11 }
   0xf   :  { %550 = vadd.xlane.f32.xlu1 %v549_v14  ;;  %547 = vadd.xlane.f32.xlu0 %v546_v15 }
  0x13   :  { %556 = vadd.xlane.f32.xlu1 %v555_v18  ;;  %553 = vadd.xlane.f32.xlu0 %v552_v19 }
  0x17   :  { %562 = vadd.xlane.f32.xlu1 %v561_v22  ;;  %559 = vadd.xlane.f32.xlu0 %v558_v23 }
  0x1b   :  { %568 = vadd.xlane.f32.xlu1 %v567_v26  ;;  %565 = vadd.xlane.f32.xlu0 %v564_v27 }
  0x1c   :  { %8 = vsyncpa [#allocation3], 0  ;;  %v32_v32 = vld [vmem:[%s10653_s0 + $0x88] sm:$0xff]  ;;  %v31_v33 = vld [vmem:[%s10653_s0 + $0x80] sm:$0xff]  ;;  %vm2850_vm1 = vcmask 130112   ;;  %vm2857_vm2 = vcmask 195712  }
  0x1d   :  { %v579_v34 = vsel %vm527_vm0, %v32_v32, 0.0  ;;  %v576_v35 = vsel %vm527_vm0, %v31_v33, 0.0  ;;  %v34_v36 = vld [vmem:[%s10653_s0 + $0x98] sm:$0xff]  ;;  %v33_v37 = vld [vmem:[%s10653_s0 + $0x90] sm:$0xff]  ;;  %v36_v40 = vld [vmem:[%s10653_s0 + $0xa8] sm:$0xff]  ;;  %vm2864_vm3 = vcmask 261312  }
  0x1e   :  { %v585_v38 = vsel %vm527_vm0, %v34_v36, 0.0  ;;  %v582_v39 = vsel %vm527_vm0, %v33_v37, 0.0  ;;  %v35_v41 = vld [vmem:[%s10653_s0 + $0xa0] sm:$0xff]  ;;  %v591_v42 = vsel %vm527_vm0, %v36_v40, 0.0  ;;  %v38_v44 = vld [vmem:[%s10653_s0 + $0xb8] sm:$0xff]  ;;  %v37_v45 = vld [vmem:[%s10653_s0 + $0xb0] sm:$0xff] }
  0x1f   :  { %574 = vadd.xlane.f32.xlu1 %v573_v30  ;;  %571 = vadd.xlane.f32.xlu0 %v570_v31  ;;  %v588_v43 = vsel %vm527_vm0, %v35_v41, 0.0  ;;  %v597_v46 = vsel %vm527_vm0, %v38_v44, 0.0  ;;  %v594_v47 = vsel %vm527_vm0, %v37_v45, 0.0  ;;  %v40_v48 = vld [vmem:[%s10653_s0 + $0xc8] sm:$0xff]  ;;  %v39_v49 = vld [vmem:[%s10653_s0 + $0xc0] sm:$0xff]  ;;  %v42_v52 = vld [vmem:[%s10653_s0 + $0xd8] sm:$0xff] }
  0x20   :  { %v603_v50 = vsel %vm527_vm0, %v40_v48, 0.0  ;;  %v600_v51 = vsel %vm527_vm0, %v39_v49, 0.0  ;;  %v41_v53 = vld [vmem:[%s10653_s0 + $0xd0] sm:$0xff]  ;;  %v609_v54 = vsel %vm527_vm0, %v42_v52, 0.0  ;;  %v44_v56 = vld [vmem:[%s10653_s0 + $0xe8] sm:$0xff]  ;;  %v43_v57 = vld [vmem:[%s10653_s0 + $0xe0] sm:$0xff] }
  0x21   :  { %v606_v55 = vsel %vm527_vm0, %v41_v53, 0.0  ;;  %v615_v58 = vsel %vm527_vm0, %v44_v56, 0.0  ;;  %v612_v59 = vsel %vm527_vm0, %v43_v57, 0.0  ;;  %v46_v60 = vld [vmem:[%s10653_s0 + $0xf8] sm:$0xff]  ;;  %v45_v61 = vld [vmem:[%s10653_s0 + $0xf0] sm:$0xff]  ;;  %v48_v0 = vld [vmem:[%s10653_s0 + $0x108] sm:$0xff] }
  0x22   :  { %v621_v62 = vsel %vm527_vm0, %v46_v60, 0.0  ;;  %v618_v63 = vsel %vm527_vm0, %v45_v61, 0.0  ;;  %v47_v1 = vld [vmem:[%s10653_s0 + $0x100] sm:$0xff]  ;;  %v627_v2 = vsel %vm527_vm0, %v48_v0, 0.0  ;;  %v50_v4 = vld [vmem:[%s10653_s0 + $0x118] sm:$0xff]  ;;  %v49_v5 = vld [vmem:[%s10653_s0 + $0x110] sm:$0xff] }
  0x23   :  { %580 = vadd.xlane.f32.xlu1 %v579_v34  ;;  %577 = vadd.xlane.f32.xlu0 %v576_v35  ;;  %v624_v3 = vsel %vm527_vm0, %v47_v1, 0.0  ;;  %v633_v6 = vsel %vm527_vm0, %v50_v4, 0.0  ;;  %v630_v7 = vsel %vm527_vm0, %v49_v5, 0.0  ;;  %v52_v8 = vld [vmem:[%s10653_s0 + $0x128] sm:$0xff]  ;;  %v51_v9 = vld [vmem:[%s10653_s0 + $0x120] sm:$0xff]  ;;  %v54_v12 = vld [vmem:[%s10653_s0 + $0x138] sm:$0xff] }
  0x24   :  { %v639_v10 = vsel %vm527_vm0, %v52_v8, 0.0  ;;  %v636_v11 = vsel %vm527_vm0, %v51_v9, 0.0  ;;  %v53_v13 = vld [vmem:[%s10653_s0 + $0x130] sm:$0xff]  ;;  %v645_v14 = vsel %vm527_vm0, %v54_v12, 0.0  ;;  %v56_v16 = vld [vmem:[%s10653_s0 + $0x148] sm:$0xff]  ;;  %v55_v17 = vld [vmem:[%s10653_s0 + $0x140] sm:$0xff] }
  0x25   :  { %v642_v15 = vsel %vm527_vm0, %v53_v13, 0.0  ;;  %v651_v18 = vsel %vm527_vm0, %v56_v16, 0.0  ;;  %v648_v19 = vsel %vm527_vm0, %v55_v17, 0.0  ;;  %v58_v20 = vld [vmem:[%s10653_s0 + $0x158] sm:$0xff]  ;;  %v57_v21 = vld [vmem:[%s10653_s0 + $0x150] sm:$0xff]  ;;  %v60_v24 = vld [vmem:[%s10653_s0 + $0x168] sm:$0xff] }
  0x26   :  { %v657_v22 = vsel %vm527_vm0, %v58_v20, 0.0  ;;  %v654_v23 = vsel %vm527_vm0, %v57_v21, 0.0  ;;  %v59_v25 = vld [vmem:[%s10653_s0 + $0x160] sm:$0xff]  ;;  %v663_v26 = vsel %vm527_vm0, %v60_v24, 0.0  ;;  %v62_v28 = vld [vmem:[%s10653_s0 + $0x178] sm:$0xff]  ;;  %v61_v29 = vld [vmem:[%s10653_s0 + $0x170] sm:$0xff] }
  0x27   :  { %586 = vadd.xlane.f32.xlu1 %v585_v38  ;;  %583 = vadd.xlane.f32.xlu0 %v582_v39  ;;  %v660_v27 = vsel %vm527_vm0, %v59_v25, 0.0  ;;  %v669_v30 = vsel %vm527_vm0, %v62_v28, 0.0  ;;  %v666_v31 = vsel %vm527_vm0, %v61_v29, 0.0  ;;  %v64_v32 = vld [vmem:[%s10653_s0 + $0x188] sm:$0xff]  ;;  %v63_v33 = vld [vmem:[%s10653_s0 + $0x180] sm:$0xff]  ;;  %v66_v36 = vld [vmem:[%s10653_s0 + $0x198] sm:$0xff] }
  0x28   :  { %v675_v34 = vsel %vm527_vm0, %v64_v32, 0.0  ;;  %v672_v35 = vsel %vm527_vm0, %v63_v33, 0.0  ;;  %v65_v37 = vld [vmem:[%s10653_s0 + $0x190] sm:$0xff]  ;;  %v681_v38 = vsel %vm527_vm0, %v66_v36, 0.0  ;;  %v68_v40 = vld [vmem:[%s10653_s0 + $0x1a8] sm:$0xff]  ;;  %v67_v41 = vld [vmem:[%s10653_s0 + $0x1a0] sm:$0xff] }
  0x29   :  { %v678_v39 = vsel %vm527_vm0, %v65_v37, 0.0  ;;  %v70_v44 = vld [vmem:[%s10653_s0 + $0x1b8] sm:$0xff]  ;;  %v69_v45 = vld [vmem:[%s10653_s0 + $0x1b0] sm:$0xff]  ;;  %v72_v48 = vld [vmem:[%s10653_s0 + $0x1c8] sm:$0xff]  ;;  %vm2871_vm4 = vcmask 326912   ;;  %vm2878_vm5 = vcmask 392512  }
  0x2a   :  { %v71_v49 = vld [vmem:[%s10653_s0 + $0x1c0] sm:$0xff]  ;;  %v74_v52 = vld [vmem:[%s10653_s0 + $0x1d8] sm:$0xff]  ;;  %v73_v53 = vld [vmem:[%s10653_s0 + $0x1d0] sm:$0xff]  ;;  %vm2885_vm6 = vcmask 458112   ;;  %vm10661_vm7 = vcmask 523712   ;;  %vm2899_vm8 = vcmask 589312  }
  0x2b   :  { %592 = vadd.xlane.f32.xlu1 %v591_v42  ;;  %589 = vadd.xlane.f32.xlu0 %v588_v43  ;;  %v687_v42 = vsel %vm527_vm0, %v68_v40, 0.0  ;;  %v684_v43 = vsel %vm527_vm0, %v67_v41, 0.0  ;;  %v76_v56 = vld [vmem:[%s10653_s0 + $0x1e8] sm:$0xff]  ;;  %v75_v57 = vld [vmem:[%s10653_s0 + $0x1e0] sm:$0xff]  ;;  %v78_v60 = vld [vmem:[%s10653_s0 + $0x1f8] sm:$0xff]  ;;  %vm10658_vm9 = vcmask 654912  }
  0x2c   :  { %v77_v61 = vld [vmem:[%s10653_s0 + $0x1f0] sm:$0xff]  ;;  %v80_v0 = vld [vmem:[%s10653_s0 + $0x208] sm:$0xff]  ;;  %v79_v1 = vld [vmem:[%s10653_s0 + $0x200] sm:$0xff]  ;;  %vm2913_vm10 = vcmask 720512   ;;  %vm2920_vm11 = vcmask 786112   ;;  %vm10657_vm12 = vcmask 851712  }
  0x2d   :  { %v82_v4 = vld [vmem:[%s10653_s0 + $0x218] sm:$0xff]  ;;  %v81_v5 = vld [vmem:[%s10653_s0 + $0x210] sm:$0xff]  ;;  %v84_v9 = vld [vmem:[%s10653_s0 + $0x228] sm:$0xff]  ;;  %vm2934_vm13 = vcmask 917312   ;;  %vm2941_vm14 = vcmask 982912   ;;  %vm2948_vm15 = vcmask 1048512  }
  0x2e   :  { %v726_v8 = vsel %vm527_vm0, %v81_v5, 0.0  ;;  %v735_v12 = vsel %vm527_vm0, %v84_v9, 0.0  ;;  %v85_v16 = vld [vmem:[%s10653_s0 + $0x230] sm:$0xff]  ;;  %v88_v24 = vld [vmem:[%s10653_s0 + $0x248] sm:$0xff]  ;;  %v87_v29 = vld [vmem:[%s10653_s0 + $0x240] sm:$0xff] }
  0x2f   :  { %598 = vadd.xlane.f32.xlu1 %v597_v46  ;;  %595 = vadd.xlane.f32.xlu0 %v594_v47  ;;  %v693_v46 = vsel %vm527_vm0, %v70_v44, 0.0  ;;  %v690_v47 = vsel %vm527_vm0, %v69_v45, 0.0  ;;  %v747_v32 = vsel %vm527_vm0, %v88_v24, 0.0  ;;  %v90_v37 = vld [vmem:[%s10653_s0 + $0x258] sm:$0xff]  ;;  %v93_v5 = vld [vmem:[%s10653_s0 + $0x270] sm:$0xff] }
  0x33   :  { %604 = vadd.xlane.f32.xlu1 %v603_v50  ;;  %601 = vadd.xlane.f32.xlu0 %v600_v51  ;;  %v699_v50 = vsel %vm527_vm0, %v72_v48, 0.0  ;;  %v696_v51 = vsel %vm527_vm0, %v71_v49, 0.0 }
  0x37   :  { %610 = vadd.xlane.f32.xlu1 %v609_v54  ;;  %607 = vadd.xlane.f32.xlu0 %v606_v55  ;;  %v705_v54 = vsel %vm527_vm0, %v74_v52, 0.0  ;;  %v702_v55 = vsel %vm527_vm0, %v73_v53, 0.0 }
  0x3b   :  { %616 = vadd.xlane.f32.xlu1 %v615_v58  ;;  %613 = vadd.xlane.f32.xlu0 %v612_v59  ;;  %v711_v58 = vsel %vm527_vm0, %v76_v56, 0.0  ;;  %v708_v59 = vsel %vm527_vm0, %v75_v57, 0.0 }
  0x3f   :  { %622 = vadd.xlane.f32.xlu1 %v621_v62  ;;  %619 = vadd.xlane.f32.xlu0 %v618_v63  ;;  %v717_v62 = vsel %vm527_vm0, %v78_v60, 0.0  ;;  %v714_v63 = vsel %vm527_vm0, %v77_v61, 0.0 }
  0x43   :  { %628 = vadd.xlane.f32.xlu1 %v627_v2  ;;  %625 = vadd.xlane.f32.xlu0 %v624_v3  ;;  %v723_v2 = vsel %vm527_vm0, %v80_v0, 0.0  ;;  %v720_v3 = vsel %vm527_vm0, %v79_v1, 0.0 }
  0x47   :  { %634 = vadd.xlane.f32.xlu1 %v633_v6  ;;  %631 = vadd.xlane.f32.xlu0 %v630_v7  ;;  %v2839_v6 = vlaneseq  ;;  %v729_v7 = vsel %vm527_vm0, %v82_v4, 0.0  ;;  %v94_v4 = vld [vmem:[%s10653_s0 + $0x278] sm:$0xff] }
  0x4b   :  { %640 = vadd.xlane.f32.xlu1 %v639_v10  ;;  %637 = vadd.xlane.f32.xlu0 %v636_v11  ;;  %v83_v10 = vld [vmem:[%s10653_s0 + $0x220] sm:$0xff]  ;;  %v6610_v11 = vand.u32 127, %v2839_v6 }
  0x4c   :  { %v732_v13 = vsel %vm527_vm0, %v83_v10, 0.0 }
  0x4d   :  { %v2859_v17 = vadd.s32 4294967272, %v6610_v11  ;;  %v2873_v25 = vadd.s32 4294967256, %v6610_v11  ;;  %v2880_v40 = vadd.s32 4294967248, %v6610_v11  ;;  %v2901_v56 = vadd.s32 4294967224, %v6610_v11 }
  0x4e   :  { %v2894_v60 = vadd.s32 4294967232, %v6610_v11  ;;  %v2908_v10 = vadd.s32 4294967216, %v6610_v11 }
  0x4f   :  { %646 = vadd.xlane.f32.xlu1 %v645_v14  ;;  %643 = vadd.xlane.f32.xlu0 %v642_v15  ;;  %v6614_v14 = vshrl.u32 %v2839_v6, 7  ;;  %v86_v15 = vld [vmem:[%s10653_s0 + $0x238] sm:$0xff]  ;;  %v2915_v6 = vadd.s32 4294967208, %v6610_v11 }
  0x51   :  { %v6651_v36 = vsub.s32 %v2873_v25, %v6614_v14  ;;  %v6676_v53 = vsub.s32 %v2880_v40, %v6614_v14  ;;  %v6706_v9 = vsub.s32 %v2894_v60, %v6614_v14  ;;  %v6726_v25 = vsub.s32 %v2908_v10, %v6614_v14 }
  0x53   :  { %652 = vadd.xlane.f32.xlu1 %v651_v18  ;;  %649 = vadd.xlane.f32.xlu0 %v648_v19  ;;  %v2845_v18 = vadd.s32 4294967288, %v6610_v11  ;;  %v2852_v19 = vadd.s32 4294967280, %v6610_v11 }
  0x55   :  { %v6639_v28 = vsub.s32 %v2845_v18, %v6614_v14 }
  0x57   :  { %658 = vadd.xlane.f32.xlu1 %v657_v22  ;;  %655 = vadd.xlane.f32.xlu0 %v654_v23  ;;  %v741_v22 = vsel %vm527_vm0, %v86_v15, 0.0  ;;  %v738_v23 = vsel %vm527_vm0, %v85_v16, 0.0  ;;  %v762_v15 = vsel %vm527_vm0, %v93_v5, 0.0  ;;  %v101_v5 = vld [vmem:[%s10653_s0 + $0x2b0] sm:$0xff] }
  0x5b   :  { %664 = vadd.xlane.f32.xlu1 %v663_v26  ;;  %661 = vadd.xlane.f32.xlu0 %v660_v27  ;;  %v6633_v26 = vsub.s32 %v6610_v11, %v6614_v14  ;;  %v6636_v27 = vsub.s32 %v2859_v17, %v6614_v14 }
  0x5d   :  { %10662 = vst [vmem:[#allocation5_spill] sm:$0xff] %v6633_v26 }
  0x5f   :  { %670 = vadd.xlane.f32.xlu1 %v669_v30  ;;  %667 = vadd.xlane.f32.xlu0 %v666_v31  ;;  %v2866_v30 = vadd.s32 4294967264, %v6610_v11  ;;  %v6646_v31 = vsub.s32 %v2852_v19, %v6614_v14  ;;  %v6714_v19 = vsub.s32 %v2915_v6, %v6614_v14 }
  0x61   :  { %v6665_v44 = vsub.s32 %v2866_v30, %v6614_v14 }
  0x63   :  { %676 = vadd.xlane.f32.xlu1 %v675_v34  ;;  %673 = vadd.xlane.f32.xlu0 %v672_v35  ;;  %v744_v35 = vsel %vm527_vm0, %v87_v29, 0.0  ;;  %v2922_v29 = vadd.s32 4294967200, %v6610_v11 }
  0x67   :  { %682 = vadd.xlane.f32.xlu1 %v681_v38  ;;  %679 = vadd.xlane.f32.xlu0 %v678_v39  ;;  %v89_v38 = vld [vmem:[%s10653_s0 + $0x250] sm:$0xff]  ;;  %v2887_v39 = vadd.s32 4294967240, %v6610_v11 }
  0x68   :  { %v750_v48 = vsel %vm527_vm0, %v89_v38, 0.0 }
  0x69   :  { %v6673_v52 = vsub.s32 %v2887_v39, %v6614_v14  ;;  %v2936_v39 = vadd.s32 4294967184, %v6610_v11 }
  0x6b   :  { %688 = vadd.xlane.f32.xlu1 %v687_v42  ;;  %685 = vadd.xlane.f32.xlu0 %v684_v43 }
  0x6f   :  { %694 = vadd.xlane.f32.xlu1 %v693_v46  ;;  %691 = vadd.xlane.f32.xlu0 %v690_v47  ;;  %v753_v47 = vsel %vm527_vm0, %v90_v37, 0.0 }
  0x73   :  { %700 = vadd.xlane.f32.xlu1 %v699_v50  ;;  %697 = vadd.xlane.f32.xlu0 %v696_v51 }
  0x77   :  { %706 = vadd.xlane.f32.xlu1 %v705_v54  ;;  %703 = vadd.xlane.f32.xlu0 %v702_v55  ;;  %v92_v54 = vld [vmem:[%s10653_s0 + $0x268] sm:$0xff]  ;;  %v91_v55 = vld [vmem:[%s10653_s0 + $0x260] sm:$0xff] }
  0x7b   :  { %712 = vadd.xlane.f32.xlu1 %v711_v58  ;;  %709 = vadd.xlane.f32.xlu0 %v708_v59 }
  0x7f   :  { %718 = vadd.xlane.f32.xlu1 %v717_v62  ;;  %715 = vadd.xlane.f32.xlu0 %v714_v63  ;;  %v759_v62 = vsel %vm527_vm0, %v92_v54, 0.0  ;;  %v756_v63 = vsel %vm527_vm0, %v91_v55, 0.0  ;;  %v6754_v55 = vsub.s32 %v2936_v39, %v6614_v14 }
  0x83   :  { %724 = vadd.xlane.f32.xlu1 %v723_v2  ;;  %721 = vadd.xlane.f32.xlu0 %v720_v3  ;;  %v6694_v3 = vsub.s32 %v2901_v56, %v6614_v14 }
  0x87   :  { %730 = vadd.xlane.f32.xlu1 %v729_v7  ;;  %727 = vadd.xlane.f32.xlu0 %v726_v8 }
  0x8b   :  { %736 = vadd.xlane.f32.xlu1 %v735_v12  ;;  %733 = vadd.xlane.f32.xlu0 %v732_v13  ;;  %v765_v13 = vsel %vm527_vm0, %v94_v4, 0.0  ;;  %v102_v4 = vld [vmem:[%s10653_s0 + $0x2b8] sm:$0xff] }
  0x8c   :  { %v536_v20 = vpop.xlane.xlu1 %535  ;;  %v530_v21 = vpop.xlane.xlu0 %529  ;;  %v789_v10 = vsel %vm527_vm0, %v102_v4, 0.0 }
  0x8d   :  { %v2844_v41 = vrot.slane %v530_v21, %v6633_v26  ;;  %v2856_v45 = vrot.slane %v536_v20, %v6646_v31  ;;  %v96_v20 = vld [vmem:[%s10653_s0 + $0x288] sm:$0xff]  ;;  %v95_v21 = vld [vmem:[%s10653_s0 + $0x280] sm:$0xff] }
  0x8f   :  { %742 = vadd.xlane.f32.xlu1 %v741_v22  ;;  %739 = vadd.xlane.f32.xlu0 %v738_v23  ;;  %v2929_v22 = vadd.s32 4294967192, %v6610_v11 }
  0x90   :  { %v539_v33 = vpop.xlane.xlu1 %538  ;;  %v533_v34 = vpop.xlane.xlu0 %532 }
  0x91   :  { %v2863_v42 = vrot.slane %v539_v33, %v6636_v27  ;;  %v2849_v43 = vrot.slane %v533_v34, %v6639_v28  ;;  %v768_v33 = vsel %vm527_vm0, %v95_v21, 0.0  ;;  %v6734_v38 = vsub.s32 %v2929_v22, %v6614_v14 }
  0x93   :  { %v2851_v46 = vsel %vm2850_vm1, %v2849_v43, %v2844_v41  ;;  %748 = vadd.xlane.f32.xlu1 %v747_v32  ;;  %745 = vadd.xlane.f32.xlu0 %v744_v35  ;;  %v771_v32 = vsel %vm527_vm0, %v96_v20, 0.0  ;;  %v98_v43 = vld [vmem:[%s10653_s0 + $0x298] sm:$0xff] }
  0x94   :  { %v2858_v49 = vsel %vm2857_vm2, %v2856_v45, %v2851_v46  ;;  %v545_v50 = vpop.xlane.xlu1 %544  ;;  %v542_v51 = vpop.xlane.xlu0 %541  ;;  %v97_v45 = vld [vmem:[%s10653_s0 + $0x290] sm:$0xff]  ;;  %v2943_v46 = vadd.s32 4294967176, %v6610_v11 }
  0x95   :  { %v2877_v57 = vrot.slane %v545_v50, %v6651_v36  ;;  %v2865_v58 = vsel %vm2864_vm3, %v2863_v42, %v2858_v49  ;;  %v2870_v59 = vrot.slane %v542_v51, %v6665_v44  ;;  %v6740_v42 = vsub.s32 %v2922_v29, %v6614_v14 }
  0x96   :  { %v777_v51 = vsel %vm527_vm0, %v98_v43, 0.0  ;;  %v774_v54 = vsel %vm527_vm0, %v97_v45, 0.0 }
  0x97   :  { %v2872_v61 = vsel %vm2871_vm4, %v2870_v59, %v2865_v58  ;;  %754 = vadd.xlane.f32.xlu1 %v753_v47  ;;  %751 = vadd.xlane.f32.xlu0 %v750_v48  ;;  %v100_v58 = vld [vmem:[%s10653_s0 + $0x2a8] sm:$0xff]  ;;  %v99_v59 = vld [vmem:[%s10653_s0 + $0x2a0] sm:$0xff] }
  0x98   :  { %v551_v0 = vpop.xlane.xlu1 %550  ;;  %v2879_v1 = vsel %vm2878_vm5, %v2877_v57, %v2872_v61  ;;  %v548_v2 = vpop.xlane.xlu0 %547  ;;  %v6759_v57 = vsub.s32 %v2943_v46, %v6614_v14  ;;  %v780_v14 = vsel %vm527_vm0, %v99_v59, 0.0  ;;  %v108_v46 = vld [vmem:[%s10653_s0 + $0x2e8] sm:$0xff]  ;;  %v110_v59 = vld [vmem:[%s10653_s0 + $0x2f8] sm:$0xff] }
  0x99   :  { %v2891_v7 = vrot.slane %v551_v0, %v6673_v52  ;;  %v2884_v8 = vrot.slane %v548_v2, %v6676_v53 }
  0x9b   :  { %v2886_v12 = vsel %vm2885_vm6, %v2884_v8, %v2879_v1  ;;  %760 = vadd.xlane.f32.xlu1 %v759_v62  ;;  %757 = vadd.xlane.f32.xlu0 %v756_v63  ;;  %v783_v63 = vsel %vm527_vm0, %v100_v58, 0.0 }
  0x9c   :  { %v557_v16 = vpop.xlane.xlu1 %556  ;;  %v2893_v17 = vsel %vm10661_vm7, %v2891_v7, %v2886_v12  ;;  %v554_v18 = vpop.xlane.xlu0 %553  ;;  %v786_v12 = vsel %vm527_vm0, %v101_v5, 0.0  ;;  %v112_v5 = vld [vmem:[%s10653_s0 + $0x308] sm:$0xff] }
  0x9d   :  { %v2905_v23 = vrot.slane %v557_v16, %v6694_v3  ;;  %v2898_v24 = vrot.slane %v554_v18, %v6706_v9  ;;  %v103_v18 = vld [vmem:[%s10653_s0 + $0x2c0] sm:$0xff] }
  0x9f   :  { %v2900_v30 = vsel %vm2899_vm8, %v2898_v24, %v2893_v17  ;;  %766 = vadd.xlane.f32.xlu1 %v765_v13  ;;  %763 = vadd.xlane.f32.xlu0 %v762_v15  ;;  %v104_v17 = vld [vmem:[%s10653_s0 + $0x2c8] sm:$0xff]  ;;  %v792_v24 = vsel %vm527_vm0, %v103_v18, 0.0 }
  0xa0   :  { %v563_v34 = vpop.xlane.xlu1 %562  ;;  %v2907_v35 = vsel %vm10658_vm9, %v2905_v23, %v2900_v30  ;;  %v560_v37 = vpop.xlane.xlu0 %559  ;;  %v795_v23 = vsel %vm527_vm0, %v104_v17, 0.0 }
  0xa1   :  { %v2919_v40 = vrot.slane %v563_v34, %v6714_v19  ;;  %v2912_v41 = vrot.slane %v560_v37, %v6726_v25 }
  0xa3   :  { %v2914_v47 = vsel %vm2913_vm10, %v2912_v41, %v2907_v35  ;;  %772 = vadd.xlane.f32.xlu1 %v771_v32  ;;  %769 = vadd.xlane.f32.xlu0 %v768_v33  ;;  %v106_v32 = vld [vmem:[%s10653_s0 + $0x2d8] sm:$0xff]  ;;  %v105_v33 = vld [vmem:[%s10653_s0 + $0x2d0] sm:$0xff] }
  0xa4   :  { %v569_v48 = vpop.xlane.xlu1 %568  ;;  %v2921_v49 = vsel %vm2920_vm11, %v2919_v40, %v2914_v47  ;;  %v566_v50 = vpop.xlane.xlu0 %565  ;;  %v801_v40 = vsel %vm527_vm0, %v106_v32, 0.0  ;;  %v798_v41 = vsel %vm527_vm0, %v105_v33, 0.0  ;;  %v107_v47 = vld [vmem:[%s10653_s0 + $0x2e0] sm:$0xff] }
  0xa5   :  { %v2933_v56 = vrot.slane %v569_v48, %v6734_v38  ;;  %v2926_v11 = vrot.slane %v566_v50, %v6740_v42 }
  0xa7   :  { %v2928_v60 = vsel %vm10657_vm12, %v2926_v11, %v2921_v49  ;;  %778 = vadd.xlane.f32.xlu1 %v777_v51  ;;  %775 = vadd.xlane.f32.xlu0 %v774_v54  ;;  %v807_v54 = vsel %vm527_vm0, %v108_v46, 0.0 }
  0xa8   :  { %v575_v61 = vpop.xlane.xlu1 %574  ;;  %v572_v62 = vpop.xlane.xlu0 %571  ;;  %v2935_v0 = vsel %vm2934_vm13, %v2933_v56, %v2928_v60  ;;  %v804_v56 = vsel %vm527_vm0, %v107_v47, 0.0  ;;  %v109_v60 = vld [vmem:[%s10653_s0 + $0x2f0] sm:$0xff] }
  0xa9   :  { %v2947_v1 = vrot.slane %v575_v61, %v6759_v57  ;;  %v2940_v2 = vrot.slane %v572_v62, %v6754_v55 }
  0xab   :  { %784 = vadd.xlane.f32.xlu1 %v783_v63  ;;  %781 = vadd.xlane.f32.xlu0 %v780_v14  ;;  %v2942_v6 = vsel %vm2941_vm14, %v2940_v2, %v2935_v0  ;;  %v813_v0 = vsel %vm527_vm0, %v110_v59, 0.0 }
  0xac   :  { %v581_v7 = vpop.xlane.xlu1 %580  ;;  %v578_v8 = vpop.xlane.xlu0 %577  ;;  %v6783_v13 = vsel %vm2948_vm15, %v2947_v1, %v2942_v6  ;;  %v810_v1 = vsel %vm527_vm0, %v109_v60, 0.0  ;;  %v111_v6 = vld [vmem:[%s10653_s0 + $0x300] sm:$0xff] }
  0xad   :  { %v2957_v15 = vrot.slane %v581_v7, %v6639_v28  ;;  %v2953_v16 = vrot.slane %v578_v8, %v6633_v26 }
  0xaf   :  { %v2958_v20 = vsel %vm2850_vm1, %v2957_v15, %v2953_v16  ;;  %790 = vadd.xlane.f32.xlu1 %v789_v10  ;;  %787 = vadd.xlane.f32.xlu0 %v786_v12  ;;  %v819_v15 = vsel %vm527_vm0, %v112_v5, 0.0  ;;  %v816_v16 = vsel %vm527_vm0, %v111_v6, 0.0 }
  0xb0   :  { %v587_v21 = vpop.xlane.xlu1 %586  ;;  %v584_v22 = vpop.xlane.xlu0 %583 }
  0xb1   :  { %v2967_v29 = vrot.slane %v587_v21, %v6636_v27  ;;  %v2962_v30 = vrot.slane %v584_v22, %v6646_v31  ;;  %v113_v21 = vld [vmem:[%s10653_s0 + $0x310] sm:$0xff] }
  0xb2   :  { %v822_v32 = vsel %vm527_vm0, %v113_v21, 0.0 }
  0xb3   :  { %v2963_v34 = vsel %vm2857_vm2, %v2962_v30, %v2958_v20  ;;  %796 = vadd.xlane.f32.xlu1 %v795_v23  ;;  %793 = vadd.xlane.f32.xlu0 %v792_v24  ;;  %v114_v20 = vld [vmem:[%s10653_s0 + $0x318] sm:$0xff] }
  0xb4   :  { %v593_v35 = vpop.xlane.xlu1 %592  ;;  %v2968_v37 = vsel %vm2864_vm3, %v2967_v29, %v2963_v34  ;;  %v590_v39 = vpop.xlane.xlu0 %589  ;;  %v825_v30 = vsel %vm527_vm0, %v114_v20, 0.0 }
  0xb5   :  { %v2977_v43 = vrot.slane %v593_v35, %v6651_v36  ;;  %v2972_v45 = vrot.slane %v590_v39, %v6665_v44  ;;  %v116_v35 = vld [vmem:[%s10653_s0 + $0x328] sm:$0xff] }
  0xb7   :  { %v2973_v48 = vsel %vm2871_vm4, %v2972_v45, %v2968_v37  ;;  %802 = vadd.xlane.f32.xlu1 %v801_v40  ;;  %799 = vadd.xlane.f32.xlu0 %v798_v41  ;;  %v115_v37 = vld [vmem:[%s10653_s0 + $0x320] sm:$0xff] }
  0xb8   :  { %v599_v49 = vpop.xlane.xlu1 %598  ;;  %v2978_v50 = vsel %vm2878_vm5, %v2977_v43, %v2973_v48  ;;  %v596_v51 = vpop.xlane.xlu0 %595  ;;  %v831_v43 = vsel %vm527_vm0, %v116_v35, 0.0  ;;  %v828_v45 = vsel %vm527_vm0, %v115_v37, 0.0 }
  0xb9   :  { %v2987_v11 = vrot.slane %v599_v49, %v6673_v52  ;;  %v2982_v58 = vrot.slane %v596_v51, %v6676_v53  ;;  %v118_v49 = vld [vmem:[%s10653_s0 + $0x338] sm:$0xff] }
  0xbb   :  { %v2983_v61 = vsel %vm2885_vm6, %v2982_v58, %v2978_v50  ;;  %808 = vadd.xlane.f32.xlu1 %v807_v54  ;;  %805 = vadd.xlane.f32.xlu0 %v804_v56  ;;  %v117_v50 = vld [vmem:[%s10653_s0 + $0x330] sm:$0xff] }
  0xbc   :  { %v605_v62 = vpop.xlane.xlu1 %604  ;;  %v2988_v63 = vsel %vm10661_vm7, %v2987_v11, %v2983_v61  ;;  %v602_v14 = vpop.xlane.xlu0 %601  ;;  %v837_v11 = vsel %vm527_vm0, %v118_v49, 0.0  ;;  %v834_v58 = vsel %vm527_vm0, %v117_v50, 0.0 }
  0xbd   :  { %v2997_v2 = vrot.slane %v605_v62, %v6694_v3  ;;  %v2992_v4 = vrot.slane %v602_v14, %v6706_v9  ;;  %v120_v62 = vld [vmem:[%s10653_s0 + $0x348] sm:$0xff] }
  0xbf   :  { %v2993_v7 = vsel %vm2899_vm8, %v2992_v4, %v2988_v63  ;;  %814 = vadd.xlane.f32.xlu1 %v813_v0  ;;  %811 = vadd.xlane.f32.xlu0 %v810_v1  ;;  %v119_v63 = vld [vmem:[%s10653_s0 + $0x340] sm:$0xff] }
  0xc0   :  { %v611_v8 = vpop.xlane.xlu1 %610  ;;  %v2998_v10 = vsel %vm10658_vm9, %v2997_v2, %v2993_v7  ;;  %v608_v12 = vpop.xlane.xlu0 %607  ;;  %v843_v2 = vsel %vm527_vm0, %v120_v62, 0.0  ;;  %v840_v4 = vsel %vm527_vm0, %v119_v63, 0.0  ;;  %v122_v7 = vld [vmem:[%s10653_s0 + $0x358] sm:$0xff] }
  0xc1   :  { %v3007_v17 = vrot.slane %v611_v8, %v6714_v19  ;;  %v3002_v18 = vrot.slane %v608_v12, %v6726_v25  ;;  %v121_v8 = vld [vmem:[%s10653_s0 + $0x350] sm:$0xff] }
  0xc3   :  { %v3003_v22 = vsel %vm2913_vm10, %v3002_v18, %v2998_v10  ;;  %820 = vadd.xlane.f32.xlu1 %v819_v15  ;;  %817 = vadd.xlane.f32.xlu0 %v816_v16  ;;  %v846_v18 = vsel %vm527_vm0, %v121_v8, 0.0 }
  0xc4   :  { %v617_v23 = vpop.xlane.xlu1 %616  ;;  %v3008_v24 = vsel %vm2920_vm11, %v3007_v17, %v3003_v22  ;;  %v614_v29 = vpop.xlane.xlu0 %613  ;;  %v849_v17 = vsel %vm527_vm0, %v122_v7, 0.0  ;;  %v124_v22 = vld [vmem:[%s10653_s0 + $0x368] sm:$0xff] }
  0xc5   :  { %v3017_v33 = vrot.slane %v617_v23, %v6734_v38  ;;  %v3012_v34 = vrot.slane %v614_v29, %v6740_v42  ;;  %v123_v23 = vld [vmem:[%s10653_s0 + $0x360] sm:$0xff] }
  0xc7   :  { %v3013_v39 = vsel %vm10657_vm12, %v3012_v34, %v3008_v24  ;;  %826 = vadd.xlane.f32.xlu1 %v825_v30  ;;  %823 = vadd.xlane.f32.xlu0 %v822_v32  ;;  %v852_v34 = vsel %vm527_vm0, %v123_v23, 0.0 }
  0xc8   :  { %v623_v40 = vpop.xlane.xlu1 %622  ;;  %v620_v41 = vpop.xlane.xlu0 %619  ;;  %v3018_v46 = vsel %vm2934_vm13, %v3017_v33, %v3013_v39  ;;  %v855_v33 = vsel %vm527_vm0, %v124_v22, 0.0  ;;  %v126_v39 = vld [vmem:[%s10653_s0 + $0x378] sm:$0xff] }
  0xc9   :  { %v3027_v47 = vrot.slane %v623_v40, %v6759_v57  ;;  %v3022_v48 = vrot.slane %v620_v41, %v6754_v55  ;;  %v125_v40 = vld [vmem:[%s10653_s0 + $0x370] sm:$0xff] }
  0xcb   :  { %832 = vadd.xlane.f32.xlu1 %v831_v43  ;;  %829 = vadd.xlane.f32.xlu0 %v828_v45  ;;  %v3023_v51 = vsel %vm2941_vm14, %v3022_v48, %v3018_v46  ;;  %v858_v48 = vsel %vm527_vm0, %v125_v40, 0.0 }
  0xcc   :  { %v629_v54 = vpop.xlane.xlu1 %628  ;;  %v626_v56 = vpop.xlane.xlu0 %625  ;;  %v6880_v59 = vsel %vm2948_vm15, %v3027_v47, %v3023_v51  ;;  %v861_v47 = vsel %vm527_vm0, %v126_v39, 0.0  ;;  %v128_v51 = vld [vmem:[%s10653_s0 + $0x388] sm:$0xff] }
  0xcd   :  { %v3036_v60 = vrot.slane %v629_v54, %v6639_v28  ;;  %v3032_v61 = vrot.slane %v626_v56, %v6633_v26  ;;  %v127_v54 = vld [vmem:[%s10653_s0 + $0x380] sm:$0xff] }
  0xce   :  { %v864_v62 = vsel %vm527_vm0, %v127_v54, 0.0 }
  0xcf   :  { %v3037_v14 = vsel %vm2850_vm1, %v3036_v60, %v3032_v61  ;;  %838 = vadd.xlane.f32.xlu1 %v837_v11  ;;  %835 = vadd.xlane.f32.xlu0 %v834_v58  ;;  %v867_v61 = vsel %vm527_vm0, %v128_v51, 0.0 }
  0xd0   :  { %v635_v0 = vpop.xlane.xlu1 %634  ;;  %v632_v1 = vpop.xlane.xlu0 %631 }
  0xd1   :  { %v3046_v5 = vrot.slane %v635_v0, %v6636_v27  ;;  %v3041_v6 = vrot.slane %v632_v1, %v6646_v31  ;;  %v130_v0 = vld [vmem:[%s10653_s0 + $0x398] sm:$0xff]  ;;  %v129_v1 = vld [vmem:[%s10653_s0 + $0x390] sm:$0xff] }
  0xd2   :  { %v873_v7 = vsel %vm527_vm0, %v130_v0, 0.0  ;;  %v870_v8 = vsel %vm527_vm0, %v129_v1, 0.0 }
  0xd3   :  { %v3042_v10 = vsel %vm2857_vm2, %v3041_v6, %v3037_v14  ;;  %844 = vadd.xlane.f32.xlu1 %v843_v2  ;;  %841 = vadd.xlane.f32.xlu0 %v840_v4 }
  0xd4   :  { %v641_v12 = vpop.xlane.xlu1 %640  ;;  %v3047_v15 = vsel %vm2864_vm3, %v3046_v5, %v3042_v10  ;;  %v638_v16 = vpop.xlane.xlu0 %637 }
  0xd5   :  { %v3056_v20 = vrot.slane %v641_v12, %v6651_v36  ;;  %v3051_v21 = vrot.slane %v638_v16, %v6665_v44  ;;  %v131_v16 = vld [vmem:[%s10653_s0 + $0x3a0] sm:$0xff] }
  0xd6   :  { %v876_v22 = vsel %vm527_vm0, %v131_v16, 0.0 }
  0xd7   :  { %v3052_v24 = vsel %vm2871_vm4, %v3051_v21, %v3047_v15  ;;  %850 = vadd.xlane.f32.xlu1 %v849_v17  ;;  %847 = vadd.xlane.f32.xlu0 %v846_v18  ;;  %v132_v15 = vld [vmem:[%s10653_s0 + $0x3a8] sm:$0xff] }
  0xd8   :  { %v647_v29 = vpop.xlane.xlu1 %646  ;;  %v3057_v30 = vsel %vm2878_vm5, %v3056_v20, %v3052_v24  ;;  %v644_v32 = vpop.xlane.xlu0 %643  ;;  %v879_v21 = vsel %vm527_vm0, %v132_v15, 0.0 }
  0xd9   :  { %v3066_v35 = vrot.slane %v647_v29, %v6673_v52  ;;  %v3061_v37 = vrot.slane %v644_v32, %v6676_v53  ;;  %v133_v32 = vld [vmem:[%s10653_s0 + $0x3b0] sm:$0xff] }
  0xda   :  { %v882_v39 = vsel %vm527_vm0, %v133_v32, 0.0 }
  0xdb   :  { %v3062_v41 = vsel %vm2885_vm6, %v3061_v37, %v3057_v30  ;;  %856 = vadd.xlane.f32.xlu1 %v855_v33  ;;  %853 = vadd.xlane.f32.xlu0 %v852_v34  ;;  %v134_v30 = vld [vmem:[%s10653_s0 + $0x3b8] sm:$0xff] }
  0xdc   :  { %v653_v43 = vpop.xlane.xlu1 %652  ;;  %v3067_v45 = vsel %vm10661_vm7, %v3066_v35, %v3062_v41  ;;  %v650_v46 = vpop.xlane.xlu0 %649  ;;  %v885_v37 = vsel %vm527_vm0, %v134_v30, 0.0 }
  0xdd   :  { %v3076_v49 = vrot.slane %v653_v43, %v6694_v3  ;;  %v3071_v50 = vrot.slane %v650_v46, %v6706_v9  ;;  %v135_v46 = vld [vmem:[%s10653_s0 + $0x3c0] sm:$0xff] }
  0xde   :  { %v888_v51 = vsel %vm527_vm0, %v135_v46, 0.0 }
  0xdf   :  { %v3072_v56 = vsel %vm2899_vm8, %v3071_v50, %v3067_v45  ;;  %862 = vadd.xlane.f32.xlu1 %v861_v47  ;;  %859 = vadd.xlane.f32.xlu0 %v858_v48  ;;  %v136_v45 = vld [vmem:[%s10653_s0 + $0x3c8] sm:$0xff] }
  0xe0   :  { %v659_v11 = vpop.xlane.xlu1 %658  ;;  %v3077_v58 = vsel %vm10658_vm9, %v3076_v49, %v3072_v56  ;;  %v656_v60 = vpop.xlane.xlu0 %655  ;;  %v891_v50 = vsel %vm527_vm0, %v136_v45, 0.0 }
  0xe1   :  { %v3086_v63 = vrot.slane %v659_v11, %v6714_v19  ;;  %v3081_v14 = vrot.slane %v656_v60, %v6726_v25  ;;  %v138_v11 = vld [vmem:[%s10653_s0 + $0x3d8] sm:$0xff] }
  0xe3   :  { %v3082_v2 = vsel %vm2913_vm10, %v3081_v14, %v3077_v58  ;;  %868 = vadd.xlane.f32.xlu1 %v867_v61  ;;  %865 = vadd.xlane.f32.xlu0 %v864_v62  ;;  %v137_v58 = vld [vmem:[%s10653_s0 + $0x3d0] sm:$0xff]  ;;  %v897_v14 = vsel %vm527_vm0, %v138_v11, 0.0 }
  0xe4   :  { %v665_v4 = vpop.xlane.xlu1 %664  ;;  %v3087_v5 = vsel %vm2920_vm11, %v3086_v63, %v3082_v2  ;;  %v662_v6 = vpop.xlane.xlu0 %661  ;;  %v894_v0 = vsel %vm527_vm0, %v137_v58, 0.0 }
  0xe5   :  { %v3096_v10 = vrot.slane %v665_v4, %v6734_v38  ;;  %v3091_v12 = vrot.slane %v662_v6, %v6740_v42  ;;  %v140_v4 = vld [vmem:[%s10653_s0 + $0x3e8] sm:$0xff] }
  0xe7   :  { %v3092_v17 = vsel %vm10657_vm12, %v3091_v12, %v3087_v5  ;;  %874 = vadd.xlane.f32.xlu1 %v873_v7  ;;  %871 = vadd.xlane.f32.xlu0 %v870_v8  ;;  %v139_v5 = vld [vmem:[%s10653_s0 + $0x3e0] sm:$0xff]  ;;  %v903_v12 = vsel %vm527_vm0, %v140_v4, 0.0 }
  0xe8   :  { %v671_v18 = vpop.xlane.xlu1 %670  ;;  %v668_v20 = vpop.xlane.xlu0 %667  ;;  %v3097_v23 = vsel %vm2934_vm13, %v3096_v10, %v3092_v17  ;;  %v900_v15 = vsel %vm527_vm0, %v139_v5, 0.0 }
  0xe9   :  { %v3106_v24 = vrot.slane %v671_v18, %v6759_v57  ;;  %v3101_v29 = vrot.slane %v668_v20, %v6754_v55  ;;  %v142_v18 = vld [vmem:[%s10653_s0 + $0x3f8] sm:$0xff]  ;;  %v141_v20 = vld [vmem:[%s10653_s0 + $0x3f0] sm:$0xff] }
  0xea   :  { %v906_v30 = vsel %vm527_vm0, %v141_v20, 0.0 }
  0xeb   :  { %880 = vadd.xlane.f32.xlu1 %v879_v21  ;;  %877 = vadd.xlane.f32.xlu0 %v876_v22  ;;  %v3102_v33 = vsel %vm2941_vm14, %v3101_v29, %v3097_v23  ;;  %v909_v29 = vsel %vm527_vm0, %v142_v18, 0.0 }
  0xec   :  { %v677_v34 = vpop.xlane.xlu1 %676  ;;  %v674_v35 = vpop.xlane.xlu0 %673  ;;  %v6977_v40 = vsel %vm2948_vm15, %v3106_v24, %v3102_v33 }
  0xed   :  { %v3115_v41 = vrot.slane %v677_v34, %v6639_v28  ;;  %v3111_v43 = vrot.slane %v674_v35, %v6633_v26  ;;  %v144_v34 = vld [vmem:[%s10653_s0 + $0x408] sm:$0xff]  ;;  %v143_v35 = vld [vmem:[%s10653_s0 + $0x400] sm:$0xff] }
  0xee   :  { %v915_v45 = vsel %vm527_vm0, %v144_v34, 0.0  ;;  %v912_v46 = vsel %vm527_vm0, %v143_v35, 0.0 }
  0xef   :  { %v3116_v47 = vsel %vm2850_vm1, %v3115_v41, %v3111_v43  ;;  %886 = vadd.xlane.f32.xlu1 %v885_v37  ;;  %883 = vadd.xlane.f32.xlu0 %v882_v39 }
  0xf0   :  { %v683_v48 = vpop.xlane.xlu1 %682  ;;  %v680_v49 = vpop.xlane.xlu0 %679 }
  0xf1   :  { %v3125_v54 = vrot.slane %v683_v48, %v6636_v27  ;;  %v3120_v56 = vrot.slane %v680_v49, %v6646_v31  ;;  %v146_v49 = vld [vmem:[%s10653_s0 + $0x418] sm:$0xff] }
  0xf2   :  { %v921_v58 = vsel %vm527_vm0, %v146_v49, 0.0 }
  0xf3   :  { %v3121_v60 = vsel %vm2857_vm2, %v3120_v56, %v3116_v47  ;;  %892 = vadd.xlane.f32.xlu1 %v891_v50  ;;  %889 = vadd.xlane.f32.xlu0 %v888_v51  ;;  %v145_v50 = vld [vmem:[%s10653_s0 + $0x410] sm:$0xff] }
  0xf4   :  { %v689_v61 = vpop.xlane.xlu1 %688  ;;  %v3126_v62 = vsel %vm2864_vm3, %v3125_v54, %v3121_v60  ;;  %v686_v63 = vpop.xlane.xlu0 %685  ;;  %v918_v60 = vsel %vm527_vm0, %v145_v50, 0.0 }
  0xf5   :  { %v3135_v1 = vrot.slane %v689_v61, %v6651_v36  ;;  %v3130_v2 = vrot.slane %v686_v63, %v6665_v44  ;;  %v148_v63 = vld [vmem:[%s10653_s0 + $0x428] sm:$0xff] }
  0xf6   :  { %v927_v4 = vsel %vm527_vm0, %v148_v63, 0.0 }
  0xf7   :  { %v3131_v6 = vsel %vm2871_vm4, %v3130_v2, %v3126_v62  ;;  %898 = vadd.xlane.f32.xlu1 %v897_v14  ;;  %895 = vadd.xlane.f32.xlu0 %v894_v0  ;;  %v147_v14 = vld [vmem:[%s10653_s0 + $0x420] sm:$0xff] }
  0xf8   :  { %v695_v7 = vpop.xlane.xlu1 %694  ;;  %v3136_v8 = vsel %vm2878_vm5, %v3135_v1, %v3131_v6  ;;  %v692_v10 = vpop.xlane.xlu0 %691  ;;  %v924_v5 = vsel %vm527_vm0, %v147_v14, 0.0 }
  0xf9   :  { %v3145_v16 = vrot.slane %v695_v7, %v6673_v52  ;;  %v3140_v17 = vrot.slane %v692_v10, %v6676_v53  ;;  %v150_v10 = vld [vmem:[%s10653_s0 + $0x438] sm:$0xff] }
  0xfa   :  { %v933_v18 = vsel %vm527_vm0, %v150_v10, 0.0 }
  0xfb   :  { %v3141_v21 = vsel %vm2885_vm6, %v3140_v17, %v3136_v8  ;;  %904 = vadd.xlane.f32.xlu1 %v903_v12  ;;  %901 = vadd.xlane.f32.xlu0 %v900_v15  ;;  %v149_v12 = vld [vmem:[%s10653_s0 + $0x430] sm:$0xff] }
  0xfc   :  { %v701_v22 = vpop.xlane.xlu1 %700  ;;  %v3146_v23 = vsel %vm10661_vm7, %v3145_v16, %v3141_v21  ;;  %v698_v24 = vpop.xlane.xlu0 %697  ;;  %v930_v20 = vsel %vm527_vm0, %v149_v12, 0.0 }
  0xfd   :  { %v3155_v32 = vrot.slane %v701_v22, %v6694_v3  ;;  %v3150_v33 = vrot.slane %v698_v24, %v6706_v9  ;;  %v152_v24 = vld [vmem:[%s10653_s0 + $0x448] sm:$0xff] }
  0xfe   :  { %v939_v34 = vsel %vm527_vm0, %v152_v24, 0.0 }
  0xff   :  { %v3151_v37 = vsel %vm2899_vm8, %v3150_v33, %v3146_v23  ;;  %910 = vadd.xlane.f32.xlu1 %v909_v29  ;;  %907 = vadd.xlane.f32.xlu0 %v906_v30  ;;  %v151_v29 = vld [vmem:[%s10653_s0 + $0x440] sm:$0xff] }
 0x100   :  { %v707_v39 = vpop.xlane.xlu1 %706  ;;  %v3156_v41 = vsel %vm10658_vm9, %v3155_v32, %v3151_v37  ;;  %v704_v43 = vpop.xlane.xlu0 %703  ;;  %v936_v35 = vsel %vm527_vm0, %v151_v29, 0.0 }
 0x101   :  { %v3165_v47 = vrot.slane %v707_v39, %v6714_v19  ;;  %v3160_v48 = vrot.slane %v704_v43, %v6726_v25  ;;  %v153_v43 = vld [vmem:[%s10653_s0 + $0x450] sm:$0xff] }
 0x102   :  { %v942_v50 = vsel %vm527_vm0, %v153_v43, 0.0 }
 0x103   :  { %v3161_v51 = vsel %vm2913_vm10, %v3160_v48, %v3156_v41  ;;  %916 = vadd.xlane.f32.xlu1 %v915_v45  ;;  %913 = vadd.xlane.f32.xlu0 %v912_v46  ;;  %v154_v41 = vld [vmem:[%s10653_s0 + $0x458] sm:$0xff] }
 0x104   :  { %v713_v54 = vpop.xlane.xlu1 %712  ;;  %v3166_v56 = vsel %vm2920_vm11, %v3165_v47, %v3161_v51  ;;  %v710_v11 = vpop.xlane.xlu0 %709  ;;  %v945_v49 = vsel %vm527_vm0, %v154_v41, 0.0 }
 0x105   :  { %v3175_v61 = vrot.slane %v713_v54, %v6734_v38  ;;  %v3170_v62 = vrot.slane %v710_v11, %v6740_v42  ;;  %v155_v11 = vld [vmem:[%s10653_s0 + $0x460] sm:$0xff] }
 0x106   :  { %v948_v14 = vsel %vm527_vm0, %v155_v11, 0.0 }
 0x107   :  { %v3171_v0 = vsel %vm10657_vm12, %v3170_v62, %v3166_v56  ;;  %922 = vadd.xlane.f32.xlu1 %v921_v58  ;;  %919 = vadd.xlane.f32.xlu0 %v918_v60  ;;  %v156_v56 = vld [vmem:[%s10653_s0 + $0x468] sm:$0xff] }
 0x108   :  { %v719_v1 = vpop.xlane.xlu1 %718  ;;  %v716_v2 = vpop.xlane.xlu0 %715  ;;  %v3176_v6 = vsel %vm2934_vm13, %v3175_v61, %v3171_v0  ;;  %v951_v63 = vsel %vm527_vm0, %v156_v56, 0.0 }
 0x109   :  { %v3185_v7 = vrot.slane %v719_v1, %v6759_v57  ;;  %v3180_v8 = vrot.slane %v716_v2, %v6754_v55  ;;  %v158_v2 = vld [vmem:[%s10653_s0 + $0x478] sm:$0xff] }
 0x10a   :  { %v957_v10 = vsel %vm527_vm0, %v158_v2, 0.0 }
 0x10b   :  { %928 = vadd.xlane.f32.xlu1 %v927_v4  ;;  %925 = vadd.xlane.f32.xlu0 %v924_v5  ;;  %v3181_v15 = vsel %vm2941_vm14, %v3180_v8, %v3176_v6  ;;  %v157_v4 = vld [vmem:[%s10653_s0 + $0x470] sm:$0xff] }
 0x10c   :  { %v725_v16 = vpop.xlane.xlu1 %724  ;;  %v722_v17 = vpop.xlane.xlu0 %721  ;;  %v7074_v21 = vsel %vm2948_vm15, %v3185_v7, %v3181_v15  ;;  %v954_v12 = vsel %vm527_vm0, %v157_v4, 0.0 }
 0x10d   :  { %v3194_v22 = vrot.slane %v725_v16, %v6639_v28  ;;  %v3190_v23 = vrot.slane %v722_v17, %v6633_v26  ;;  %v160_v17 = vld [vmem:[%s10653_s0 + $0x488] sm:$0xff] }
 0x10e   :  { %v963_v29 = vsel %vm527_vm0, %v160_v17, 0.0 }
 0x10f   :  { %v3195_v30 = vsel %vm2850_vm1, %v3194_v22, %v3190_v23  ;;  %934 = vadd.xlane.f32.xlu1 %v933_v18  ;;  %931 = vadd.xlane.f32.xlu0 %v930_v20  ;;  %v159_v18 = vld [vmem:[%s10653_s0 + $0x480] sm:$0xff] }
 0x110   :  { %v731_v32 = vpop.xlane.xlu1 %730  ;;  %v728_v33 = vpop.xlane.xlu0 %727 }
 0x111   :  { %v3204_v37 = vrot.slane %v731_v32, %v6636_v27  ;;  %v3199_v39 = vrot.slane %v728_v33, %v6646_v31 }
 0x113   :  { %v3200_v45 = vsel %vm2857_vm2, %v3199_v39, %v3195_v30  ;;  %940 = vadd.xlane.f32.xlu1 %v939_v34  ;;  %937 = vadd.xlane.f32.xlu0 %v936_v35  ;;  %v960_v30 = vsel %vm527_vm0, %v159_v18, 0.0  ;;  %v162_v34 = vld [vmem:[%s10653_s0 + $0x498] sm:$0xff]  ;;  %v161_v35 = vld [vmem:[%s10653_s0 + $0x490] sm:$0xff] }
 0x114   :  { %v737_v46 = vpop.xlane.xlu1 %736  ;;  %v3205_v47 = vsel %vm2864_vm3, %v3204_v37, %v3200_v45  ;;  %v734_v48 = vpop.xlane.xlu0 %733  ;;  %v969_v45 = vsel %vm527_vm0, %v162_v34, 0.0 }
 0x115   :  { %v3214_v51 = vrot.slane %v737_v46, %v6651_v36  ;;  %v3209_v54 = vrot.slane %v734_v48, %v6665_v44  ;;  %v966_v46 = vsel %vm527_vm0, %v161_v35, 0.0 }
 0x117   :  { %v3210_v58 = vsel %vm2871_vm4, %v3209_v54, %v3205_v47  ;;  %946 = vadd.xlane.f32.xlu1 %v945_v49  ;;  %943 = vadd.xlane.f32.xlu0 %v942_v50  ;;  %v164_v49 = vld [vmem:[%s10653_s0 + $0x4a8] sm:$0xff]  ;;  %v163_v50 = vld [vmem:[%s10653_s0 + $0x4a0] sm:$0xff] }
 0x118   :  { %v743_v60 = vpop.xlane.xlu1 %742  ;;  %v3215_v61 = vsel %vm2878_vm5, %v3214_v51, %v3210_v58  ;;  %v740_v62 = vpop.xlane.xlu0 %739  ;;  %v975_v58 = vsel %vm527_vm0, %v164_v49, 0.0 }
 0x119   :  { %v3224_v0 = vrot.slane %v743_v60, %v6673_v52  ;;  %v3219_v1 = vrot.slane %v740_v62, %v6676_v53  ;;  %v972_v60 = vsel %vm527_vm0, %v163_v50, 0.0 }
 0x11b   :  { %v3220_v5 = vsel %vm2885_vm6, %v3219_v1, %v3215_v61  ;;  %952 = vadd.xlane.f32.xlu1 %v951_v63  ;;  %949 = vadd.xlane.f32.xlu0 %v948_v14  ;;  %v166_v63 = vld [vmem:[%s10653_s0 + $0x4b8] sm:$0xff]  ;;  %v165_v14 = vld [vmem:[%s10653_s0 + $0x4b0] sm:$0xff] }
 0x11c   :  { %v749_v6 = vpop.xlane.xlu1 %748  ;;  %v3225_v7 = vsel %vm10661_vm7, %v3224_v0, %v3220_v5  ;;  %v746_v8 = vpop.xlane.xlu0 %745  ;;  %v981_v4 = vsel %vm527_vm0, %v166_v63, 0.0  ;;  %v978_v5 = vsel %vm527_vm0, %v165_v14, 0.0 }
 0x11d   :  { %v3234_v15 = vrot.slane %v749_v6, %v6694_v3  ;;  %v3229_v16 = vrot.slane %v746_v8, %v6706_v9 }
 0x11f   :  { %v3230_v20 = vsel %vm2899_vm8, %v3229_v16, %v3225_v7  ;;  %958 = vadd.xlane.f32.xlu1 %v957_v10  ;;  %955 = vadd.xlane.f32.xlu0 %v954_v12  ;;  %v168_v10 = vld [vmem:[%s10653_s0 + $0x4c8] sm:$0xff]  ;;  %v167_v12 = vld [vmem:[%s10653_s0 + $0x4c0] sm:$0xff] }
 0x120   :  { %v755_v22 = vpop.xlane.xlu1 %754  ;;  %v3235_v23 = vsel %vm10658_vm9, %v3234_v15, %v3230_v20  ;;  %v752_v24 = vpop.xlane.xlu0 %751  ;;  %v987_v18 = vsel %vm527_vm0, %v168_v10, 0.0  ;;  %v984_v20 = vsel %vm527_vm0, %v167_v12, 0.0 }
 0x121   :  { %v3244_v32 = vrot.slane %v755_v22, %v6714_v19  ;;  %v3239_v33 = vrot.slane %v752_v24, %v6726_v25  ;;  %v170_v24 = vld [vmem:[%s10653_s0 + $0x4d8] sm:$0xff] }
 0x122   :  { %v993_v35 = vsel %vm527_vm0, %v170_v24, 0.0 }
 0x123   :  { %v3240_v37 = vsel %vm2913_vm10, %v3239_v33, %v3235_v23  ;;  %964 = vadd.xlane.f32.xlu1 %v963_v29  ;;  %961 = vadd.xlane.f32.xlu0 %v960_v30  ;;  %v169_v29 = vld [vmem:[%s10653_s0 + $0x4d0] sm:$0xff] }
 0x124   :  { %v761_v39 = vpop.xlane.xlu1 %760  ;;  %v3245_v41 = vsel %vm2920_vm11, %v3244_v32, %v3240_v37  ;;  %v758_v43 = vpop.xlane.xlu0 %757  ;;  %v990_v37 = vsel %vm527_vm0, %v169_v29, 0.0 }
 0x125   :  { %v3254_v47 = vrot.slane %v761_v39, %v6734_v38  ;;  %v3249_v48 = vrot.slane %v758_v43, %v6740_v42  ;;  %v172_v43 = vld [vmem:[%s10653_s0 + $0x4e8] sm:$0xff] }
 0x126   :  { %v999_v50 = vsel %vm527_vm0, %v172_v43, 0.0 }
 0x127   :  { %v3250_v51 = vsel %vm10657_vm12, %v3249_v48, %v3245_v41  ;;  %970 = vadd.xlane.f32.xlu1 %v969_v45  ;;  %967 = vadd.xlane.f32.xlu0 %v966_v46  ;;  %v171_v45 = vld [vmem:[%s10653_s0 + $0x4e0] sm:$0xff] }
 0x128   :  { %v767_v54 = vpop.xlane.xlu1 %766  ;;  %v3255_v56 = vsel %vm2934_vm13, %v3254_v47, %v3250_v51  ;;  %v764_v11 = vpop.xlane.xlu0 %763  ;;  %v996_v51 = vsel %vm527_vm0, %v171_v45, 0.0 }
 0x129   :  { %v3264_v61 = vrot.slane %v767_v54, %v6759_v57  ;;  %v3259_v62 = vrot.slane %v764_v11, %v6754_v55  ;;  %v174_v11 = vld [vmem:[%s10653_s0 + $0x4f8] sm:$0xff] }
 0x12a   :  { %v1005_v14 = vsel %vm527_vm0, %v174_v11, 0.0 }
 0x12b   :  { %v3260_v0 = vsel %vm2941_vm14, %v3259_v62, %v3255_v56  ;;  %976 = vadd.xlane.f32.xlu1 %v975_v58  ;;  %973 = vadd.xlane.f32.xlu0 %v972_v60  ;;  %v173_v58 = vld [vmem:[%s10653_s0 + $0x4f0] sm:$0xff] }
 0x12c   :  { %v773_v1 = vpop.xlane.xlu1 %772  ;;  %v770_v2 = vpop.xlane.xlu0 %769  ;;  %v7171_v6 = vsel %vm2948_vm15, %v3264_v61, %v3260_v0  ;;  %v1002_v0 = vsel %vm527_vm0, %v173_v58, 0.0 }
 0x12d   :  { %v3273_v7 = vrot.slane %v773_v1, %v6639_v28  ;;  %v3269_v8 = vrot.slane %v770_v2, %v6633_v26 }
 0x12f   :  { %v3274_v15 = vsel %vm2850_vm1, %v3273_v7, %v3269_v8  ;;  %982 = vadd.xlane.f32.xlu1 %v981_v4  ;;  %979 = vadd.xlane.f32.xlu0 %v978_v5  ;;  %v176_v4 = vld [vmem:[%s10653_s0 + $0x508] sm:$0xff]  ;;  %v175_v5 = vld [vmem:[%s10653_s0 + $0x500] sm:$0xff] }
 0x130   :  { %v779_v16 = vpop.xlane.xlu1 %778  ;;  %v776_v17 = vpop.xlane.xlu0 %775 }
 0x131   :  { %v3283_v22 = vrot.slane %v779_v16, %v6636_v27  ;;  %v3278_v23 = vrot.slane %v776_v17, %v6646_v31  ;;  %v1008_v16 = vsel %vm527_vm0, %v175_v5, 0.0 }
 0x133   :  { %v3279_v30 = vsel %vm2857_vm2, %v3278_v23, %v3274_v15  ;;  %988 = vadd.xlane.f32.xlu1 %v987_v18  ;;  %985 = vadd.xlane.f32.xlu0 %v984_v20  ;;  %v1011_v15 = vsel %vm527_vm0, %v176_v4, 0.0  ;;  %v178_v20 = vld [vmem:[%s10653_s0 + $0x518] sm:$0xff] }
 0x134   :  { %v785_v32 = vpop.xlane.xlu1 %784  ;;  %v3284_v33 = vsel %vm2864_vm3, %v3283_v22, %v3279_v30  ;;  %v782_v34 = vpop.xlane.xlu0 %781  ;;  %v177_v22 = vld [vmem:[%s10653_s0 + $0x510] sm:$0xff] }
 0x135   :  { %v3293_v39 = vrot.slane %v785_v32, %v6651_v36  ;;  %v3288_v41 = vrot.slane %v782_v34, %v6665_v44  ;;  %v1017_v32 = vsel %vm527_vm0, %v178_v20, 0.0 }
 0x137   :  { %v3289_v46 = vsel %vm2871_vm4, %v3288_v41, %v3284_v33  ;;  %994 = vadd.xlane.f32.xlu1 %v993_v35  ;;  %991 = vadd.xlane.f32.xlu0 %v990_v37  ;;  %v1014_v33 = vsel %vm527_vm0, %v177_v22, 0.0  ;;  %v180_v37 = vld [vmem:[%s10653_s0 + $0x528] sm:$0xff] }
 0x138   :  { %v791_v47 = vpop.xlane.xlu1 %790  ;;  %v3294_v48 = vsel %vm2878_vm5, %v3293_v39, %v3289_v46  ;;  %v788_v49 = vpop.xlane.xlu0 %787  ;;  %v179_v39 = vld [vmem:[%s10653_s0 + $0x520] sm:$0xff]  ;;  %v1023_v46 = vsel %vm527_vm0, %v180_v37, 0.0 }
 0x139   :  { %v3303_v54 = vrot.slane %v791_v47, %v6673_v52  ;;  %v3298_v56 = vrot.slane %v788_v49, %v6676_v53  ;;  %v1020_v47 = vsel %vm527_vm0, %v179_v39, 0.0 }
 0x13b   :  { %v3299_v60 = vsel %vm2885_vm6, %v3298_v56, %v3294_v48  ;;  %1000 = vadd.xlane.f32.xlu1 %v999_v50  ;;  %997 = vadd.xlane.f32.xlu0 %v996_v51  ;;  %v182_v51 = vld [vmem:[%s10653_s0 + $0x538] sm:$0xff] }
 0x13c   :  { %v797_v61 = vpop.xlane.xlu1 %796  ;;  %v3304_v62 = vsel %vm10661_vm7, %v3303_v54, %v3299_v60  ;;  %v794_v63 = vpop.xlane.xlu0 %793  ;;  %v181_v54 = vld [vmem:[%s10653_s0 + $0x530] sm:$0xff]  ;;  %v1029_v60 = vsel %vm527_vm0, %v182_v51, 0.0 }
 0x13d   :  { %v3313_v1 = vrot.slane %v797_v61, %v6694_v3  ;;  %v3308_v2 = vrot.slane %v794_v63, %v6706_v9  ;;  %v1026_v61 = vsel %vm527_vm0, %v181_v54, 0.0 }
 0x13f   :  { %v3309_v7 = vsel %vm2899_vm8, %v3308_v2, %v3304_v62  ;;  %1006 = vadd.xlane.f32.xlu1 %v1005_v14  ;;  %1003 = vadd.xlane.f32.xlu0 %v1002_v0  ;;  %v184_v0 = vld [vmem:[%s10653_s0 + $0x548] sm:$0xff] }
 0x140   :  { %v803_v8 = vpop.xlane.xlu1 %802  ;;  %v3314_v10 = vsel %vm10658_vm9, %v3313_v1, %v3309_v7  ;;  %v800_v12 = vpop.xlane.xlu0 %799  ;;  %v183_v1 = vld [vmem:[%s10653_s0 + $0x540] sm:$0xff]  ;;  %v1035_v7 = vsel %vm527_vm0, %v184_v0, 0.0 }
 0x141   :  { %v3323_v17 = vrot.slane %v803_v8, %v6714_v19  ;;  %v3318_v18 = vrot.slane %v800_v12, %v6726_v25  ;;  %v1032_v8 = vsel %vm527_vm0, %v183_v1, 0.0 }
 0x143   :  { %v3319_v23 = vsel %vm2913_vm10, %v3318_v18, %v3314_v10  ;;  %1012 = vadd.xlane.f32.xlu1 %v1011_v15  ;;  %1009 = vadd.xlane.f32.xlu0 %v1008_v16  ;;  %v186_v15 = vld [vmem:[%s10653_s0 + $0x558] sm:$0xff]  ;;  %v185_v16 = vld [vmem:[%s10653_s0 + $0x550] sm:$0xff] }
 0x144   :  { %v809_v24 = vpop.xlane.xlu1 %808  ;;  %v3324_v29 = vsel %vm2920_vm11, %v3323_v17, %v3319_v23  ;;  %v806_v30 = vpop.xlane.xlu0 %805  ;;  %v1041_v23 = vsel %vm527_vm0, %v186_v15, 0.0 }
 0x145   :  { %v3333_v34 = vrot.slane %v809_v24, %v6734_v38  ;;  %v3328_v35 = vrot.slane %v806_v30, %v6740_v42  ;;  %v1038_v24 = vsel %vm527_vm0, %v185_v16, 0.0 }
 0x147   :  { %v3329_v41 = vsel %vm10657_vm12, %v3328_v35, %v3324_v29  ;;  %1018 = vadd.xlane.f32.xlu1 %v1017_v32  ;;  %1015 = vadd.xlane.f32.xlu0 %v1014_v33  ;;  %v188_v32 = vld [vmem:[%s10653_s0 + $0x568] sm:$0xff]  ;;  %v187_v33 = vld [vmem:[%s10653_s0 + $0x560] sm:$0xff] }
 0x148   :  { %v815_v43 = vpop.xlane.xlu1 %814  ;;  %v812_v45 = vpop.xlane.xlu0 %811  ;;  %v3334_v48 = vsel %vm2934_vm13, %v3333_v34, %v3329_v41  ;;  %v1047_v41 = vsel %vm527_vm0, %v188_v32, 0.0 }
 0x149   :  { %v3343_v49 = vrot.slane %v815_v43, %v6759_v57  ;;  %v3338_v50 = vrot.slane %v812_v45, %v6754_v55  ;;  %v1044_v43 = vsel %vm527_vm0, %v187_v33, 0.0 }
 0x14b   :  { %1024 = vadd.xlane.f32.xlu1 %v1023_v46  ;;  %1021 = vadd.xlane.f32.xlu0 %v1020_v47  ;;  %v3339_v56 = vsel %vm2941_vm14, %v3338_v50, %v3334_v48  ;;  %v190_v47 = vld [vmem:[%s10653_s0 + $0x578] sm:$0xff]  ;;  %v189_v48 = vld [vmem:[%s10653_s0 + $0x570] sm:$0xff] }
 0x14c   :  { %v821_v11 = vpop.xlane.xlu1 %820  ;;  %v818_v58 = vpop.xlane.xlu0 %817  ;;  %v7268_v62 = vsel %vm2948_vm15, %v3343_v49, %v3339_v56  ;;  %v1053_v56 = vsel %vm527_vm0, %v190_v47, 0.0 }
 0x14d   :  { %v3352_v63 = vrot.slane %v821_v11, %v6639_v28  ;;  %v3348_v14 = vrot.slane %v818_v58, %v6633_v26  ;;  %v1050_v11 = vsel %vm527_vm0, %v189_v48, 0.0 }
 0x14f   :  { %v3353_v2 = vsel %vm2850_vm1, %v3352_v63, %v3348_v14  ;;  %1030 = vadd.xlane.f32.xlu1 %v1029_v60  ;;  %1027 = vadd.xlane.f32.xlu0 %v1026_v61  ;;  %v192_v61 = vld [vmem:[%s10653_s0 + $0x588] sm:$0xff]  ;;  %v191_v63 = vld [vmem:[%s10653_s0 + $0x580] sm:$0xff] }
 0x150   :  { %v827_v4 = vpop.xlane.xlu1 %826  ;;  %v824_v5 = vpop.xlane.xlu0 %823 }
 0x151   :  { %v3362_v10 = vrot.slane %v827_v4, %v6636_v27  ;;  %v3357_v12 = vrot.slane %v824_v5, %v6646_v31  ;;  %v1059_v4 = vsel %vm527_vm0, %v192_v61, 0.0  ;;  %v1056_v5 = vsel %vm527_vm0, %v191_v63, 0.0 }
 0x153   :  { %v3358_v17 = vsel %vm2857_vm2, %v3357_v12, %v3353_v2  ;;  %1036 = vadd.xlane.f32.xlu1 %v1035_v7  ;;  %1033 = vadd.xlane.f32.xlu0 %v1032_v8  ;;  %v193_v12 = vld [vmem:[%s10653_s0 + $0x590] sm:$0xff] }
 0x154   :  { %v833_v18 = vpop.xlane.xlu1 %832  ;;  %v3363_v20 = vsel %vm2864_vm3, %v3362_v10, %v3358_v17  ;;  %v830_v22 = vpop.xlane.xlu0 %829  ;;  %v194_v10 = vld [vmem:[%s10653_s0 + $0x598] sm:$0xff] }
 0x155   :  { %v3372_v29 = vrot.slane %v833_v18, %v6651_v36  ;;  %v3367_v30 = vrot.slane %v830_v22, %v6665_v44  ;;  %v1062_v22 = vsel %vm527_vm0, %v193_v12, 0.0 }
 0x157   :  { %v3368_v34 = vsel %vm2871_vm4, %v3367_v30, %v3363_v20  ;;  %1042 = vadd.xlane.f32.xlu1 %v1041_v23  ;;  %1039 = vadd.xlane.f32.xlu0 %v1038_v24  ;;  %v1065_v20 = vsel %vm527_vm0, %v194_v10, 0.0  ;;  %v195_v30 = vld [vmem:[%s10653_s0 + $0x5a0] sm:$0xff] }
 0x158   :  { %v839_v35 = vpop.xlane.xlu1 %838  ;;  %v3373_v37 = vsel %vm2878_vm5, %v3372_v29, %v3368_v34  ;;  %v836_v39 = vpop.xlane.xlu0 %835  ;;  %v196_v29 = vld [vmem:[%s10653_s0 + $0x5a8] sm:$0xff] }
 0x159   :  { %v3382_v45 = vrot.slane %v839_v35, %v6673_v52  ;;  %v3377_v46 = vrot.slane %v836_v39, %v6676_v53  ;;  %v1068_v39 = vsel %vm527_vm0, %v195_v30, 0.0 }
 0x15b   :  { %v3378_v49 = vsel %vm2885_vm6, %v3377_v46, %v3373_v37  ;;  %1048 = vadd.xlane.f32.xlu1 %v1047_v41  ;;  %1045 = vadd.xlane.f32.xlu0 %v1044_v43  ;;  %v1071_v37 = vsel %vm527_vm0, %v196_v29, 0.0  ;;  %v197_v46 = vld [vmem:[%s10653_s0 + $0x5b0] sm:$0xff] }
 0x15c   :  { %v845_v50 = vpop.xlane.xlu1 %844  ;;  %v3383_v51 = vsel %vm10661_vm7, %v3382_v45, %v3378_v49  ;;  %v842_v54 = vpop.xlane.xlu0 %841  ;;  %v198_v45 = vld [vmem:[%s10653_s0 + $0x5b8] sm:$0xff] }
 0x15d   :  { %v3392_v58 = vrot.slane %v845_v50, %v6694_v3  ;;  %v3387_v60 = vrot.slane %v842_v54, %v6706_v9  ;;  %v1077_v50 = vsel %vm527_vm0, %v198_v45, 0.0 }
 0x15f   :  { %v3388_v14 = vsel %vm2899_vm8, %v3387_v60, %v3383_v51  ;;  %1054 = vadd.xlane.f32.xlu1 %v1053_v56  ;;  %1051 = vadd.xlane.f32.xlu0 %v1050_v11  ;;  %v1074_v51 = vsel %vm527_vm0, %v197_v46, 0.0  ;;  %v199_v60 = vld [vmem:[%s10653_s0 + $0x5c0] sm:$0xff] }
 0x160   :  { %v851_v0 = vpop.xlane.xlu1 %850  ;;  %v3393_v1 = vsel %vm10658_vm9, %v3392_v58, %v3388_v14  ;;  %v848_v2 = vpop.xlane.xlu0 %847  ;;  %v200_v58 = vld [vmem:[%s10653_s0 + $0x5c8] sm:$0xff] }
 0x161   :  { %v3402_v7 = vrot.slane %v851_v0, %v6714_v19  ;;  %v3397_v8 = vrot.slane %v848_v2, %v6726_v25  ;;  %v1083_v0 = vsel %vm527_vm0, %v200_v58, 0.0 }
 0x163   :  { %v3398_v15 = vsel %vm2913_vm10, %v3397_v8, %v3393_v1  ;;  %1060 = vadd.xlane.f32.xlu1 %v1059_v4  ;;  %1057 = vadd.xlane.f32.xlu0 %v1056_v5  ;;  %v1080_v1 = vsel %vm527_vm0, %v199_v60, 0.0  ;;  %v202_v5 = vld [vmem:[%s10653_s0 + $0x5d8] sm:$0xff] }
 0x164   :  { %v857_v16 = vpop.xlane.xlu1 %856  ;;  %v3403_v17 = vsel %vm2920_vm11, %v3402_v7, %v3398_v15  ;;  %v854_v18 = vpop.xlane.xlu0 %853  ;;  %v201_v7 = vld [vmem:[%s10653_s0 + $0x5d0] sm:$0xff] }
 0x165   :  { %v3412_v23 = vrot.slane %v857_v16, %v6734_v38  ;;  %v3407_v24 = vrot.slane %v854_v18, %v6740_v42  ;;  %v1089_v16 = vsel %vm527_vm0, %v202_v5, 0.0  ;;  %v209_v5 = vld [vmem:[%s10653_s0 + $0x610] sm:$0xff] }
 0x167   :  { %v3408_v32 = vsel %vm10657_vm12, %v3407_v24, %v3403_v17  ;;  %1066 = vadd.xlane.f32.xlu1 %v1065_v20  ;;  %1063 = vadd.xlane.f32.xlu0 %v1062_v22  ;;  %v1086_v17 = vsel %vm527_vm0, %v201_v7, 0.0  ;;  %v204_v22 = vld [vmem:[%s10653_s0 + $0x5e8] sm:$0xff] }
 0x168   :  { %v863_v33 = vpop.xlane.xlu1 %862  ;;  %v3413_v34 = vsel %vm2934_vm13, %v3412_v23, %v3408_v32  ;;  %v860_v35 = vpop.xlane.xlu0 %859  ;;  %v203_v23 = vld [vmem:[%s10653_s0 + $0x5e0] sm:$0xff] }
 0x169   :  { %v3422_v41 = vrot.slane %v863_v33, %v6759_v57  ;;  %v3417_v43 = vrot.slane %v860_v35, %v6754_v55  ;;  %v1095_v33 = vsel %vm527_vm0, %v204_v22, 0.0  ;;  %v211_v22 = vld [vmem:[%s10653_s0 + $0x620] sm:$0xff] }
 0x16b   :  { %v3418_v47 = vsel %vm2941_vm14, %v3417_v43, %v3413_v34  ;;  %1072 = vadd.xlane.f32.xlu1 %v1071_v37  ;;  %1069 = vadd.xlane.f32.xlu0 %v1068_v39  ;;  %v1092_v34 = vsel %vm527_vm0, %v203_v23, 0.0  ;;  %v206_v39 = vld [vmem:[%s10653_s0 + $0x5f8] sm:$0xff] }
 0x16c   :  { %v869_v48 = vpop.xlane.xlu1 %868  ;;  %v866_v49 = vpop.xlane.xlu0 %865  ;;  %v7365_v54 = vsel %vm2948_vm15, %v3422_v41, %v3418_v47  ;;  %v205_v41 = vld [vmem:[%s10653_s0 + $0x5f0] sm:$0xff] }
 0x16d   :  { %v3431_v56 = vrot.slane %v869_v48, %v6639_v28  ;;  %v3427_v11 = vrot.slane %v866_v49, %v6633_v26  ;;  %v1101_v48 = vsel %vm527_vm0, %v206_v39, 0.0  ;;  %v1098_v49 = vsel %vm527_vm0, %v205_v41, 0.0  ;;  %v213_v39 = vld [vmem:[%s10653_s0 + $0x630] sm:$0xff] }
 0x16f   :  { %v3432_v61 = vsel %vm2850_vm1, %v3431_v56, %v3427_v11  ;;  %1078 = vadd.xlane.f32.xlu1 %v1077_v50  ;;  %1075 = vadd.xlane.f32.xlu0 %v1074_v51  ;;  %v208_v56 = vld [vmem:[%s10653_s0 + $0x608] sm:$0xff]  ;;  %v207_v11 = vld [vmem:[%s10653_s0 + $0x600] sm:$0xff] }
 0x170   :  { %v875_v63 = vpop.xlane.xlu1 %874  ;;  %v872_v14 = vpop.xlane.xlu0 %871 }
 0x171   :  { %v3441_v2 = vrot.slane %v875_v63, %v6636_v27  ;;  %v3436_v4 = vrot.slane %v872_v14, %v6646_v31  ;;  %v1107_v14 = vsel %vm527_vm0, %v208_v56, 0.0  ;;  %v215_v56 = vld [vmem:[%s10653_s0 + $0x640] sm:$0xff] }
 0x173   :  { %v3437_v8 = vsel %vm2857_vm2, %v3436_v4, %v3432_v61  ;;  %1084 = vadd.xlane.f32.xlu1 %v1083_v0  ;;  %1081 = vadd.xlane.f32.xlu0 %v1080_v1  ;;  %v1104_v0 = vsel %vm527_vm0, %v207_v11, 0.0  ;;  %v210_v4 = vld [vmem:[%s10653_s0 + $0x618] sm:$0xff] }
 0x174   :  { %v881_v10 = vpop.xlane.xlu1 %880  ;;  %v3442_v12 = vsel %vm2864_vm3, %v3441_v2, %v3437_v8  ;;  %v878_v15 = vpop.xlane.xlu0 %877 }
 0x175   :  { %v3451_v18 = vrot.slane %v881_v10, %v6651_v36  ;;  %v3446_v20 = vrot.slane %v878_v15, %v6665_v44  ;;  %v1113_v15 = vsel %vm527_vm0, %v210_v4, 0.0 }
 0x177   :  { %v3447_v24 = vsel %vm2871_vm4, %v3446_v20, %v3442_v12  ;;  %1090 = vadd.xlane.f32.xlu1 %v1089_v16  ;;  %1087 = vadd.xlane.f32.xlu0 %v1086_v17  ;;  %v1110_v16 = vsel %vm527_vm0, %v209_v5, 0.0  ;;  %v212_v20 = vld [vmem:[%s10653_s0 + $0x628] sm:$0xff] }
 0x178   :  { %v887_v29 = vpop.xlane.xlu1 %886  ;;  %v3452_v30 = vsel %vm2878_vm5, %v3451_v18, %v3447_v24  ;;  %v884_v32 = vpop.xlane.xlu0 %883 }
 0x179   :  { %v3461_v35 = vrot.slane %v887_v29, %v6673_v52  ;;  %v3456_v37 = vrot.slane %v884_v32, %v6676_v53  ;;  %v1116_v32 = vsel %vm527_vm0, %v211_v22, 0.0 }
 0x17b   :  { %v3457_v43 = vsel %vm2885_vm6, %v3456_v37, %v3452_v30  ;;  %1096 = vadd.xlane.f32.xlu1 %v1095_v33  ;;  %1093 = vadd.xlane.f32.xlu0 %v1092_v34  ;;  %v1119_v30 = vsel %vm527_vm0, %v212_v20, 0.0  ;;  %v214_v37 = vld [vmem:[%s10653_s0 + $0x638] sm:$0xff] }
 0x17c   :  { %v893_v45 = vpop.xlane.xlu1 %892  ;;  %v3462_v46 = vsel %vm10661_vm7, %v3461_v35, %v3457_v43  ;;  %v890_v47 = vpop.xlane.xlu0 %889 }
 0x17d   :  { %v3471_v50 = vrot.slane %v893_v45, %v6694_v3  ;;  %v3466_v51 = vrot.slane %v890_v47, %v6706_v9  ;;  %v1122_v47 = vsel %vm527_vm0, %v213_v39, 0.0 }
 0x17f   :  { %v3467_v58 = vsel %vm2899_vm8, %v3466_v51, %v3462_v46  ;;  %1102 = vadd.xlane.f32.xlu1 %v1101_v48  ;;  %1099 = vadd.xlane.f32.xlu0 %v1098_v49  ;;  %v1125_v46 = vsel %vm527_vm0, %v214_v37, 0.0  ;;  %v216_v51 = vld [vmem:[%s10653_s0 + $0x648] sm:$0xff] }
 0x180   :  { %v899_v60 = vpop.xlane.xlu1 %898  ;;  %v3472_v61 = vsel %vm10658_vm9, %v3471_v50, %v3467_v58  ;;  %v896_v63 = vpop.xlane.xlu0 %895 }
 0x181   :  { %v3481_v1 = vrot.slane %v899_v60, %v6714_v19  ;;  %v3476_v2 = vrot.slane %v896_v63, %v6726_v25  ;;  %v1128_v63 = vsel %vm527_vm0, %v215_v56, 0.0 }
 0x183   :  { %v3477_v7 = vsel %vm2913_vm10, %v3476_v2, %v3472_v61  ;;  %1108 = vadd.xlane.f32.xlu1 %v1107_v14  ;;  %1105 = vadd.xlane.f32.xlu0 %v1104_v0  ;;  %v1131_v61 = vsel %vm527_vm0, %v216_v51, 0.0  ;;  %v217_v2 = vld [vmem:[%s10653_s0 + $0x650] sm:$0xff]  ;;  %v223_v51 = vld [vmem:[%s10653_s0 + $0x680] sm:$0xff] }
 0x184   :  { %v905_v8 = vpop.xlane.xlu1 %904  ;;  %v3482_v10 = vsel %vm2920_vm11, %v3481_v1, %v3477_v7  ;;  %v902_v12 = vpop.xlane.xlu0 %901  ;;  %v218_v1 = vld [vmem:[%s10653_s0 + $0x658] sm:$0xff] }
 0x185   :  { %v3491_v17 = vrot.slane %v905_v8, %v6734_v38  ;;  %v3486_v18 = vrot.slane %v902_v12, %v6740_v42  ;;  %v1134_v12 = vsel %vm527_vm0, %v217_v2, 0.0  ;;  %v225_v2 = vld [vmem:[%s10653_s0 + $0x690] sm:$0xff] }
 0x187   :  { %v3487_v23 = vsel %vm10657_vm12, %v3486_v18, %v3482_v10  ;;  %1114 = vadd.xlane.f32.xlu1 %v1113_v15  ;;  %1111 = vadd.xlane.f32.xlu0 %v1110_v16  ;;  %v1137_v10 = vsel %vm527_vm0, %v218_v1, 0.0  ;;  %v219_v18 = vld [vmem:[%s10653_s0 + $0x660] sm:$0xff]  ;;  %v226_v1 = vld [vmem:[%s10653_s0 + $0x698] sm:$0xff] }
 0x188   :  { %v911_v24 = vpop.xlane.xlu1 %910  ;;  %v908_v29 = vpop.xlane.xlu0 %907  ;;  %v3492_v33 = vsel %vm2934_vm13, %v3491_v17, %v3487_v23  ;;  %v220_v17 = vld [vmem:[%s10653_s0 + $0x668] sm:$0xff] }
 0x189   :  { %v3501_v34 = vrot.slane %v911_v24, %v6759_v57  ;;  %v3496_v35 = vrot.slane %v908_v29, %v6754_v55  ;;  %v1143_v29 = vsel %vm527_vm0, %v220_v17, 0.0  ;;  %v228_v17 = vld [vmem:[%s10653_s0 + $0x6a8] sm:$0xff] }
 0x18b   :  { %1120 = vadd.xlane.f32.xlu1 %v1119_v30  ;;  %1117 = vadd.xlane.f32.xlu0 %v1116_v32  ;;  %v3497_v41 = vsel %vm2941_vm14, %v3496_v35, %v3492_v33  ;;  %v1140_v30 = vsel %vm527_vm0, %v219_v18, 0.0  ;;  %v221_v35 = vld [vmem:[%s10653_s0 + $0x670] sm:$0xff]  ;;  %v227_v18 = vld [vmem:[%s10653_s0 + $0x6a0] sm:$0xff] }
 0x18c   :  { %v917_v43 = vpop.xlane.xlu1 %916  ;;  %v914_v45 = vpop.xlane.xlu0 %913  ;;  %v7462_v48 = vsel %vm2948_vm15, %v3501_v34, %v3497_v41  ;;  %v222_v34 = vld [vmem:[%s10653_s0 + $0x678] sm:$0xff] }
 0x18d   :  { %v3510_v49 = vrot.slane %v917_v43, %v6639_v28  ;;  %v3506_v50 = vrot.slane %v914_v45, %v6633_v26  ;;  %v1149_v45 = vsel %vm527_vm0, %v222_v34, 0.0  ;;  %v230_v34 = vld [vmem:[%s10653_s0 + $0x6b8] sm:$0xff] }
 0x18f   :  { %v3511_v11 = vsel %vm2850_vm1, %v3510_v49, %v3506_v50  ;;  %1126 = vadd.xlane.f32.xlu1 %v1125_v46  ;;  %1123 = vadd.xlane.f32.xlu0 %v1122_v47  ;;  %v1146_v46 = vsel %vm527_vm0, %v221_v35, 0.0  ;;  %v224_v50 = vld [vmem:[%s10653_s0 + $0x688] sm:$0xff]  ;;  %v229_v35 = vld [vmem:[%s10653_s0 + $0x6b0] sm:$0xff] }
 0x190   :  { %v923_v58 = vpop.xlane.xlu1 %922  ;;  %v920_v60 = vpop.xlane.xlu0 %919 }
 0x191   :  { %v3520_v14 = vrot.slane %v923_v58, %v6636_v27  ;;  %v3515_v0 = vrot.slane %v920_v60, %v6646_v31 }
 0x193   :  { %v3516_v4 = vsel %vm2857_vm2, %v3515_v0, %v3511_v11  ;;  %1132 = vadd.xlane.f32.xlu1 %v1131_v61  ;;  %1129 = vadd.xlane.f32.xlu0 %v1128_v63  ;;  %v1155_v61 = vsel %vm527_vm0, %v224_v50, 0.0  ;;  %v1152_v63 = vsel %vm527_vm0, %v223_v51, 0.0  ;;  %v232_v50 = vld [vmem:[%s10653_s0 + $0x6c8] sm:$0xff]  ;;  %v231_v51 = vld [vmem:[%s10653_s0 + $0x6c0] sm:$0xff] }
 0x194   :  { %v929_v5 = vpop.xlane.xlu1 %928  ;;  %v3521_v7 = vsel %vm2864_vm3, %v3520_v14, %v3516_v4  ;;  %v926_v8 = vpop.xlane.xlu0 %925 }
 0x195   :  { %v3530_v15 = vrot.slane %v929_v5, %v6651_v36  ;;  %v3525_v16 = vrot.slane %v926_v8, %v6665_v44 }
 0x197   :  { %v3526_v20 = vsel %vm2871_vm4, %v3525_v16, %v3521_v7  ;;  %1138 = vadd.xlane.f32.xlu1 %v1137_v10  ;;  %1135 = vadd.xlane.f32.xlu0 %v1134_v12  ;;  %v1161_v10 = vsel %vm527_vm0, %v226_v1, 0.0  ;;  %v1158_v12 = vsel %vm527_vm0, %v225_v2, 0.0  ;;  %v233_v1 = vld [vmem:[%s10653_s0 + $0x6d0] sm:$0xff] }
 0x198   :  { %v935_v22 = vpop.xlane.xlu1 %934  ;;  %v3531_v23 = vsel %vm2878_vm5, %v3530_v15, %v3526_v20  ;;  %v932_v24 = vpop.xlane.xlu0 %931 }
 0x199   :  { %v3540_v32 = vrot.slane %v935_v22, %v6673_v52  ;;  %v3535_v33 = vrot.slane %v932_v24, %v6676_v53 }
 0x19b   :  { %v3536_v37 = vsel %vm2885_vm6, %v3535_v33, %v3531_v23  ;;  %1144 = vadd.xlane.f32.xlu1 %v1143_v29  ;;  %1141 = vadd.xlane.f32.xlu0 %v1140_v30  ;;  %v1167_v29 = vsel %vm527_vm0, %v228_v17, 0.0  ;;  %v1164_v30 = vsel %vm527_vm0, %v227_v18, 0.0  ;;  %v235_v17 = vld [vmem:[%s10653_s0 + $0x6e0] sm:$0xff] }
 0x19c   :  { %v941_v39 = vpop.xlane.xlu1 %940  ;;  %v3541_v41 = vsel %vm10661_vm7, %v3540_v32, %v3536_v37  ;;  %v938_v43 = vpop.xlane.xlu0 %937 }
 0x19d   :  { %v3550_v47 = vrot.slane %v941_v39, %v6694_v3  ;;  %v3545_v49 = vrot.slane %v938_v43, %v6706_v9  ;;  %v1173_v43 = vsel %vm527_vm0, %v230_v34, 0.0  ;;  %v237_v34 = vld [vmem:[%s10653_s0 + $0x6f0] sm:$0xff] }
 0x19f   :  { %v3546_v56 = vsel %vm2899_vm8, %v3545_v49, %v3541_v41  ;;  %1150 = vadd.xlane.f32.xlu1 %v1149_v45  ;;  %1147 = vadd.xlane.f32.xlu0 %v1146_v46  ;;  %v1170_v45 = vsel %vm527_vm0, %v229_v35, 0.0 }
 0x1a0   :  { %v947_v11 = vpop.xlane.xlu1 %946  ;;  %v3551_v58 = vsel %vm10658_vm9, %v3550_v47, %v3546_v56  ;;  %v944_v60 = vpop.xlane.xlu0 %943 }
 0x1a1   :  { %v3560_v14 = vrot.slane %v947_v11, %v6714_v19  ;;  %v3555_v0 = vrot.slane %v944_v60, %v6726_v25  ;;  %v1179_v60 = vsel %vm527_vm0, %v232_v50, 0.0  ;;  %v240_v50 = vld [vmem:[%s10653_s0 + $0x708] sm:$0xff] }
 0x1a3   :  { %v3556_v4 = vsel %vm2913_vm10, %v3555_v0, %v3551_v58  ;;  %1156 = vadd.xlane.f32.xlu1 %v1155_v61  ;;  %1153 = vadd.xlane.f32.xlu0 %v1152_v63  ;;  %v1176_v61 = vsel %vm527_vm0, %v231_v51, 0.0  ;;  %v234_v0 = vld [vmem:[%s10653_s0 + $0x6d8] sm:$0xff]  ;;  %v239_v51 = vld [vmem:[%s10653_s0 + $0x700] sm:$0xff] }
 0x1a4   :  { %v953_v5 = vpop.xlane.xlu1 %952  ;;  %v3561_v7 = vsel %vm2920_vm11, %v3560_v14, %v3556_v4  ;;  %v950_v8 = vpop.xlane.xlu0 %949 }
 0x1a5   :  { %v3570_v15 = vrot.slane %v953_v5, %v6734_v38  ;;  %v3565_v16 = vrot.slane %v950_v8, %v6740_v42  ;;  %v1185_v8 = vsel %vm527_vm0, %v234_v0, 0.0 }
 0x1a7   :  { %v3566_v20 = vsel %vm10657_vm12, %v3565_v16, %v3561_v7  ;;  %1162 = vadd.xlane.f32.xlu1 %v1161_v10  ;;  %1159 = vadd.xlane.f32.xlu0 %v1158_v12  ;;  %v1182_v10 = vsel %vm527_vm0, %v233_v1, 0.0  ;;  %v236_v16 = vld [vmem:[%s10653_s0 + $0x6e8] sm:$0xff]  ;;  %v242_v1 = vld [vmem:[%s10653_s0 + $0x718] sm:$0xff] }
 0x1a8   :  { %v959_v22 = vpop.xlane.xlu1 %958  ;;  %v3571_v23 = vsel %vm2934_vm13, %v3570_v15, %v3566_v20  ;;  %v956_v24 = vpop.xlane.xlu0 %955 }
 0x1a9   :  { %v3580_v32 = vrot.slane %v959_v22, %v6759_v57  ;;  %v3575_v33 = vrot.slane %v956_v24, %v6754_v55  ;;  %v1191_v24 = vsel %vm527_vm0, %v236_v16, 0.0 }
 0x1ab   :  { %v3576_v37 = vsel %vm2941_vm14, %v3575_v33, %v3571_v23  ;;  %1168 = vadd.xlane.f32.xlu1 %v1167_v29  ;;  %1165 = vadd.xlane.f32.xlu0 %v1164_v30  ;;  %v1188_v29 = vsel %vm527_vm0, %v235_v17, 0.0  ;;  %v238_v33 = vld [vmem:[%s10653_s0 + $0x6f8] sm:$0xff]  ;;  %v244_v17 = vld [vmem:[%s10653_s0 + $0x728] sm:$0xff] }
 0x1ac   :  { %v965_v39 = vpop.xlane.xlu1 %964  ;;  %v962_v41 = vpop.xlane.xlu0 %961  ;;  %v7559_v46 = vsel %vm2948_vm15, %v3580_v32, %v3576_v37 }
 0x1ad   :  { %10663 = vst [vmem:[#allocation6_spill] sm:$0xff] %v7559_v46  ;;  %v3589_v47 = vrot.slane %v965_v39, %v6639_v28  ;;  %v3585_v49 = vrot.slane %v962_v41, %v6633_v26 }
 0x1af   :  { %v3590_v56 = vsel %vm2850_vm1, %v3589_v47, %v3585_v49  ;;  %1174 = vadd.xlane.f32.xlu1 %v1173_v43  ;;  %1171 = vadd.xlane.f32.xlu0 %v1170_v45  ;;  %v1197_v43 = vsel %vm527_vm0, %v238_v33, 0.0  ;;  %v1194_v45 = vsel %vm527_vm0, %v237_v34, 0.0  ;;  %v246_v34 = vld [vmem:[%s10653_s0 + $0x738] sm:$0xff] }
 0x1b0   :  { %v971_v11 = vpop.xlane.xlu1 %970  ;;  %v968_v58 = vpop.xlane.xlu0 %967 }
 0x1b1   :  { %v3599_v63 = vrot.slane %v971_v11, %v6636_v27  ;;  %v3594_v14 = vrot.slane %v968_v58, %v6646_v31 }
 0x1b3   :  { %v3595_v2 = vsel %vm2857_vm2, %v3594_v14, %v3590_v56  ;;  %1180 = vadd.xlane.f32.xlu1 %v1179_v60  ;;  %1177 = vadd.xlane.f32.xlu0 %v1176_v61  ;;  %v1203_v61 = vsel %vm527_vm0, %v240_v50, 0.0 }
 0x1b4   :  { %v977_v4 = vpop.xlane.xlu1 %976  ;;  %v3600_v5 = vsel %vm2864_vm3, %v3599_v63, %v3595_v2  ;;  %v974_v7 = vpop.xlane.xlu0 %973  ;;  %v1200_v63 = vsel %vm527_vm0, %v239_v51, 0.0  ;;  %v241_v2 = vld [vmem:[%s10653_s0 + $0x710] sm:$0xff]  ;;  %v248_v51 = vld [vmem:[%s10653_s0 + $0x748] sm:$0xff] }
 0x1b5   :  { %v3609_v12 = vrot.slane %v977_v4, %v6651_v36  ;;  %v3604_v15 = vrot.slane %v974_v7, %v6665_v44 }
 0x1b7   :  { %v3605_v18 = vsel %vm2871_vm4, %v3604_v15, %v3600_v5  ;;  %1186 = vadd.xlane.f32.xlu1 %v1185_v8  ;;  %1183 = vadd.xlane.f32.xlu0 %v1182_v10  ;;  %v1209_v10 = vsel %vm527_vm0, %v242_v1, 0.0  ;;  %v250_v1 = vld [vmem:[%s10653_s0 + $0x758] sm:$0xff] }
 0x1b8   :  { %v983_v20 = vpop.xlane.xlu1 %982  ;;  %v3610_v22 = vsel %vm2878_vm5, %v3609_v12, %v3605_v18  ;;  %v980_v23 = vpop.xlane.xlu0 %979  ;;  %v1206_v12 = vsel %vm527_vm0, %v241_v2, 0.0  ;;  %v243_v18 = vld [vmem:[%s10653_s0 + $0x720] sm:$0xff]  ;;  %v249_v2 = vld [vmem:[%s10653_s0 + $0x750] sm:$0xff] }
 0x1b9   :  { %v3619_v30 = vrot.slane %v983_v20, %v6673_v52  ;;  %v3614_v32 = vrot.slane %v980_v23, %v6676_v53 }
 0x1bb   :  { %v3615_v35 = vsel %vm2885_vm6, %v3614_v32, %v3610_v22  ;;  %1192 = vadd.xlane.f32.xlu1 %v1191_v24  ;;  %1189 = vadd.xlane.f32.xlu0 %v1188_v29  ;;  %v1215_v24 = vsel %vm527_vm0, %v244_v17, 0.0  ;;  %v1212_v29 = vsel %vm527_vm0, %v243_v18, 0.0  ;;  %v252_v17 = vld [vmem:[%s10653_s0 + $0x768] sm:$0xff]  ;;  %v251_v18 = vld [vmem:[%s10653_s0 + $0x760] sm:$0xff] }
 0x1bc   :  { %v989_v37 = vpop.xlane.xlu1 %988  ;;  %v3620_v39 = vsel %vm10661_vm7, %v3619_v30, %v3615_v35  ;;  %v986_v41 = vpop.xlane.xlu0 %985  ;;  %v245_v35 = vld [vmem:[%s10653_s0 + $0x730] sm:$0xff] }
 0x1bd   :  { %v3629_v47 = vrot.slane %v989_v37, %v6694_v3  ;;  %v3624_v49 = vrot.slane %v986_v41, %v6706_v9 }
 0x1bf   :  { %v3625_v56 = vsel %vm2899_vm8, %v3624_v49, %v3620_v39  ;;  %1198 = vadd.xlane.f32.xlu1 %v1197_v43  ;;  %1195 = vadd.xlane.f32.xlu0 %v1194_v45  ;;  %v1221_v43 = vsel %vm527_vm0, %v246_v34, 0.0  ;;  %v1218_v45 = vsel %vm527_vm0, %v245_v35, 0.0  ;;  %v254_v34 = vld [vmem:[%s10653_s0 + $0x778] sm:$0xff]  ;;  %v253_v35 = vld [vmem:[%s10653_s0 + $0x770] sm:$0xff] }
 0x1c0   :  { %v995_v11 = vpop.xlane.xlu1 %994  ;;  %v3630_v58 = vsel %vm10658_vm9, %v3629_v47, %v3625_v56  ;;  %v992_v60 = vpop.xlane.xlu0 %991  ;;  %v247_v56 = vld [vmem:[%s10653_s0 + $0x740] sm:$0xff] }
 0x1c1   :  { %v3639_v14 = vrot.slane %v995_v11, %v6714_v19  ;;  %v3634_v0 = vrot.slane %v992_v60, %v6726_v25 }
 0x1c3   :  { %v3635_v4 = vsel %vm2913_vm10, %v3634_v0, %v3630_v58  ;;  %1204 = vadd.xlane.f32.xlu1 %v1203_v61  ;;  %1201 = vadd.xlane.f32.xlu0 %v1200_v63  ;;  %v1227_v61 = vsel %vm527_vm0, %v248_v51, 0.0  ;;  %v1224_v63 = vsel %vm527_vm0, %v247_v56, 0.0  ;;  %v256_v56 = vld [vmem:[%s10653_s0 + $0x788] sm:$0xff] }
 0x1c4   :  { %v1001_v5 = vpop.xlane.xlu1 %1000  ;;  %v3640_v7 = vsel %vm2920_vm11, %v3639_v14, %v3635_v4  ;;  %v998_v8 = vpop.xlane.xlu0 %997 }
 0x1c5   :  { %v3649_v15 = vrot.slane %v1001_v5, %v6734_v38  ;;  %v3644_v16 = vrot.slane %v998_v8, %v6740_v42 }
 0x1c7   :  { %v3645_v20 = vsel %vm10657_vm12, %v3644_v16, %v3640_v7  ;;  %1210 = vadd.xlane.f32.xlu1 %v1209_v10  ;;  %1207 = vadd.xlane.f32.xlu0 %v1206_v12  ;;  %v1233_v10 = vsel %vm527_vm0, %v250_v1, 0.0  ;;  %v1230_v12 = vsel %vm527_vm0, %v249_v2, 0.0 }
 0x1c8   :  { %v1007_v22 = vpop.xlane.xlu1 %1006  ;;  %v1004_v23 = vpop.xlane.xlu0 %1003  ;;  %v3650_v30 = vsel %vm2934_vm13, %v3649_v15, %v3645_v20 }
 0x1c9   :  { %v3659_v32 = vrot.slane %v1007_v22, %v6759_v57  ;;  %v3654_v33 = vrot.slane %v1004_v23, %v6754_v55 }
 0x1cb   :  { %1216 = vadd.xlane.f32.xlu1 %v1215_v24  ;;  %1213 = vadd.xlane.f32.xlu0 %v1212_v29  ;;  %v3655_v37 = vsel %vm2941_vm14, %v3654_v33, %v3650_v30  ;;  %v1239_v29 = vsel %vm527_vm0, %v252_v17, 0.0  ;;  %v1236_v30 = vsel %vm527_vm0, %v251_v18, 0.0 }
 0x1cc   :  { %v1013_v39 = vpop.xlane.xlu1 %1012  ;;  %v1010_v41 = vpop.xlane.xlu0 %1009  ;;  %v7656_v47 = vsel %vm2948_vm15, %v3659_v32, %v3655_v37 }
 0x1cd   :  { %10664 = vst [vmem:[#allocation7_spill] sm:$0xff] %v7656_v47  ;;  %v3668_v49 = vrot.slane %v1013_v39, %v6639_v28  ;;  %v3664_v50 = vrot.slane %v1010_v41, %v6633_v26 }
 0x1cf   :  { %v3669_v11 = vsel %vm2850_vm1, %v3668_v49, %v3664_v50  ;;  %1222 = vadd.xlane.f32.xlu1 %v1221_v43  ;;  %1219 = vadd.xlane.f32.xlu0 %v1218_v45  ;;  %v1245_v45 = vsel %vm527_vm0, %v254_v34, 0.0  ;;  %v1242_v49 = vsel %vm527_vm0, %v253_v35, 0.0 }
 0x1d0   :  { %v1019_v58 = vpop.xlane.xlu1 %1018  ;;  %v1016_v60 = vpop.xlane.xlu0 %1015 }
 0x1d1   :  { %v3678_v14 = vrot.slane %v1019_v58, %v6636_v27  ;;  %v3673_v0 = vrot.slane %v1016_v60, %v6646_v31 }
 0x1d3   :  { %v3674_v4 = vsel %vm2857_vm2, %v3673_v0, %v3669_v11  ;;  %1228 = vadd.xlane.f32.xlu1 %v1227_v61  ;;  %1225 = vadd.xlane.f32.xlu0 %v1224_v63  ;;  %v255_v11 = vld [vmem:[%s10653_s0 + $0x780] sm:$0xff] }
 0x1d4   :  { %v1025_v5 = vpop.xlane.xlu1 %1024  ;;  %v3679_v7 = vsel %vm2864_vm3, %v3678_v14, %v3674_v4  ;;  %v1022_v8 = vpop.xlane.xlu0 %1021  ;;  %v1251_v14 = vsel %vm527_vm0, %v256_v56, 0.0  ;;  %v1248_v0 = vsel %vm527_vm0, %v255_v11, 0.0  ;;  %v258_v4 = vld [vmem:[%s10653_s0 + $0x798] sm:$0xff] }
 0x1d5   :  { %v3688_v15 = vrot.slane %v1025_v5, %v6651_v36  ;;  %v3683_v16 = vrot.slane %v1022_v8, %v6665_v44  ;;  %v257_v5 = vld [vmem:[%s10653_s0 + $0x790] sm:$0xff] }
 0x1d7   :  { %v3684_v20 = vsel %vm2871_vm4, %v3683_v16, %v3679_v7  ;;  %1234 = vadd.xlane.f32.xlu1 %v1233_v10  ;;  %1231 = vadd.xlane.f32.xlu0 %v1230_v12  ;;  %v1254_v16 = vsel %vm527_vm0, %v257_v5, 0.0  ;;  %v266_v5 = vld [vmem:[%s10653_s0 + $0x7d8] sm:$0xff] }
 0x1d8   :  { %v1031_v22 = vpop.xlane.xlu1 %1030  ;;  %v3689_v23 = vsel %vm2878_vm5, %v3688_v15, %v3684_v20  ;;  %v1028_v24 = vpop.xlane.xlu0 %1027  ;;  %v1257_v15 = vsel %vm527_vm0, %v258_v4, 0.0  ;;  %v260_v20 = vld [vmem:[%s10653_s0 + $0x7a8] sm:$0xff] }
 0x1d9   :  { %v3698_v32 = vrot.slane %v1031_v22, %v6673_v52  ;;  %v3693_v33 = vrot.slane %v1028_v24, %v6676_v53  ;;  %v259_v22 = vld [vmem:[%s10653_s0 + $0x7a0] sm:$0xff] }
 0x1db   :  { %v3694_v37 = vsel %vm2885_vm6, %v3693_v33, %v3689_v23  ;;  %1240 = vadd.xlane.f32.xlu1 %v1239_v29  ;;  %1237 = vadd.xlane.f32.xlu0 %v1236_v30  ;;  %v1260_v33 = vsel %vm527_vm0, %v259_v22, 0.0  ;;  %v268_v22 = vld [vmem:[%s10653_s0 + $0x7e8] sm:$0xff] }
 0x1dc   :  { %v1037_v39 = vpop.xlane.xlu1 %1036  ;;  %v3699_v41 = vsel %vm10661_vm7, %v3698_v32, %v3694_v37  ;;  %v1034_v43 = vpop.xlane.xlu0 %1033  ;;  %v1263_v32 = vsel %vm527_vm0, %v260_v20, 0.0  ;;  %v262_v37 = vld [vmem:[%s10653_s0 + $0x7b8] sm:$0xff] }
 0x1dd   :  { %v3708_v50 = vrot.slane %v1037_v39, %v6694_v3  ;;  %v3703_v51 = vrot.slane %v1034_v43, %v6706_v9  ;;  %v261_v39 = vld [vmem:[%s10653_s0 + $0x7b0] sm:$0xff] }
 0x1df   :  { %v3704_v58 = vsel %vm2899_vm8, %v3703_v51, %v3699_v41  ;;  %1246 = vadd.xlane.f32.xlu1 %v1245_v45  ;;  %1243 = vadd.xlane.f32.xlu0 %v1242_v49  ;;  %v1269_v49 = vsel %vm527_vm0, %v262_v37, 0.0 }
 0x1e0   :  { %v1043_v60 = vpop.xlane.xlu1 %1042  ;;  %v3709_v61 = vsel %vm10658_vm9, %v3708_v50, %v3704_v58  ;;  %v1040_v63 = vpop.xlane.xlu0 %1039  ;;  %v1266_v50 = vsel %vm527_vm0, %v261_v39, 0.0  ;;  %v264_v58 = vld [vmem:[%s10653_s0 + $0x7c8] sm:$0xff]  ;;  %v270_v39 = vld [vmem:[%s10653_s0 + $0x7f8] sm:$0xff] }
 0x1e1   :  { %v3718_v1 = vrot.slane %v1043_v60, %v6714_v19  ;;  %v3713_v2 = vrot.slane %v1040_v63, %v6726_v25  ;;  %v263_v60 = vld [vmem:[%s10653_s0 + $0x7c0] sm:$0xff] }
 0x1e3   :  { %v3714_v7 = vsel %vm2913_vm10, %v3713_v2, %v3709_v61  ;;  %1252 = vadd.xlane.f32.xlu1 %v1251_v14  ;;  %1249 = vadd.xlane.f32.xlu0 %v1248_v0  ;;  %v1275_v0 = vsel %vm527_vm0, %v264_v58, 0.0 }
 0x1e4   :  { %v1049_v8 = vpop.xlane.xlu1 %1048  ;;  %v3719_v10 = vsel %vm2920_vm11, %v3718_v1, %v3714_v7  ;;  %v1046_v12 = vpop.xlane.xlu0 %1045  ;;  %v1272_v1 = vsel %vm527_vm0, %v263_v60, 0.0  ;;  %v265_v7 = vld [vmem:[%s10653_s0 + $0x7d0] sm:$0xff] }
 0x1e5   :  { %v3728_v17 = vrot.slane %v1049_v8, %v6734_v38  ;;  %v3723_v18 = vrot.slane %v1046_v12, %v6740_v42 }
 0x1e7   :  { %v3724_v23 = vsel %vm10657_vm12, %v3723_v18, %v3719_v10  ;;  %1258 = vadd.xlane.f32.xlu1 %v1257_v15  ;;  %1255 = vadd.xlane.f32.xlu0 %v1254_v16  ;;  %v1281_v16 = vsel %vm527_vm0, %v266_v5, 0.0 }
 0x1e8   :  { %v1055_v24 = vpop.xlane.xlu1 %1054  ;;  %v3729_v29 = vsel %vm2934_vm13, %v3728_v17, %v3724_v23  ;;  %v1052_v30 = vpop.xlane.xlu0 %1051  ;;  %v1278_v17 = vsel %vm527_vm0, %v265_v7, 0.0  ;;  %v267_v23 = vld [vmem:[%s10653_s0 + $0x7e0] sm:$0xff] }
 0x1e9   :  { %v3738_v34 = vrot.slane %v1055_v24, %v6759_v57  ;;  %v3733_v35 = vrot.slane %v1052_v30, %v6754_v55 }
 0x1eb   :  { %v3734_v41 = vsel %vm2941_vm14, %v3733_v35, %v3729_v29  ;;  %1264 = vadd.xlane.f32.xlu1 %v1263_v32  ;;  %1261 = vadd.xlane.f32.xlu0 %v1260_v33  ;;  %v1287_v33 = vsel %vm527_vm0, %v268_v22, 0.0 }
 0x1ec   :  { %v1061_v43 = vpop.xlane.xlu1 %1060  ;;  %v1058_v45 = vpop.xlane.xlu0 %1057  ;;  %v7753_v51 = vsel %vm2948_vm15, %v3738_v34, %v3734_v41  ;;  %v1284_v34 = vsel %vm527_vm0, %v267_v23, 0.0  ;;  %v269_v41 = vld [vmem:[%s10653_s0 + $0x7f0] sm:$0xff] }
 0x1ed   :  { %10665 = vst [vmem:[#allocation8_spill] sm:$0xff] %v7753_v51  ;;  %v3747_v56 = vrot.slane %v1061_v43, %v6639_v28  ;;  %v3743_v11 = vrot.slane %v1058_v45, %v6633_v26 }
 0x1ef   :  { %v3748_v61 = vsel %vm2850_vm1, %v3747_v56, %v3743_v11  ;;  %1270 = vadd.xlane.f32.xlu1 %v1269_v49  ;;  %1267 = vadd.xlane.f32.xlu0 %v1266_v50  ;;  %v1293_v56 = vsel %vm527_vm0, %v270_v39, 0.0  ;;  %v1290_v11 = vsel %vm527_vm0, %v269_v41, 0.0 }
 0x1f0   :  { %v1067_v63 = vpop.xlane.xlu1 %1066  ;;  %v1064_v14 = vpop.xlane.xlu0 %1063 }
 0x1f1   :  { %v3757_v2 = vrot.slane %v1067_v63, %v6636_v27  ;;  %v3752_v4 = vrot.slane %v1064_v14, %v6646_v31  ;;  %v271_v63 = vld [vmem:[%s10653_s0 + $0x800] sm:$0xff] }
 0x1f2   :  { %v1296_v5 = vsel %vm527_vm0, %v271_v63, 0.0 }
 0x1f3   :  { %v3753_v8 = vsel %vm2857_vm2, %v3752_v4, %v3748_v61  ;;  %1276 = vadd.xlane.f32.xlu1 %v1275_v0  ;;  %1273 = vadd.xlane.f32.xlu0 %v1272_v1  ;;  %v272_v61 = vld [vmem:[%s10653_s0 + $0x808] sm:$0xff] }
 0x1f4   :  { %v1073_v10 = vpop.xlane.xlu1 %1072  ;;  %v3758_v12 = vsel %vm2864_vm3, %v3757_v2, %v3753_v8  ;;  %v1070_v15 = vpop.xlane.xlu0 %1069  ;;  %v1299_v4 = vsel %vm527_vm0, %v272_v61, 0.0 }
 0x1f5   :  { %v3767_v18 = vrot.slane %v1073_v10, %v6651_v36  ;;  %v3762_v20 = vrot.slane %v1070_v15, %v6665_v44  ;;  %v274_v10 = vld [vmem:[%s10653_s0 + $0x818] sm:$0xff] }
 0x1f7   :  { %v3763_v24 = vsel %vm2871_vm4, %v3762_v20, %v3758_v12  ;;  %1282 = vadd.xlane.f32.xlu1 %v1281_v16  ;;  %1279 = vadd.xlane.f32.xlu0 %v1278_v17  ;;  %v273_v12 = vld [vmem:[%s10653_s0 + $0x810] sm:$0xff]  ;;  %v1305_v20 = vsel %vm527_vm0, %v274_v10, 0.0 }
 0x1f8   :  { %v1079_v29 = vpop.xlane.xlu1 %1078  ;;  %v3768_v30 = vsel %vm2878_vm5, %v3767_v18, %v3763_v24  ;;  %v1076_v32 = vpop.xlane.xlu0 %1075  ;;  %v1302_v22 = vsel %vm527_vm0, %v273_v12, 0.0 }
 0x1f9   :  { %v3777_v35 = vrot.slane %v1079_v29, %v6673_v52  ;;  %v3772_v37 = vrot.slane %v1076_v32, %v6676_v53  ;;  %v276_v29 = vld [vmem:[%s10653_s0 + $0x828] sm:$0xff] }
 0x1fb   :  { %v3773_v43 = vsel %vm2885_vm6, %v3772_v37, %v3768_v30  ;;  %1288 = vadd.xlane.f32.xlu1 %v1287_v33  ;;  %1285 = vadd.xlane.f32.xlu0 %v1284_v34  ;;  %v275_v30 = vld [vmem:[%s10653_s0 + $0x820] sm:$0xff] }
 0x1fc   :  { %v1085_v45 = vpop.xlane.xlu1 %1084  ;;  %v3778_v49 = vsel %vm10661_vm7, %v3777_v35, %v3773_v43  ;;  %v1082_v50 = vpop.xlane.xlu0 %1081  ;;  %v1311_v35 = vsel %vm527_vm0, %v276_v29, 0.0  ;;  %v1308_v37 = vsel %vm527_vm0, %v275_v30, 0.0 }
 0x1fd   :  { %v3787_v58 = vrot.slane %v1085_v45, %v6694_v3  ;;  %v3782_v60 = vrot.slane %v1082_v50, %v6706_v9  ;;  %v278_v45 = vld [vmem:[%s10653_s0 + $0x838] sm:$0xff] }
 0x1ff   :  { %v3783_v14 = vsel %vm2899_vm8, %v3782_v60, %v3778_v49  ;;  %1294 = vadd.xlane.f32.xlu1 %v1293_v56  ;;  %1291 = vadd.xlane.f32.xlu0 %v1290_v11  ;;  %v277_v49 = vld [vmem:[%s10653_s0 + $0x830] sm:$0xff] }
 0x200   :  { %v1091_v0 = vpop.xlane.xlu1 %1090  ;;  %v3788_v1 = vsel %vm10658_vm9, %v3787_v58, %v3783_v14  ;;  %v1088_v2 = vpop.xlane.xlu0 %1087  ;;  %v1317_v58 = vsel %vm527_vm0, %v278_v45, 0.0  ;;  %v1314_v60 = vsel %vm527_vm0, %v277_v49, 0.0 }
 0x201   :  { %v3797_v7 = vrot.slane %v1091_v0, %v6714_v19  ;;  %v3792_v8 = vrot.slane %v1088_v2, %v6726_v25  ;;  %v280_v0 = vld [vmem:[%s10653_s0 + $0x848] sm:$0xff] }
 0x203   :  { %v3793_v15 = vsel %vm2913_vm10, %v3792_v8, %v3788_v1  ;;  %1300 = vadd.xlane.f32.xlu1 %v1299_v4  ;;  %1297 = vadd.xlane.f32.xlu0 %v1296_v5  ;;  %v279_v1 = vld [vmem:[%s10653_s0 + $0x840] sm:$0xff] }
 0x204   :  { %v1097_v16 = vpop.xlane.xlu1 %1096  ;;  %v3798_v17 = vsel %vm2920_vm11, %v3797_v7, %v3793_v15  ;;  %v1094_v18 = vpop.xlane.xlu0 %1093  ;;  %v1323_v7 = vsel %vm527_vm0, %v280_v0, 0.0  ;;  %v1320_v8 = vsel %vm527_vm0, %v279_v1, 0.0  ;;  %v282_v15 = vld [vmem:[%s10653_s0 + $0x858] sm:$0xff] }
 0x205   :  { %v3807_v23 = vrot.slane %v1097_v16, %v6734_v38  ;;  %v3802_v24 = vrot.slane %v1094_v18, %v6740_v42  ;;  %v281_v16 = vld [vmem:[%s10653_s0 + $0x850] sm:$0xff] }
 0x207   :  { %v3803_v32 = vsel %vm10657_vm12, %v3802_v24, %v3798_v17  ;;  %1306 = vadd.xlane.f32.xlu1 %v1305_v20  ;;  %1303 = vadd.xlane.f32.xlu0 %v1302_v22  ;;  %v1326_v24 = vsel %vm527_vm0, %v281_v16, 0.0 }
 0x208   :  { %v1103_v33 = vpop.xlane.xlu1 %1102  ;;  %v1100_v34 = vpop.xlane.xlu0 %1099  ;;  %v3808_v39 = vsel %vm2934_vm13, %v3807_v23, %v3803_v32  ;;  %v1329_v23 = vsel %vm527_vm0, %v282_v15, 0.0  ;;  %v284_v32 = vld [vmem:[%s10653_s0 + $0x868] sm:$0xff] }
 0x209   :  { %v3817_v41 = vrot.slane %v1103_v33, %v6759_v57  ;;  %v3812_v43 = vrot.slane %v1100_v34, %v6754_v55  ;;  %v283_v33 = vld [vmem:[%s10653_s0 + $0x860] sm:$0xff] }
 0x20b   :  { %1312 = vadd.xlane.f32.xlu1 %v1311_v35  ;;  %1309 = vadd.xlane.f32.xlu0 %v1308_v37  ;;  %v3813_v50 = vsel %vm2941_vm14, %v3812_v43, %v3808_v39  ;;  %v1332_v43 = vsel %vm527_vm0, %v283_v33, 0.0 }
 0x20c   :  { %v1109_v56 = vpop.xlane.xlu1 %1108  ;;  %v1106_v11 = vpop.xlane.xlu0 %1105  ;;  %v7850_v61 = vsel %vm2948_vm15, %v3817_v41, %v3813_v50  ;;  %v1335_v41 = vsel %vm527_vm0, %v284_v32, 0.0  ;;  %v286_v50 = vld [vmem:[%s10653_s0 + $0x878] sm:$0xff] }
 0x20d   :  { %10666 = vst [vmem:[#allocation9_spill] sm:$0xff] %v7850_v61  ;;  %v3826_v63 = vrot.slane %v1109_v56, %v6639_v28  ;;  %v3822_v14 = vrot.slane %v1106_v11, %v6633_v26  ;;  %v285_v56 = vld [vmem:[%s10653_s0 + $0x870] sm:$0xff] }
 0x20e   :  { %v1338_v0 = vsel %vm527_vm0, %v285_v56, 0.0 }
 0x20f   :  { %v3827_v2 = vsel %vm2850_vm1, %v3826_v63, %v3822_v14  ;;  %1318 = vadd.xlane.f32.xlu1 %v1317_v58  ;;  %1315 = vadd.xlane.f32.xlu0 %v1314_v60  ;;  %v1341_v14 = vsel %vm527_vm0, %v286_v50, 0.0 }
 0x210   :  { %v1115_v4 = vpop.xlane.xlu1 %1114  ;;  %v1112_v5 = vpop.xlane.xlu0 %1111 }
 0x211   :  { %v3836_v10 = vrot.slane %v1115_v4, %v6636_v27  ;;  %v3831_v12 = vrot.slane %v1112_v5, %v6646_v31  ;;  %v288_v4 = vld [vmem:[%s10653_s0 + $0x888] sm:$0xff]  ;;  %v287_v5 = vld [vmem:[%s10653_s0 + $0x880] sm:$0xff] }
 0x212   :  { %v1347_v15 = vsel %vm527_vm0, %v288_v4, 0.0  ;;  %v1344_v16 = vsel %vm527_vm0, %v287_v5, 0.0 }
 0x213   :  { %v3832_v17 = vsel %vm2857_vm2, %v3831_v12, %v3827_v2  ;;  %1324 = vadd.xlane.f32.xlu1 %v1323_v7  ;;  %1321 = vadd.xlane.f32.xlu0 %v1320_v8 }
 0x214   :  { %v1121_v18 = vpop.xlane.xlu1 %1120  ;;  %v3837_v20 = vsel %vm2864_vm3, %v3836_v10, %v3832_v17  ;;  %v1118_v22 = vpop.xlane.xlu0 %1117 }
 0x215   :  { %v3846_v29 = vrot.slane %v1121_v18, %v6651_v36  ;;  %v3841_v30 = vrot.slane %v1118_v22, %v6665_v44  ;;  %v289_v22 = vld [vmem:[%s10653_s0 + $0x890] sm:$0xff] }
 0x216   :  { %v1350_v33 = vsel %vm527_vm0, %v289_v22, 0.0 }
 0x217   :  { %v3842_v34 = vsel %vm2871_vm4, %v3841_v30, %v3837_v20  ;;  %1330 = vadd.xlane.f32.xlu1 %v1329_v23  ;;  %1327 = vadd.xlane.f32.xlu0 %v1326_v24  ;;  %v290_v20 = vld [vmem:[%s10653_s0 + $0x898] sm:$0xff] }
 0x218   :  { %v1127_v35 = vpop.xlane.xlu1 %1126  ;;  %v3847_v37 = vsel %vm2878_vm5, %v3846_v29, %v3842_v34  ;;  %v1124_v39 = vpop.xlane.xlu0 %1123  ;;  %v1353_v32 = vsel %vm527_vm0, %v290_v20, 0.0 }
 0x219   :  { %v3856_v45 = vrot.slane %v1127_v35, %v6673_v52  ;;  %v3851_v49 = vrot.slane %v1124_v39, %v6676_v53  ;;  %v291_v39 = vld [vmem:[%s10653_s0 + $0x8a0] sm:$0xff] }
 0x21a   :  { %v1356_v56 = vsel %vm527_vm0, %v291_v39, 0.0  ;;  %v2077_v39 = vld [vmem:[%s10654_s1 + $0x68] sm:$0xff] }
 0x21b   :  { %v3852_v11 = vsel %vm2885_vm6, %v3851_v49, %v3847_v37  ;;  %1336 = vadd.xlane.f32.xlu1 %v1335_v41  ;;  %1333 = vadd.xlane.f32.xlu0 %v1332_v43  ;;  %v292_v37 = vld [vmem:[%s10653_s0 + $0x8a8] sm:$0xff] }
 0x21c   :  { %v1133_v58 = vpop.xlane.xlu1 %1132  ;;  %v3857_v60 = vsel %vm10661_vm7, %v3856_v45, %v3852_v11  ;;  %v1130_v63 = vpop.xlane.xlu0 %1129  ;;  %v1359_v50 = vsel %vm527_vm0, %v292_v37, 0.0 }
 0x21d   :  { %v3866_v1 = vrot.slane %v1133_v58, %v6694_v3  ;;  %v3861_v2 = vrot.slane %v1130_v63, %v6706_v9  ;;  %v293_v63 = vld [vmem:[%s10653_s0 + $0x8b0] sm:$0xff] }
 0x21e   :  { %v1362_v4 = vsel %vm527_vm0, %v293_v63, 0.0  ;;  %v2092_v63 = vld [vmem:[%s10654_s1 + $0xe0] sm:$0xff] }
 0x21f   :  { %v3862_v7 = vsel %vm2899_vm8, %v3861_v2, %v3857_v60  ;;  %1342 = vadd.xlane.f32.xlu1 %v1341_v14  ;;  %1339 = vadd.xlane.f32.xlu0 %v1338_v0  ;;  %v294_v60 = vld [vmem:[%s10653_s0 + $0x8b8] sm:$0xff] }
 0x220   :  { %v1139_v8 = vpop.xlane.xlu1 %1138  ;;  %v3867_v10 = vsel %vm10658_vm9, %v3866_v1, %v3862_v7  ;;  %v1136_v12 = vpop.xlane.xlu0 %1135  ;;  %v1365_v2 = vsel %vm527_vm0, %v294_v60, 0.0  ;;  %v299_v60 = vld [vmem:[%s10653_s0 + $0x8e0] sm:$0xff] }
 0x221   :  { %v3876_v17 = vrot.slane %v1139_v8, %v6714_v19  ;;  %v3871_v18 = vrot.slane %v1136_v12, %v6726_v25  ;;  %v295_v12 = vld [vmem:[%s10653_s0 + $0x8c0] sm:$0xff] }
 0x223   :  { %v3872_v23 = vsel %vm2913_vm10, %v3871_v18, %v3867_v10  ;;  %1348 = vadd.xlane.f32.xlu1 %v1347_v15  ;;  %1345 = vadd.xlane.f32.xlu0 %v1344_v16  ;;  %v296_v10 = vld [vmem:[%s10653_s0 + $0x8c8] sm:$0xff]  ;;  %v2095_v15 = vld [vmem:[%s10654_s1 + $0xf8] sm:$0xff] }
 0x224   :  { %v1145_v24 = vpop.xlane.xlu1 %1144  ;;  %v3877_v29 = vsel %vm2920_vm11, %v3876_v17, %v3872_v23  ;;  %v1142_v30 = vpop.xlane.xlu0 %1141  ;;  %v2079_v17 = vld [vmem:[%s10654_s1 + $0x78] sm:$0xff]  ;;  %v1371_v22 = vsel %vm527_vm0, %v296_v10, 0.0  ;;  %v1368_v23 = vsel %vm527_vm0, %v295_v12, 0.0  ;;  %6008 = vmatprep.subr.mxu0 %v2095_v15  ;;  %v1380_v10 = vsel %vm527_vm0, %v299_v60, 0.0 }
 0x225   :  { %v3886_v34 = vrot.slane %v1145_v24, %v6734_v38  ;;  %v3881_v35 = vrot.slane %v1142_v30, %v6740_v42  ;;  %v2094_v24 = vld [vmem:[%s10654_s1 + $0xf0] sm:$0xff]  ;;  %6009 = vmatpush3.msra.mxu0 %v2079_v17 }
 0x226   :  { %6010 = vmatprep.subr.mxu0 %v2094_v24  ;;  %v301_v17 = vld [vmem:[%s10653_s0 + $0x8f0] sm:$0xff] }
 0x227   :  { %v3882_v41 = vsel %vm10657_vm12, %v3881_v35, %v3877_v29  ;;  %1354 = vadd.xlane.f32.xlu1 %v1353_v32  ;;  %1351 = vadd.xlane.f32.xlu0 %v1350_v33  ;;  %v298_v32 = vld [vmem:[%s10653_s0 + $0x8d8] sm:$0xff]  ;;  %v297_v33 = vld [vmem:[%s10653_s0 + $0x8d0] sm:$0xff]  ;;  %v2093_v35 = vld [vmem:[%s10654_s1 + $0xe8] sm:$0xff] }
 0x228   :  { %v1151_v43 = vpop.xlane.xlu1 %1150  ;;  %v3887_v45 = vsel %vm2934_vm13, %v3886_v34, %v3882_v41  ;;  %v1148_v49 = vpop.xlane.xlu0 %1147  ;;  %v2078_v34 = vld [vmem:[%s10654_s1 + $0x70] sm:$0xff] }
 0x229   :  { %v3896_v11 = vrot.slane %v1151_v43, %v6759_v57  ;;  %v3891_v58 = vrot.slane %v1148_v49, %v6754_v55  ;;  %v1377_v49 = vsel %vm527_vm0, %v298_v32, 0.0  ;;  %6011 = vmatpush3.msra.mxu0 %v2078_v34 }
 0x22a   :  { %6012 = vmatprep.subr.mxu0 %v2093_v35 }
 0x22b   :  { %v3892_v14 = vsel %vm2941_vm14, %v3891_v58, %v3887_v45  ;;  %1360 = vadd.xlane.f32.xlu1 %v1359_v50  ;;  %1357 = vadd.xlane.f32.xlu0 %v1356_v56  ;;  %v1374_v50 = vsel %vm527_vm0, %v297_v33, 0.0  ;;  %v300_v58 = vld [vmem:[%s10653_s0 + $0x8e8] sm:$0xff]  ;;  %v1386_v33 = vsel %vm527_vm0, %v301_v17, 0.0 }
 0x22c   :  { %v1157_v0 = vpop.xlane.xlu1 %1156  ;;  %v1154_v1 = vpop.xlane.xlu0 %1153  ;;  %v7947_v5 = vsel %vm2948_vm15, %v3896_v11, %v3892_v14  ;;  %6013 = vmatpush3.msra.mxu0 %v2077_v39  ;;  %v2076_v14 = vld [vmem:[%s10654_s1 + $0x60] sm:$0xff] }
 0x22d   :  { %10667 = vst [vmem:[#allocation10_spill] sm:$0xff] %v7947_v5  ;;  %v3905_v7 = vrot.slane %v1157_v0, %v6639_v28  ;;  %v3901_v8 = vrot.slane %v1154_v1, %v6633_v26  ;;  %v2091_v1 = vld [vmem:[%s10654_s1 + $0xd8] sm:$0xff]  ;;  %6014 = vmatprep.subr.mxu0 %v2092_v63  ;;  %v303_v39 = vld [vmem:[%s10653_s0 + $0x900] sm:$0xff] }
 0x22e   :  { %6015 = vmatpush3.msra.mxu0 %v2076_v14  ;;  %v1392_v60 = vsel %vm527_vm0, %v303_v39, 0.0 }
 0x22f   :  { %v3906_v16 = vsel %vm2850_vm1, %v3905_v7, %v3901_v8  ;;  %1366 = vadd.xlane.f32.xlu1 %v1365_v2  ;;  %1363 = vadd.xlane.f32.xlu0 %v1362_v4  ;;  %v1383_v8 = vsel %vm527_vm0, %v300_v58, 0.0 }
 0x230   :  { %v1163_v18 = vpop.xlane.xlu1 %1162  ;;  %v1160_v20 = vpop.xlane.xlu0 %1159  ;;  %6016 = vmatprep.subr.mxu0 %v2091_v1  ;;  %v305_v1 = vld [vmem:[%s10653_s0 + $0x910] sm:$0xff] }
 0x231   :  { %v3915_v29 = vrot.slane %v1163_v18, %v6636_v27  ;;  %v3910_v30 = vrot.slane %v1160_v20, %v6646_v31  ;;  %v2075_v18 = vld [vmem:[%s10654_s1 + $0x58] sm:$0xff]  ;;  %v2090_v20 = vld [vmem:[%s10654_s1 + $0xd0] sm:$0xff]  ;;  %v1398_v17 = vsel %vm527_vm0, %v305_v1, 0.0 }
 0x232   :  { %6017 = vmatpush3.msra.mxu0 %v2075_v18 }
 0x233   :  { %v3911_v37 = vsel %vm2857_vm2, %v3910_v30, %v3906_v16  ;;  %1372 = vadd.xlane.f32.xlu1 %v1371_v22  ;;  %1369 = vadd.xlane.f32.xlu0 %v1368_v23  ;;  %v302_v16 = vld [vmem:[%s10653_s0 + $0x8f8] sm:$0xff]  ;;  %v2074_v23 = vld [vmem:[%s10654_s1 + $0x50] sm:$0xff] }
 0x234   :  { %v1169_v41 = vpop.xlane.xlu1 %1168  ;;  %v3916_v43 = vsel %vm2864_vm3, %v3915_v29, %v3911_v37  ;;  %v1166_v45 = vpop.xlane.xlu0 %1165  ;;  %v1389_v32 = vsel %vm527_vm0, %v302_v16, 0.0  ;;  %v304_v37 = vld [vmem:[%s10653_s0 + $0x908] sm:$0xff]  ;;  %6018 = vmatprep.subr.mxu0 %v2090_v20 }
 0x235   :  { %v3925_v56 = vrot.slane %v1169_v41, %v6651_v36  ;;  %v3920_v11 = vrot.slane %v1166_v45, %v6665_v44  ;;  %v2089_v41 = vld [vmem:[%s10654_s1 + $0xc8] sm:$0xff]  ;;  %6019 = vmatpush3.msra.mxu0 %v2074_v23  ;;  %v1395_v58 = vsel %vm527_vm0, %v304_v37, 0.0  ;;  %v307_v23 = vld [vmem:[%s10653_s0 + $0x920] sm:$0xff] }
 0x236   :  { %6020 = vmatprep.subr.mxu0 %v2089_v41  ;;  %v1404_v37 = vsel %vm527_vm0, %v307_v23, 0.0 }
 0x237   :  { %v3921_v0 = vsel %vm2871_vm4, %v3920_v11, %v3916_v43  ;;  %1378 = vadd.xlane.f32.xlu1 %v1377_v49  ;;  %1375 = vadd.xlane.f32.xlu0 %v1374_v50  ;;  %v2073_v43 = vld [vmem:[%s10654_s1 + $0x48] sm:$0xff]  ;;  %v2088_v49 = vld [vmem:[%s10654_s1 + $0xc0] sm:$0xff] }
 0x238   :  { %v1175_v2 = vpop.xlane.xlu1 %1174  ;;  %v3926_v4 = vsel %vm2878_vm5, %v3925_v56, %v3921_v0  ;;  %v1172_v7 = vpop.xlane.xlu0 %1171  ;;  %v306_v0 = vld [vmem:[%s10653_s0 + $0x918] sm:$0xff]  ;;  %6021 = vmatpush3.msra.mxu0 %v2073_v43 }
 0x239   :  { %v3935_v12 = vrot.slane %v1175_v2, %v6673_v52  ;;  %v3930_v15 = vrot.slane %v1172_v7, %v6676_v53  ;;  %v2072_v2 = vld [vmem:[%s10654_s1 + $0x40] sm:$0xff]  ;;  %6022 = vmatprep.subr.mxu0 %v2088_v49  ;;  %v1401_v16 = vsel %vm527_vm0, %v306_v0, 0.0  ;;  %v309_v49 = vld [vmem:[%s10653_s0 + $0x930] sm:$0xff] }
 0x23a   :  { %6023 = vmatpush3.msra.mxu0 %v2072_v2  ;;  %v1410_v0 = vsel %vm527_vm0, %v309_v49, 0.0 }
 0x23b   :  { %v3931_v22 = vsel %vm2885_vm6, %v3930_v15, %v3926_v4  ;;  %1384 = vadd.xlane.f32.xlu1 %v1383_v8  ;;  %1381 = vadd.xlane.f32.xlu0 %v1380_v10  ;;  %v2087_v4 = vld [vmem:[%s10654_s1 + $0xb8] sm:$0xff] }
 0x23c   :  { %v1181_v24 = vpop.xlane.xlu1 %1180  ;;  %v3936_v29 = vsel %vm10661_vm7, %v3935_v12, %v3931_v22  ;;  %v1178_v30 = vpop.xlane.xlu0 %1177  ;;  %v2071_v8 = vld [vmem:[%s10654_s1 + $0x38] sm:$0xff]  ;;  %v308_v22 = vld [vmem:[%s10653_s0 + $0x928] sm:$0xff]  ;;  %6024 = vmatprep.subr.mxu0 %v2087_v4 }
 0x23d   :  { %v3945_v34 = vrot.slane %v1181_v24, %v6694_v3  ;;  %v3940_v35 = vrot.slane %v1178_v30, %v6706_v9  ;;  %v2086_v24 = vld [vmem:[%s10654_s1 + $0xb0] sm:$0xff]  ;;  %6025 = vmatpush3.msra.mxu0 %v2071_v8  ;;  %v311_v8 = vld [vmem:[%s10653_s0 + $0x940] sm:$0xff] }
 0x23e   :  { %6026 = vmatprep.subr.mxu0 %v2086_v24 }
 0x23f   :  { %v3941_v45 = vsel %vm2899_vm8, %v3940_v35, %v3936_v29  ;;  %1390 = vadd.xlane.f32.xlu1 %v1389_v32  ;;  %1387 = vadd.xlane.f32.xlu0 %v1386_v33  ;;  %v2070_v29 = vld [vmem:[%s10654_s1 + $0x30] sm:$0xff]  ;;  %v2085_v32 = vld [vmem:[%s10654_s1 + $0xa8] sm:$0xff]  ;;  %v1407_v35 = vsel %vm527_vm0, %v308_v22, 0.0  ;;  %v1416_v22 = vsel %vm527_vm0, %v311_v8, 0.0 }
 0x240   :  { %v1187_v50 = vpop.xlane.xlu1 %1186  ;;  %v3946_v56 = vsel %vm10658_vm9, %v3945_v34, %v3941_v45  ;;  %v1184_v11 = vpop.xlane.xlu0 %1183  ;;  %v310_v45 = vld [vmem:[%s10653_s0 + $0x938] sm:$0xff]  ;;  %6027 = vmatpush3.msra.mxu0 %v2070_v29 }
 0x241   :  { %v3955_v63 = vrot.slane %v1187_v50, %v6714_v19  ;;  %v3950_v14 = vrot.slane %v1184_v11, %v6726_v25  ;;  %v2069_v50 = vld [vmem:[%s10654_s1 + $0x28] sm:$0xff]  ;;  %6028 = vmatprep.subr.mxu0 %v2085_v32  ;;  %v2068_v11 = vld [vmem:[%s10654_s1 + $0x20] sm:$0xff]  ;;  %v314_v29 = vld [vmem:[%s10653_s0 + $0x958] sm:$0xff] }
 0x242   :  { %6029 = vmatpush3.msra.mxu0 %v2069_v50  ;;  %v2066_v32 = vld [vmem:[%s10654_s1 + $0x10] sm:$0xff] }
 0x243   :  { %v3951_v7 = vsel %vm2913_vm10, %v3950_v14, %v3946_v56  ;;  %1396 = vadd.xlane.f32.xlu1 %v1395_v58  ;;  %1393 = vadd.xlane.f32.xlu0 %v1392_v60  ;;  %v2084_v56 = vld [vmem:[%s10654_s1 + $0xa0] sm:$0xff]  ;;  %v1413_v14 = vsel %vm527_vm0, %v310_v45, 0.0 }
 0x244   :  { %v1193_v10 = vpop.xlane.xlu1 %1192  ;;  %v3956_v12 = vsel %vm2920_vm11, %v3955_v63, %v3951_v7  ;;  %v1190_v15 = vpop.xlane.xlu0 %1189  ;;  %v312_v7 = vld [vmem:[%s10653_s0 + $0x948] sm:$0xff]  ;;  %6030 = vmatprep.subr.mxu0 %v2084_v56 }
 0x245   :  { %v3965_v18 = vrot.slane %v1193_v10, %v6734_v38  ;;  %v3960_v20 = vrot.slane %v1190_v15, %v6740_v42  ;;  %v2083_v10 = vld [vmem:[%s10654_s1 + $0x98] sm:$0xff]  ;;  %6031 = vmatpush3.msra.mxu0 %v2068_v11  ;;  %v316_v56 = vld [vmem:[%s10653_s0 + $0x968] sm:$0xff]  ;;  %v315_v11 = vld [vmem:[%s10653_s0 + $0x960] sm:$0xff] }
 0x246   :  { %6032 = vmatprep.subr.mxu0 %v2083_v10 }
 0x247   :  { %v3961_v30 = vsel %vm10657_vm12, %v3960_v20, %v3956_v12  ;;  %1402 = vadd.xlane.f32.xlu1 %v1401_v16  ;;  %1399 = vadd.xlane.f32.xlu0 %v1398_v17  ;;  %v2067_v12 = vld [vmem:[%s10654_s1 + $0x18] sm:$0xff]  ;;  %v2082_v16 = vld [vmem:[%s10654_s1 + $0x90] sm:$0xff]  ;;  %v1419_v20 = vsel %vm527_vm0, %v312_v7, 0.0  ;;  %v1428_v7 = vsel %vm527_vm0, %v315_v11, 0.0 }
 0x248   :  { %v1199_v33 = vpop.xlane.xlu1 %1198  ;;  %v1196_v34 = vpop.xlane.xlu0 %1195  ;;  %v3966_v39 = vsel %vm2934_vm13, %v3965_v18, %v3961_v30  ;;  %v313_v30 = vld [vmem:[%s10653_s0 + $0x950] sm:$0xff]  ;;  %6033 = vmatpush3.msra.mxu0 %v2067_v12  ;;  %v318_v12 = vld [vmem:[%s10653_s0 + $0x978] sm:$0xff] }
 0x249   :  { %v3975_v41 = vrot.slane %v1199_v33, %v6759_v57  ;;  %v3970_v43 = vrot.slane %v1196_v34, %v6754_v55  ;;  %6034 = vmatprep.subr.mxu0 %v2082_v16  ;;  %v2081_v33 = vld [vmem:[%s10654_s1 + $0x88] sm:$0xff]  ;;  %v1422_v45 = vsel %vm527_vm0, %v313_v30, 0.0 }
 0x24a   :  { %6035 = vmatpush3.msra.mxu0 %v2066_v32  ;;  %v320_v30 = vld [vmem:[%s10653_s0 + $0x988] sm:$0xff]  ;;  %v319_v32 = vld [vmem:[%s10653_s0 + $0x980] sm:$0xff] }
 0x24b   :  { %1408 = vadd.xlane.f32.xlu1 %v1407_v35  ;;  %1405 = vadd.xlane.f32.xlu0 %v1404_v37  ;;  %v3971_v58 = vsel %vm2941_vm14, %v3970_v43, %v3966_v39  ;;  %v2065_v35 = vld [vmem:[%s10654_s1 + $0x8] sm:$0xff]  ;;  %v1425_v43 = vsel %vm527_vm0, %v314_v29, 0.0 }
 0x24c   :  { %v1205_v60 = vpop.xlane.xlu1 %1204  ;;  %v1202_v63 = vpop.xlane.xlu0 %1201  ;;  %v8116_v1 = vsel %vm2948_vm15, %v3975_v41, %v3971_v58  ;;  %6036 = vmatprep.subr.mxu0 %v2081_v33  ;;  %v2080_v58 = vld [vmem:[%s10654_s1 + $0x80] sm:$0xff] }
 0x24d   :  { %10668 = vst [vmem:[#allocation11_spill] sm:$0xff] %v8116_v1  ;;  %v3984_v2 = vrot.slane %v1205_v60, %v6639_v28  ;;  %v3980_v4 = vrot.slane %v1202_v63, %v6633_v26  ;;  %6037 = vmatpush3.msra.mxu0 %v2065_v35  ;;  %v2064_v60 = vld [vmem:[%s10654_s1] sm:$0xff] }
 0x24e   :  { %6038 = vmatprep.subr.mxu0 %v2080_v58 }
 0x24f   :  { %v3985_v15 = vsel %vm2850_vm1, %v3984_v2, %v3980_v4  ;;  %1414 = vadd.xlane.f32.xlu1 %v1413_v14  ;;  %1411 = vadd.xlane.f32.xlu0 %v1410_v0  ;;  %v1431_v4 = vsel %vm527_vm0, %v316_v56, 0.0 }
 0x250   :  { %v1211_v17 = vpop.xlane.xlu1 %1210  ;;  %v1208_v18 = vpop.xlane.xlu0 %1207  ;;  %6039 = vmatpush3.msra.mxu0 %v2064_v60 }
 0x251   :  { %v3994_v23 = vrot.slane %v1211_v17, %v6636_v27  ;;  %v3989_v24 = vrot.slane %v1208_v18, %v6646_v31 }
 0x253   :  { %v3990_v34 = vsel %vm2857_vm2, %v3989_v24, %v3985_v15  ;;  %1420 = vadd.xlane.f32.xlu1 %v1419_v20  ;;  %1417 = vadd.xlane.f32.xlu0 %v1416_v22  ;;  %v317_v15 = vld [vmem:[%s10653_s0 + $0x970] sm:$0xff]  ;;  %v1437_v22 = vsel %vm527_vm0, %v318_v12, 0.0 }
 0x254   :  { %v1217_v37 = vpop.xlane.xlu1 %1216  ;;  %v3995_v39 = vsel %vm2864_vm3, %v3994_v23, %v3990_v34  ;;  %v1214_v41 = vpop.xlane.xlu0 %1213  ;;  %v1434_v23 = vsel %vm527_vm0, %v317_v15, 0.0 }
 0x255   :  { %v4004_v49 = vrot.slane %v1217_v37, %v6651_v36  ;;  %v3999_v50 = vrot.slane %v1214_v41, %v6665_v44  ;;  %v1440_v41 = vsel %vm527_vm0, %v319_v32, 0.0 }
 0x257   :  { %v4000_v63 = vsel %vm2871_vm4, %v3999_v50, %v3995_v39  ;;  %1426 = vadd.xlane.f32.xlu1 %v1425_v43  ;;  %1423 = vadd.xlane.f32.xlu0 %v1422_v45  ;;  %v1443_v39 = vsel %vm527_vm0, %v320_v30, 0.0  ;;  %v321_v50 = vld [vmem:[%s10653_s0 + $0x990] sm:$0xff] }
 0x258   :  { %v1223_v14 = vpop.xlane.xlu1 %1222  ;;  %v4005_v0 = vsel %vm2878_vm5, %v4004_v49, %v4000_v63  ;;  %v1220_v2 = vpop.xlane.xlu0 %1219  ;;  %v322_v49 = vld [vmem:[%s10653_s0 + $0x998] sm:$0xff] }
 0x259   :  { %v4014_v8 = vrot.slane %v1223_v14, %v6673_v52  ;;  %v4009_v10 = vrot.slane %v1220_v2, %v6676_v53  ;;  %v1449_v63 = vsel %vm527_vm0, %v322_v49, 0.0  ;;  %v1446_v14 = vsel %vm527_vm0, %v321_v50, 0.0  ;;  %v2111_v49 = vld [vmem:[%s10654_s1 + $0x178] sm:$0xff] }
 0x25b   :  { %v4010_v16 = vsel %vm2885_vm6, %v4009_v10, %v4005_v0  ;;  %1432 = vadd.xlane.f32.xlu1 %v1431_v4  ;;  %1429 = vadd.xlane.f32.xlu0 %v1428_v7  ;;  %v324_v4 = vld [vmem:[%s10653_s0 + $0x9a8] sm:$0xff]  ;;  %v323_v7 = vld [vmem:[%s10653_s0 + $0x9a0] sm:$0xff] }
 0x25c   :  { %v1229_v17 = vpop.xlane.xlu1 %1228  ;;  %v4015_v18 = vsel %vm10661_vm7, %v4014_v8, %v4010_v16  ;;  %v1226_v20 = vpop.xlane.xlu0 %1225  ;;  %v1455_v16 = vsel %vm527_vm0, %v324_v4, 0.0  ;;  %v2110_v4 = vld [vmem:[%s10654_s1 + $0x170] sm:$0xff] }
 0x25d   :  { %v4024_v24 = vrot.slane %v1229_v17, %v6694_v3  ;;  %v4019_v29 = vrot.slane %v1226_v20, %v6706_v9  ;;  %v1452_v17 = vsel %vm527_vm0, %v323_v7, 0.0 }
 0x25f   :  { %v4020_v33 = vsel %vm2899_vm8, %v4019_v29, %v4015_v18  ;;  %1438 = vadd.xlane.f32.xlu1 %v1437_v22  ;;  %1435 = vadd.xlane.f32.xlu0 %v1434_v23  ;;  %v326_v22 = vld [vmem:[%s10653_s0 + $0x9b8] sm:$0xff]  ;;  %v325_v23 = vld [vmem:[%s10653_s0 + $0x9b0] sm:$0xff] }
 0x260   :  { %v1235_v34 = vpop.xlane.xlu1 %1234  ;;  %v4025_v35 = vsel %vm10658_vm9, %v4024_v24, %v4020_v33  ;;  %v1232_v37 = vpop.xlane.xlu0 %1231  ;;  %v1461_v32 = vsel %vm527_vm0, %v326_v22, 0.0  ;;  %v1458_v33 = vsel %vm527_vm0, %v325_v23, 0.0  ;;  %v332_v23 = vld [vmem:[%s10653_s0 + $0x9e8] sm:$0xff] }
 0x261   :  { %v4034_v43 = vrot.slane %v1235_v34, %v6714_v19  ;;  %v4029_v45 = vrot.slane %v1232_v37, %v6726_v25 }
 0x263   :  { %v4030_v56 = vsel %vm2913_vm10, %v4029_v45, %v4025_v35  ;;  %1444 = vadd.xlane.f32.xlu1 %v1443_v39  ;;  %1441 = vadd.xlane.f32.xlu0 %v1440_v41  ;;  %v328_v39 = vld [vmem:[%s10653_s0 + $0x9c8] sm:$0xff]  ;;  %v327_v41 = vld [vmem:[%s10653_s0 + $0x9c0] sm:$0xff]  ;;  %v2127_v45 = vld [vmem:[%s10654_s1 + $0x1f8] sm:$0xff] }
 0x264   :  { %v1241_v11 = vpop.xlane.xlu1 %1240  ;;  %v4035_v58 = vsel %vm2920_vm11, %v4034_v43, %v4030_v56  ;;  %v1238_v60 = vpop.xlane.xlu0 %1237  ;;  %6043 = vmatprep.subr.mxu1 %v2127_v45 }
 0x265   :  { %v4044_v0 = vrot.slane %v1241_v11, %v6734_v38  ;;  %v4039_v2 = vrot.slane %v1238_v60, %v6740_v42  ;;  %v1467_v11 = vsel %vm527_vm0, %v328_v39, 0.0  ;;  %6044 = vmatpush3.msra.mxu1 %v2111_v49 }
 0x267   :  { %v4040_v8 = vsel %vm10657_vm12, %v4039_v2, %v4035_v58  ;;  %1450 = vadd.xlane.f32.xlu1 %v1449_v63  ;;  %1447 = vadd.xlane.f32.xlu0 %v1446_v14  ;;  %v1464_v58 = vsel %vm527_vm0, %v327_v41, 0.0  ;;  %v330_v14 = vld [vmem:[%s10653_s0 + $0x9d8] sm:$0xff]  ;;  %v2126_v2 = vld [vmem:[%s10654_s1 + $0x1f0] sm:$0xff]  ;;  %v1479_v41 = vsel %vm527_vm0, %v332_v23, 0.0 }
 0x268   :  { %v1247_v10 = vpop.xlane.xlu1 %1246  ;;  %v4045_v12 = vsel %vm2934_vm13, %v4044_v0, %v4040_v8  ;;  %v1244_v15 = vpop.xlane.xlu0 %1243  ;;  %v329_v0 = vld [vmem:[%s10653_s0 + $0x9d0] sm:$0xff]  ;;  %6045 = vmatprep.subr.mxu1 %v2126_v2  ;;  %v2125_v8 = vld [vmem:[%s10654_s1 + $0x1e8] sm:$0xff] }
 0x269   :  { %v4054_v18 = vrot.slane %v1247_v10, %v6759_v57  ;;  %v4049_v20 = vrot.slane %v1244_v15, %v6754_v55  ;;  %v2109_v10 = vld [vmem:[%s10654_s1 + $0x168] sm:$0xff]  ;;  %6046 = vmatpush3.msra.mxu1 %v2110_v4 }
 0x26a   :  { %6047 = vmatprep.subr.mxu1 %v2125_v8 }
 0x26b   :  { %v4050_v24 = vsel %vm2941_vm14, %v4049_v20, %v4045_v12  ;;  %1456 = vadd.xlane.f32.xlu1 %v1455_v16  ;;  %1453 = vadd.xlane.f32.xlu0 %v1452_v17  ;;  %v1473_v17 = vsel %vm527_vm0, %v330_v14, 0.0 }
 0x26c   :  { %v1253_v29 = vpop.xlane.xlu1 %1252  ;;  %v1250_v30 = vpop.xlane.xlu0 %1249  ;;  %v8237_v34 = vsel %vm2948_vm15, %v4054_v18, %v4050_v24  ;;  %v1470_v18 = vsel %vm527_vm0, %v329_v0, 0.0  ;;  %v331_v24 = vld [vmem:[%s10653_s0 + $0x9e0] sm:$0xff]  ;;  %6048 = vmatpush3.msra.mxu1 %v2109_v10 }
 0x26d   :  { %10669 = vst [vmem:[#allocation12_spill] sm:$0xff] %v8237_v34  ;;  %v4063_v35 = vrot.slane %v1253_v29, %v6639_v28  ;;  %v4059_v37 = vrot.slane %v1250_v30, %v6633_v26  ;;  %v2124_v29 = vld [vmem:[%s10654_s1 + $0x1e0] sm:$0xff]  ;;  %v442_v34 = vld [vmem:[%s10653_s0 + $0xd58] sm:$0xff] }
 0x26e   :  { %v2108_v30 = vld [vmem:[%s10654_s1 + $0x160] sm:$0xff]  ;;  %6049 = vmatprep.subr.mxu1 %v2124_v29  ;;  %v1809_v1 = vsel %vm527_vm0, %v442_v34, 0.0 }
 0x26f   :  { %v4064_v43 = vsel %vm2850_vm1, %v4063_v35, %v4059_v37  ;;  %1462 = vadd.xlane.f32.xlu1 %v1461_v32  ;;  %1459 = vadd.xlane.f32.xlu0 %v1458_v33  ;;  %v2123_v33 = vld [vmem:[%s10654_s1 + $0x1d8] sm:$0xff] }
 0x270   :  { %v1259_v50 = vpop.xlane.xlu1 %1258  ;;  %v1256_v56 = vpop.xlane.xlu0 %1255  ;;  %6050 = vmatpush3.msra.mxu1 %v2108_v30 }
 0x271   :  { %v4073_v60 = vrot.slane %v1259_v50, %v6636_v27  ;;  %v4068_v63 = vrot.slane %v1256_v56, %v6646_v31  ;;  %v334_v50 = vld [vmem:[%s10653_s0 + $0x9f8] sm:$0xff]  ;;  %v333_v56 = vld [vmem:[%s10653_s0 + $0x9f0] sm:$0xff]  ;;  %6051 = vmatprep.subr.mxu1 %v2123_v33 }
 0x272   :  { %v1485_v4 = vsel %vm527_vm0, %v334_v50, 0.0 }
 0x273   :  { %v4069_v7 = vsel %vm2857_vm2, %v4068_v63, %v4064_v43  ;;  %1468 = vadd.xlane.f32.xlu1 %v1467_v11  ;;  %1465 = vadd.xlane.f32.xlu0 %v1464_v58  ;;  %v1476_v43 = vsel %vm527_vm0, %v331_v24, 0.0  ;;  %v2107_v11 = vld [vmem:[%s10654_s1 + $0x158] sm:$0xff]  ;;  %v2122_v58 = vld [vmem:[%s10654_s1 + $0x1d0] sm:$0xff] }
 0x274   :  { %v1265_v12 = vpop.xlane.xlu1 %1264  ;;  %v4074_v15 = vsel %vm2864_vm3, %v4073_v60, %v4069_v7  ;;  %v1262_v16 = vpop.xlane.xlu0 %1261  ;;  %v2106_v63 = vld [vmem:[%s10654_s1 + $0x150] sm:$0xff]  ;;  %v1482_v7 = vsel %vm527_vm0, %v333_v56, 0.0  ;;  %6052 = vmatpush3.msra.mxu1 %v2107_v11 }
 0x275   :  { %v4083_v20 = vrot.slane %v1265_v12, %v6651_v36  ;;  %v4078_v22 = vrot.slane %v1262_v16, %v6665_v44  ;;  %v336_v12 = vld [vmem:[%s10653_s0 + $0xa08] sm:$0xff]  ;;  %6053 = vmatprep.subr.mxu1 %v2122_v58 }
 0x276   :  { %v2121_v16 = vld [vmem:[%s10654_s1 + $0x1c8] sm:$0xff]  ;;  %6054 = vmatpush3.msra.mxu1 %v2106_v63  ;;  %v1491_v29 = vsel %vm527_vm0, %v336_v12, 0.0 }
 0x277   :  { %v4079_v32 = vsel %vm2871_vm4, %v4078_v22, %v4074_v15  ;;  %1474 = vadd.xlane.f32.xlu1 %v1473_v17  ;;  %1471 = vadd.xlane.f32.xlu0 %v1470_v18  ;;  %v335_v15 = vld [vmem:[%s10653_s0 + $0xa00] sm:$0xff]  ;;  %v2105_v17 = vld [vmem:[%s10654_s1 + $0x148] sm:$0xff] }
 0x278   :  { %v1271_v35 = vpop.xlane.xlu1 %1270  ;;  %v4084_v37 = vsel %vm2878_vm5, %v4083_v20, %v4079_v32  ;;  %v1268_v39 = vpop.xlane.xlu0 %1267  ;;  %v2120_v20 = vld [vmem:[%s10654_s1 + $0x1c0] sm:$0xff]  ;;  %v1488_v30 = vsel %vm527_vm0, %v335_v15, 0.0  ;;  %6055 = vmatprep.subr.mxu1 %v2121_v16 }
 0x279   :  { %v4093_v45 = vrot.slane %v1271_v35, %v6673_v52  ;;  %v4088_v49 = vrot.slane %v1268_v39, %v6676_v53  ;;  %v338_v35 = vld [vmem:[%s10653_s0 + $0xa18] sm:$0xff]  ;;  %6056 = vmatpush3.msra.mxu1 %v2105_v17  ;;  %v2104_v39 = vld [vmem:[%s10654_s1 + $0x140] sm:$0xff] }
 0x27a   :  { %6057 = vmatprep.subr.mxu1 %v2120_v20  ;;  %v1497_v11 = vsel %vm527_vm0, %v338_v35, 0.0 }
 0x27b   :  { %v4089_v60 = vsel %vm2885_vm6, %v4088_v49, %v4084_v37  ;;  %1480 = vadd.xlane.f32.xlu1 %v1479_v41  ;;  %1477 = vadd.xlane.f32.xlu0 %v1476_v43  ;;  %v337_v37 = vld [vmem:[%s10653_s0 + $0xa10] sm:$0xff]  ;;  %v2119_v41 = vld [vmem:[%s10654_s1 + $0x1b8] sm:$0xff] }
 0x27c   :  { %v1277_v14 = vpop.xlane.xlu1 %1276  ;;  %v4094_v0 = vsel %vm10661_vm7, %v4093_v45, %v4089_v60  ;;  %v1274_v2 = vpop.xlane.xlu0 %1273  ;;  %v2103_v45 = vld [vmem:[%s10654_s1 + $0x138] sm:$0xff]  ;;  %v1494_v58 = vsel %vm527_vm0, %v337_v37, 0.0  ;;  %6058 = vmatpush3.msra.mxu1 %v2104_v39 }
 0x27d   :  { %v4103_v8 = vrot.slane %v1277_v14, %v6694_v3  ;;  %v4098_v10 = vrot.slane %v1274_v2, %v6706_v9  ;;  %v340_v14 = vld [vmem:[%s10653_s0 + $0xa28] sm:$0xff]  ;;  %6059 = vmatprep.subr.mxu1 %v2119_v41  ;;  %v2118_v2 = vld [vmem:[%s10654_s1 + $0x1b0] sm:$0xff] }
 0x27e   :  { %6060 = vmatpush3.msra.mxu1 %v2103_v45  ;;  %v1503_v15 = vsel %vm527_vm0, %v340_v14, 0.0  ;;  %v343_v45 = vld [vmem:[%s10653_s0 + $0xa40] sm:$0xff]  ;;  %v346_v14 = vld [vmem:[%s10653_s0 + $0xa58] sm:$0xff] }
 0x27f   :  { %v4099_v18 = vsel %vm2899_vm8, %v4098_v10, %v4094_v0  ;;  %1486 = vadd.xlane.f32.xlu1 %v1485_v4  ;;  %1483 = vadd.xlane.f32.xlu0 %v1482_v7  ;;  %v339_v0 = vld [vmem:[%s10653_s0 + $0xa20] sm:$0xff]  ;;  %v2102_v4 = vld [vmem:[%s10654_s1 + $0x130] sm:$0xff] }
 0x280   :  { %v1283_v22 = vpop.xlane.xlu1 %1282  ;;  %v4104_v23 = vsel %vm10658_vm9, %v4103_v8, %v4099_v18  ;;  %v1280_v24 = vpop.xlane.xlu0 %1279  ;;  %v2117_v8 = vld [vmem:[%s10654_s1 + $0x1a8] sm:$0xff]  ;;  %v1500_v16 = vsel %vm527_vm0, %v339_v0, 0.0  ;;  %6061 = vmatprep.subr.mxu1 %v2118_v2  ;;  %v345_v0 = vld [vmem:[%s10653_s0 + $0xa50] sm:$0xff] }
 0x281   :  { %v4113_v32 = vrot.slane %v1283_v22, %v6714_v19  ;;  %v4108_v33 = vrot.slane %v1280_v24, %v6726_v25  ;;  %v342_v22 = vld [vmem:[%s10653_s0 + $0xa38] sm:$0xff]  ;;  %6062 = vmatpush3.msra.mxu1 %v2102_v4  ;;  %v2101_v24 = vld [vmem:[%s10654_s1 + $0x128] sm:$0xff]  ;;  %v2098_v2 = vld [vmem:[%s10654_s1 + $0x110] sm:$0xff] }
 0x282   :  { %6063 = vmatprep.subr.mxu1 %v2117_v8  ;;  %v1509_v37 = vsel %vm527_vm0, %v342_v22, 0.0  ;;  %v2113_v4 = vld [vmem:[%s10654_s1 + $0x188] sm:$0xff] }
 0x283   :  { %v4109_v43 = vsel %vm2913_vm10, %v4108_v33, %v4104_v23  ;;  %1492 = vadd.xlane.f32.xlu1 %v1491_v29  ;;  %1489 = vadd.xlane.f32.xlu0 %v1488_v30  ;;  %v341_v23 = vld [vmem:[%s10653_s0 + $0xa30] sm:$0xff]  ;;  %v2116_v29 = vld [vmem:[%s10654_s1 + $0x1a0] sm:$0xff] }
 0x284   :  { %v1289_v49 = vpop.xlane.xlu1 %1288  ;;  %v4114_v50 = vsel %vm2920_vm11, %v4113_v32, %v4109_v43  ;;  %v1286_v56 = vpop.xlane.xlu0 %1285  ;;  %v2100_v30 = vld [vmem:[%s10654_s1 + $0x120] sm:$0xff]  ;;  %v1506_v39 = vsel %vm527_vm0, %v341_v23, 0.0  ;;  %6064 = vmatpush3.msra.mxu1 %v2101_v24  ;;  %v344_v43 = vld [vmem:[%s10653_s0 + $0xa48] sm:$0xff] }
 0x285   :  { %v4123_v60 = vrot.slane %v1289_v49, %v6734_v38  ;;  %v4118_v63 = vrot.slane %v1286_v56, %v6740_v42  ;;  %6065 = vmatprep.subr.mxu1 %v2116_v29  ;;  %v2115_v49 = vld [vmem:[%s10654_s1 + $0x198] sm:$0xff]  ;;  %v2114_v56 = vld [vmem:[%s10654_s1 + $0x190] sm:$0xff] }
 0x286   :  { %6066 = vmatpush3.msra.mxu1 %v2100_v30  ;;  %v351_v30 = vld [vmem:[%s10653_s0 + $0xa80] sm:$0xff] }
 0x287   :  { %v4119_v7 = vsel %vm10657_vm12, %v4118_v63, %v4114_v50  ;;  %1498 = vadd.xlane.f32.xlu1 %v1497_v11  ;;  %1495 = vadd.xlane.f32.xlu0 %v1494_v58  ;;  %v2099_v50 = vld [vmem:[%s10654_s1 + $0x118] sm:$0xff]  ;;  %v1512_v63 = vsel %vm527_vm0, %v343_v45, 0.0 }
 0x288   :  { %v1295_v10 = vpop.xlane.xlu1 %1294  ;;  %v1292_v12 = vpop.xlane.xlu0 %1291  ;;  %v4124_v17 = vsel %vm2934_vm13, %v4123_v60, %v4119_v7  ;;  %v1515_v60 = vsel %vm527_vm0, %v344_v43, 0.0  ;;  %6067 = vmatprep.subr.mxu1 %v2115_v49  ;;  %v2097_v7 = vld [vmem:[%s10654_s1 + $0x108] sm:$0xff]  ;;  %v1536_v43 = vsel %vm527_vm0, %v351_v30, 0.0  ;;  %v353_v49 = vld [vmem:[%s10653_s0 + $0xa90] sm:$0xff] }
 0x289   :  { %v4133_v18 = vrot.slane %v1295_v10, %v6759_v57  ;;  %v4128_v20 = vrot.slane %v1292_v12, %v6754_v55  ;;  %6068 = vmatpush3.msra.mxu1 %v2099_v50  ;;  %v1521_v12 = vsel %vm527_vm0, %v346_v14, 0.0  ;;  %v352_v50 = vld [vmem:[%s10653_s0 + $0xa88] sm:$0xff] }
 0x28a   :  { %6069 = vmatprep.subr.mxu1 %v2114_v56  ;;  %v1539_v14 = vsel %vm527_vm0, %v352_v50, 0.0  ;;  %v368_v30 = vld [vmem:[%s10653_s0 + $0xb08] sm:$0xff] }
 0x28b   :  { %1504 = vadd.xlane.f32.xlu1 %v1503_v15  ;;  %1501 = vadd.xlane.f32.xlu0 %v1500_v16  ;;  %v4129_v32 = vsel %vm2941_vm14, %v4128_v20, %v4124_v17  ;;  %v1518_v15 = vsel %vm527_vm0, %v345_v0, 0.0  ;;  %v348_v16 = vld [vmem:[%s10653_s0 + $0xa68] sm:$0xff]  ;;  %v347_v17 = vld [vmem:[%s10653_s0 + $0xa60] sm:$0xff] }
 0x28c   :  { %v8403_v33 = vpop.xlane.xlu1 %1300  ;;  %v8405_v35 = vpop.xlane.xlu0 %1297  ;;  %v8410_v41 = vsel %vm2948_vm15, %v4133_v18, %v4129_v32  ;;  %6070 = vmatpush3.msra.mxu1 %v2098_v2  ;;  %v2112_v18 = vld [vmem:[%s10654_s1 + $0x180] sm:$0xff]  ;;  %v1527_v24 = vsel %vm527_vm0, %v348_v16, 0.0  ;;  %v1524_v29 = vsel %vm527_vm0, %v347_v17, 0.0  ;;  %v349_v32 = vld [vmem:[%s10653_s0 + $0xa70] sm:$0xff]  ;;  %v354_v2 = vld [vmem:[%s10653_s0 + $0xa98] sm:$0xff] }
 0x28d   :  { %10670 = vst [vmem:[#allocation13_spill] sm:$0xff] %v8410_v41  ;;  %6071 = vmatprep.subr.mxu1 %v2113_v4  ;;  %v2096_v20 = vld [vmem:[%s10654_s1 + $0x100] sm:$0xff]  ;;  %v1530_v45 = vsel %vm527_vm0, %v349_v32, 0.0  ;;  %v384_v17 = vld [vmem:[%s10653_s0 + $0xb88] sm:$0xff] }
 0x28e   :  { %6072 = vmatpush3.msra.mxu1 %v2097_v7  ;;  %v383_v0 = vld [vmem:[%s10653_s0 + $0xb80] sm:$0xff] }
 0x28f   :  { %1510 = vadd.xlane.f32.xlu1 %v1509_v37  ;;  %1507 = vadd.xlane.f32.xlu0 %v1506_v39  ;;  %v355_v16 = vld [vmem:[%s10653_s0 + $0xaa0] sm:$0xff] }
 0x290   :  { %v8427_v11 = vpop.xlane.xlu1 %1306  ;;  %v8429_v58 = vpop.xlane.xlu0 %1303  ;;  %6073 = vmatprep.subr.mxu1 %v2112_v18  ;;  %v367_v32 = vld [vmem:[%s10653_s0 + $0xb00] sm:$0xff] }
 0x291   :  { %6074 = vmatpush3.msra.mxu1 %v2096_v20 }
 0x293   :  { %1516 = vadd.xlane.f32.xlu1 %v1515_v60  ;;  %1513 = vadd.xlane.f32.xlu0 %v1512_v63  ;;  %v1542_v63 = vsel %vm527_vm0, %v353_v49, 0.0 }
 0x294   :  { %v8448_v8 = vpop.xlane.xlu1 %1312  ;;  %v8450_v10 = vpop.xlane.xlu0 %1309 }
 0x297   :  { %1522 = vadd.xlane.f32.xlu1 %v1521_v12  ;;  %1519 = vadd.xlane.f32.xlu0 %v1518_v15  ;;  %v1632_v12 = vsel %vm527_vm0, %v383_v0, 0.0  ;;  %v1545_v15 = vsel %vm527_vm0, %v354_v2, 0.0  ;;  %v4147_v0 = vrot.slane %v8429_v58, %v6646_v31  ;;  %v356_v2 = vld [vmem:[%s10653_s0 + $0xaa8] sm:$0xff] }
 0x298   :  { %v8466_v22 = vpop.xlane.xlu1 %1318  ;;  %v8468_v23 = vpop.xlane.xlu0 %1315 }
 0x29b   :  { %1528 = vadd.xlane.f32.xlu1 %v1527_v24  ;;  %1525 = vadd.xlane.f32.xlu0 %v1524_v29  ;;  %v1548_v24 = vsel %vm527_vm0, %v355_v16, 0.0  ;;  %v1635_v29 = vsel %vm527_vm0, %v384_v17, 0.0  ;;  %v4152_v16 = vrot.slane %v8427_v11, %v6636_v27  ;;  %v369_v11 = vld [vmem:[%s10653_s0 + $0xb10] sm:$0xff] }
 0x29c   :  { %v8478_v37 = vpop.xlane.xlu1 %1324  ;;  %v8480_v39 = vpop.xlane.xlu0 %1321 }
 0x29f   :  { %1537 = vadd.xlane.f32.xlu1 %v1536_v43  ;;  %1531 = vadd.xlane.f32.xlu0 %v1530_v45  ;;  %v4142_v43 = vrot.slane %v8403_v33, %v6639_v28  ;;  %v4138_v45 = vrot.slane %v8405_v35, %v6633_v26  ;;  %v385_v33 = vld [vmem:[%s10653_s0 + $0xb90] sm:$0xff] }
 0x2a0   :  { %v8490_v56 = vpop.xlane.xlu1 %1330  ;;  %v8492_v60 = vpop.xlane.xlu0 %1327 }
 0x2a3   :  { %1543 = vadd.xlane.f32.xlu1 %v1542_v63  ;;  %1540 = vadd.xlane.f32.xlu0 %v1539_v14  ;;  %v1587_v63 = vsel %vm527_vm0, %v368_v30, 0.0  ;;  %v1584_v14 = vsel %vm527_vm0, %v367_v32, 0.0  ;;  %v4157_v32 = vrot.slane %v8450_v10, %v6665_v44  ;;  %v4162_v10 = vrot.slane %v8448_v8, %v6651_v36  ;;  %v357_v8 = vld [vmem:[%s10653_s0 + $0xab0] sm:$0xff] }
 0x2a4   :  { %v8502_v4 = vpop.xlane.xlu1 %1336  ;;  %v8504_v7 = vpop.xlane.xlu0 %1333 }
 0x2a7   :  { %1633 = vadd.xlane.f32.xlu1 %v1632_v12  ;;  %1546 = vadd.xlane.f32.xlu0 %v1545_v15  ;;  %v4143_v15 = vsel %vm2850_vm1, %v4142_v43, %v4138_v45  ;;  %v386_v43 = vld [vmem:[%s10653_s0 + $0xb98] sm:$0xff] }
 0x2a8   :  { %v8514_v18 = vpop.xlane.xlu1 %1342  ;;  %v8516_v20 = vpop.xlane.xlu0 %1339  ;;  %v4148_v30 = vsel %vm2857_vm2, %v4147_v0, %v4143_v15  ;;  %v1590_v15 = vsel %vm527_vm0, %v369_v11, 0.0  ;;  %v1554_v11 = vsel %vm527_vm0, %v357_v8, 0.0  ;;  %v4187_v8 = vrot.slane %v8492_v60, %v6726_v25 }
 0x2a9   :  { %v4192_v60 = vrot.slane %v8490_v56, %v6714_v19  ;;  %v359_v56 = vld [vmem:[%s10653_s0 + $0xac0] sm:$0xff] }
 0x2ab   :  { %1549 = vadd.xlane.f32.xlu1 %v1548_v24  ;;  %1636 = vadd.xlane.f32.xlu0 %v1635_v29  ;;  %v1551_v24 = vsel %vm527_vm0, %v356_v2, 0.0  ;;  %v1638_v29 = vsel %vm527_vm0, %v385_v33, 0.0  ;;  %v1641_v33 = vsel %vm527_vm0, %v386_v43, 0.0 }
 0x2ac   :  { %v1349_v49 = vpop.xlane.xlu1 %1348  ;;  %v1346_v50 = vpop.xlane.xlu0 %1345 }
 0x2ad   :  { %v4221_v12 = vrot.slane %v1349_v49, %v6639_v28  ;;  %v4217_v35 = vrot.slane %v1346_v50, %v6633_v26 }
 0x2af   :  { %1588 = vadd.xlane.f32.xlu1 %v1587_v63  ;;  %1585 = vadd.xlane.f32.xlu0 %v1584_v14  ;;  %v4222_v45 = vsel %vm2850_vm1, %v4221_v12, %v4217_v35  ;;  %v4153_v14 = vsel %vm2864_vm3, %v4152_v16, %v4148_v30  ;;  %v4167_v12 = vrot.slane %v8468_v23, %v6676_v53 }
 0x2b0   :  { %v1355_v58 = vpop.xlane.xlu1 %1354  ;;  %v1352_v17 = vpop.xlane.xlu0 %1351  ;;  %v4172_v23 = vrot.slane %v8466_v22, %v6673_v52  ;;  %v387_v22 = vld [vmem:[%s10653_s0 + $0xba0] sm:$0xff] }
 0x2b1   :  { %v4226_v49 = vrot.slane %v1352_v17, %v6646_v31  ;;  %v4231_v50 = vrot.slane %v1355_v58, %v6636_v27  ;;  %v4158_v17 = vsel %vm2871_vm4, %v4157_v32, %v4153_v14  ;;  %v370_v58 = vld [vmem:[%s10653_s0 + $0xb18] sm:$0xff] }
 0x2b2   :  { %v4163_v30 = vsel %vm2878_vm5, %v4162_v10, %v4158_v17  ;;  %v1593_v43 = vsel %vm527_vm0, %v370_v58, 0.0  ;;  %v358_v14 = vld [vmem:[%s10653_s0 + $0xab8] sm:$0xff] }
 0x2b3   :  { %v4227_v63 = vsel %vm2857_vm2, %v4226_v49, %v4222_v45  ;;  %1552 = vadd.xlane.f32.xlu1 %v1551_v24  ;;  %1639 = vadd.xlane.f32.xlu0 %v1638_v29  ;;  %v4168_v45 = vsel %vm2885_vm6, %v4167_v12, %v4163_v30  ;;  %v1557_v12 = vsel %vm527_vm0, %v358_v14, 0.0 }
 0x2b4   :  { %v1361_v0 = vpop.xlane.xlu1 %1360  ;;  %v1358_v2 = vpop.xlane.xlu0 %1357  ;;  %v4232_v24 = vsel %vm2864_vm3, %v4231_v50, %v4227_v63  ;;  %v4177_v50 = vrot.slane %v8480_v39, %v6706_v9  ;;  %v4182_v39 = vrot.slane %v8478_v37, %v6694_v3  ;;  %v371_v37 = vld [vmem:[%s10653_s0 + $0xb20] sm:$0xff] }
 0x2b5   :  { %v4236_v35 = vrot.slane %v1358_v2, %v6665_v44  ;;  %v4241_v16 = vrot.slane %v1361_v0, %v6651_v36 }
 0x2b7   :  { %v4237_v29 = vsel %vm2871_vm4, %v4236_v35, %v4232_v24  ;;  %1642 = vadd.xlane.f32.xlu1 %v1641_v33  ;;  %1591 = vadd.xlane.f32.xlu0 %v1590_v15  ;;  %v4173_v33 = vsel %vm10661_vm7, %v4172_v23, %v4168_v45  ;;  %v1644_v35 = vsel %vm527_vm0, %v387_v22, 0.0  ;;  %v388_v24 = vld [vmem:[%s10653_s0 + $0xba8] sm:$0xff]  ;;  %v1596_v45 = vsel %vm527_vm0, %v371_v37, 0.0 }
 0x2b8   :  { %v1367_v32 = vpop.xlane.xlu1 %1366  ;;  %v1364_v49 = vpop.xlane.xlu0 %1363  ;;  %v4242_v0 = vsel %vm2878_vm5, %v4241_v16, %v4237_v29  ;;  %v4178_v58 = vsel %vm2899_vm8, %v4177_v50, %v4173_v33  ;;  %v372_v22 = vld [vmem:[%s10653_s0 + $0xb28] sm:$0xff] }
 0x2b9   :  { %v4246_v63 = vrot.slane %v1364_v49, %v6676_v53  ;;  %v4251_v10 = vrot.slane %v1367_v32, %v6673_v52  ;;  %v4183_v32 = vsel %vm10658_vm9, %v4182_v39, %v4178_v58  ;;  %v4207_v58 = vrot.slane %v8516_v20, %v6754_v55 }
 0x2ba   :  { %v4188_v50 = vsel %vm2913_vm10, %v4187_v8, %v4183_v32  ;;  %v4212_v20 = vrot.slane %v8514_v18, %v6759_v57  ;;  %v373_v18 = vld [vmem:[%s10653_s0 + $0xb30] sm:$0xff] }
 0x2bb   :  { %v4247_v2 = vsel %vm2885_vm6, %v4246_v63, %v4242_v0  ;;  %1594 = vadd.xlane.f32.xlu1 %v1593_v43  ;;  %1555 = vadd.xlane.f32.xlu0 %v1554_v11  ;;  %v1647_v11 = vsel %vm527_vm0, %v388_v24, 0.0  ;;  %v4197_v63 = vrot.slane %v8504_v7, %v6740_v42  ;;  %v4202_v7 = vrot.slane %v8502_v4, %v6734_v38  ;;  %v389_v4 = vld [vmem:[%s10653_s0 + $0xbb0] sm:$0xff] }
 0x2bc   :  { %v1373_v15 = vpop.xlane.xlu1 %1372  ;;  %v1370_v17 = vpop.xlane.xlu0 %1369  ;;  %v4252_v23 = vsel %vm10661_vm7, %v4251_v10, %v4247_v2  ;;  %v4193_v39 = vsel %vm2920_vm11, %v4192_v60, %v4188_v50  ;;  %v1650_v32 = vsel %vm527_vm0, %v389_v4, 0.0 }
 0x2bd   :  { %v4256_v16 = vrot.slane %v1370_v17, %v6706_v9  ;;  %v4261_v29 = vrot.slane %v1373_v15, %v6694_v3  ;;  %v1599_v17 = vsel %vm527_vm0, %v372_v22, 0.0 }
 0x2bf   :  { %v4257_v30 = vsel %vm2899_vm8, %v4256_v16, %v4252_v23  ;;  %1558 = vadd.xlane.f32.xlu1 %v1557_v12  ;;  %1645 = vadd.xlane.f32.xlu0 %v1644_v35  ;;  %v1560_v12 = vsel %vm527_vm0, %v359_v56, 0.0  ;;  %v4198_v35 = vsel %vm10657_vm12, %v4197_v63, %v4193_v39  ;;  %v360_v16 = vld [vmem:[%s10653_s0 + $0xac8] sm:$0xff] }
 0x2c0   :  { %v1379_v49 = vpop.xlane.xlu1 %1378  ;;  %v1376_v43 = vpop.xlane.xlu0 %1375  ;;  %v4262_v0 = vsel %vm10658_vm9, %v4261_v29, %v4257_v30  ;;  %v1563_v60 = vsel %vm527_vm0, %v360_v16, 0.0  ;;  %v391_v16 = vld [vmem:[%s10653_s0 + $0xbc0] sm:$0xff] }
 0x2c1   :  { %v4266_v14 = vrot.slane %v1376_v43, %v6726_v25  ;;  %v4271_v10 = vrot.slane %v1379_v49, %v6714_v19  ;;  %v4203_v49 = vsel %vm2934_vm13, %v4202_v7, %v4198_v35 }
 0x2c2   :  { %v4208_v50 = vsel %vm2941_vm14, %v4207_v58, %v4203_v49  ;;  %v376_v49 = vld [vmem:[%s10653_s0 + $0xb48] sm:$0xff] }
 0x2c3   :  { %v4267_v2 = vsel %vm2913_vm10, %v4266_v14, %v4262_v0  ;;  %1648 = vadd.xlane.f32.xlu1 %v1647_v11  ;;  %1597 = vadd.xlane.f32.xlu0 %v1596_v45  ;;  %v390_v45 = vld [vmem:[%s10653_s0 + $0xbb8] sm:$0xff]  ;;  %v4213_v7 = vsel %vm2948_vm15, %v4212_v20, %v4208_v50  ;;  %v375_v20 = vld [vmem:[%s10653_s0 + $0xb40] sm:$0xff] }
 0x2c4   :  { %v1385_v33 = vpop.xlane.xlu1 %1384  ;;  %v1382_v15 = vpop.xlane.xlu0 %1381  ;;  %v4272_v37 = vsel %vm2920_vm11, %v4271_v10, %v4267_v2  ;;  %v1653_v0 = vsel %vm527_vm0, %v390_v45, 0.0  ;;  %v1602_v2 = vsel %vm527_vm0, %v373_v18, 0.0  ;;  %v1611_v18 = vsel %vm527_vm0, %v376_v49, 0.0 }
 0x2c5   :  { %v4276_v8 = vrot.slane %v1382_v15, %v6740_v42  ;;  %v4281_v24 = vrot.slane %v1385_v33, %v6734_v38  ;;  %v374_v33 = vld [vmem:[%s10653_s0 + $0xb38] sm:$0xff]  ;;  %v361_v15 = vld [vmem:[%s10653_s0 + $0xad0] sm:$0xff] }
 0x2c6   :  { %v1566_v58 = vsel %vm527_vm0, %v361_v15, 0.0 }
 0x2c7   :  { %v4277_v29 = vsel %vm10657_vm12, %v4276_v8, %v4272_v37  ;;  %1600 = vadd.xlane.f32.xlu1 %v1599_v17  ;;  %1561 = vadd.xlane.f32.xlu0 %v1560_v12  ;;  %vm5399_vm12 = vcmask 1041409   ;;  %v362_v8 = vld [vmem:[%s10653_s0 + $0xad8] sm:$0xff]  ;;  %v1656_v37 = vsel %vm527_vm0, %v391_v16, 0.0  ;;  %v365_v16 = vld [vmem:[%s10653_s0 + $0xaf0] sm:$0xff] }
 0x2c8   :  { %v1391_v23 = vpop.xlane.xlu1 %1390  ;;  %v1388_v30 = vpop.xlane.xlu0 %1387  ;;  %v4282_v63 = vsel %vm2934_vm13, %v4281_v24, %v4277_v29  ;;  %v5400_v17 = vsel %vm5399_vm12, %v4213_v7, %v6783_v13  ;;  %v1569_v24 = vsel %vm527_vm0, %v362_v8, 0.0  ;;  %v392_v29 = vld [vmem:[%s10653_s0 + $0xbc8] sm:$0xff]  ;;  %v378_v8 = vld [vmem:[%s10653_s0 + $0xb58] sm:$0xff]  ;;  %v1578_v49 = vsel %vm527_vm0, %v365_v16, 0.0 }
 0x2c9   :  { %v4291_v43 = vrot.slane %v1391_v23, %v6759_v57  ;;  %v4286_v11 = vrot.slane %v1388_v30, %v6754_v55 }
 0x2cb   :  { %1564 = vadd.xlane.f32.xlu1 %v1563_v60  ;;  %1651 = vadd.xlane.f32.xlu0 %v1650_v32  ;;  %v4287_v14 = vsel %vm2941_vm14, %v4286_v11, %v4282_v63  ;;  %v1659_v60 = vsel %vm527_vm0, %v392_v29, 0.0  ;;  %v1608_v32 = vsel %vm527_vm0, %v375_v20, 0.0  ;;  %v364_v63 = vld [vmem:[%s10653_s0 + $0xae8] sm:$0xff]  ;;  %v2158_v29 = vld [vmem:[%s10654_s1 + $0x2f0] sm:$0xff] }
 0x2cc   :  { %v8666_v22 = vpop.xlane.xlu1 %1396  ;;  %v8668_v56 = vpop.xlane.xlu0 %1393  ;;  %v4292_v10 = vsel %vm2948_vm15, %v4291_v43, %v4287_v14  ;;  %v363_v43 = vld [vmem:[%s10653_s0 + $0xae0] sm:$0xff]  ;;  %v393_v14 = vld [vmem:[%s10653_s0 + $0xbd0] sm:$0xff] }
 0x2cd   :  { %v5401_v39 = vsel %vm5399_vm12, %v4292_v10, %v6880_v59  ;;  %v1605_v59 = vsel %vm527_vm0, %v374_v33, 0.0  ;;  %v1572_v50 = vsel %vm527_vm0, %v363_v43, 0.0  ;;  %v1662_v7 = vsel %vm527_vm0, %v393_v14, 0.0  ;;  %v377_v33 = vld [vmem:[%s10653_s0 + $0xb50] sm:$0xff]  ;;  %v2141_v14 = vld [vmem:[%s10654_s1 + $0x268] sm:$0xff] }
 0x2ce   :  { %5496 = vmatprep.mubr.f32.mxu0 %v5401_v39  ;;  %v394_v39 = vld [vmem:[%s10653_s0 + $0xbd8] sm:$0xff]  ;;  %v2142_v43 = vld [vmem:[%s10654_s1 + $0x270] sm:$0xff] }
 0x2cf   :  { %1654 = vadd.xlane.f32.xlu1 %v1653_v0  ;;  %1603 = vadd.xlane.f32.xlu0 %v1602_v2  ;;  %v1575_v2 = vsel %vm527_vm0, %v364_v63, 0.0  ;;  %v2157_v63 = vld [vmem:[%s10654_s1 + $0x2e8] sm:$0xff] }
 0x2d0   :  { %5497 = vmatmul.mubr.f32.vlgmr.msra.gmra.mxu0 %v5400_v17  ;;  %v8684_v12 = vpop.xlane.xlu1 %1402  ;;  %v8686_v35 = vpop.xlane.xlu0 %1399 }
 0x2d1   :  { %v4305_v16 = vrot.slane %v8686_v35, %v6646_v31  ;;  %v2155_v35 = vld [vmem:[%s10654_s1 + $0x2d8] sm:$0xff] }
 0x2d3   :  { %1606 = vadd.xlane.f32.xlu1 %v1605_v59  ;;  %1567 = vadd.xlane.f32.xlu0 %v1566_v58  ;;  %v1665_v59 = vsel %vm527_vm0, %v394_v39, 0.0  ;;  %v1614_v58 = vsel %vm527_vm0, %v377_v33, 0.0  ;;  %v4296_v39 = vrot.slane %v8668_v56, %v6633_v26  ;;  %v2140_v56 = vld [vmem:[%s10654_s1 + $0x260] sm:$0xff] }
 0x2d4   :  { %v8696_v13 = vpop.xlane.xlu1 %1408  ;;  %v8698_v4 = vpop.xlane.xlu0 %1405 }
 0x2d7   :  { %1570 = vadd.xlane.f32.xlu1 %v1569_v24  ;;  %1657 = vadd.xlane.f32.xlu0 %v1656_v37  ;;  %v2159_v24 = vld [vmem:[%s10654_s1 + $0x2f8] sm:$0xff] }
 0x2d8   :  { %v8708_v23 = vpop.xlane.xlu1 %1414  ;;  %v8710_v30 = vpop.xlane.xlu0 %1411  ;;  %6078 = vmatprep.subr.mxu0 %v2159_v24  ;;  %v2143_v37 = vld [vmem:[%s10654_s1 + $0x278] sm:$0xff]  ;;  %v396_v24 = vld [vmem:[%s10653_s0 + $0xbe8] sm:$0xff] }
 0x2d9   :  { %6079 = vmatpush3.msra.mxu0 %v2143_v37 }
 0x2da   :  { %6080 = vmatprep.subr.mxu0 %v2158_v29 }
 0x2db   :  { %1660 = vadd.xlane.f32.xlu1 %v1659_v60  ;;  %1609 = vadd.xlane.f32.xlu0 %v1608_v32  ;;  %v1617_v32 = vsel %vm527_vm0, %v378_v8, 0.0 }
 0x2dc   :  { %v8720_v11 = vpop.xlane.xlu1 %1420  ;;  %v8722_v45 = vpop.xlane.xlu0 %1417  ;;  %6081 = vmatpush3.msra.mxu0 %v2142_v43 }
 0x2dd   :  { %6082 = vmatprep.subr.mxu0 %v2157_v63 }
 0x2de   :  { %6083 = vmatpush3.msra.mxu0 %v2141_v14  ;;  %v1671_v14 = vsel %vm527_vm0, %v396_v24, 0.0 }
 0x2df   :  { %1612 = vadd.xlane.f32.xlu1 %v1611_v18  ;;  %1573 = vadd.xlane.f32.xlu0 %v1572_v50  ;;  %v366_v18 = vld [vmem:[%s10653_s0 + $0xaf8] sm:$0xff]  ;;  %v395_v50 = vld [vmem:[%s10653_s0 + $0xbe0] sm:$0xff] }
 0x2e0   :  { %v8732_v10 = vpop.xlane.xlu1 %1426  ;;  %v8734_v0 = vpop.xlane.xlu0 %1423  ;;  %v1668_v8 = vsel %vm527_vm0, %v395_v50, 0.0 }
 0x2e3   :  { %1576 = vadd.xlane.f32.xlu1 %v1575_v2  ;;  %1663 = vadd.xlane.f32.xlu0 %v1662_v7  ;;  %v2156_v2 = vld [vmem:[%s10654_s1 + $0x2e0] sm:$0xff]  ;;  %v4300_v7 = vrot.slane %v8666_v22, %v6639_v28 }
 0x2e4   :  { %v8744_v15 = vpop.xlane.xlu1 %1432  ;;  %v8746_v17 = vpop.xlane.xlu0 %1429  ;;  %v379_v22 = vld [vmem:[%s10653_s0 + $0xb60] sm:$0xff]  ;;  %6084 = vmatprep.subr.mxu0 %v2156_v2 }
 0x2e5   :  { %v4301_v43 = vsel %vm2850_vm1, %v4300_v7, %v4296_v39  ;;  %v1620_v2 = vsel %vm527_vm0, %v379_v22, 0.0  ;;  %6085 = vmatpush3.msra.mxu0 %v2140_v56  ;;  %v380_v7 = vld [vmem:[%s10653_s0 + $0xb68] sm:$0xff]  ;;  %v2154_v39 = vld [vmem:[%s10654_s1 + $0x2d0] sm:$0xff]  ;;  %v4320_v56 = vrot.slane %v8696_v13, %v6651_v36 }
 0x2e6   :  { %6086 = vmatprep.subr.mxu0 %v2155_v35  ;;  %v2153_v22 = vld [vmem:[%s10654_s1 + $0x2c8] sm:$0xff]  ;;  %v381_v13 = vld [vmem:[%s10653_s0 + $0xb70] sm:$0xff] }
 0x2e7   :  { %1666 = vadd.xlane.f32.xlu1 %v1665_v59  ;;  %1615 = vadd.xlane.f32.xlu0 %v1614_v58  ;;  %v1581_v58 = vsel %vm527_vm0, %v366_v18, 0.0  ;;  %v4310_v18 = vrot.slane %v8684_v12, %v6636_v27  ;;  %v350_v12 = vld [vmem:[%s10653_s0 + $0xa78] sm:$0xff] }
 0x2e8   :  { %v8765_v20 = vpop.xlane.xlu1 %1438  ;;  %v8767_v60 = vpop.xlane.xlu0 %1435 }
 0x2eb   :  { %1618 = vadd.xlane.f32.xlu1 %v1617_v32  ;;  %1579 = vadd.xlane.f32.xlu0 %v1578_v49  ;;  %v2191_v32 = vld [vmem:[%s10654_s1 + $0x3f8] sm:$0xff] }
 0x2ec   :  { %v1445_v33 = vpop.xlane.xlu1 %1444  ;;  %v1442_v59 = vpop.xlane.xlu0 %1441  ;;  %v2139_v49 = vld [vmem:[%s10654_s1 + $0x258] sm:$0xff]  ;;  %6113 = vmatprep.subr.mxu1 %v2191_v32  ;;  %v1623_v32 = vsel %vm527_vm0, %v380_v7, 0.0  ;;  %v4330_v7 = vrot.slane %v8708_v23, %v6673_v52 }
 0x2ed   :  { %v4379_v37 = vrot.slane %v1445_v33, %v6639_v28  ;;  %v4375_v29 = vrot.slane %v1442_v59, %v6633_v26  ;;  %v4306_v33 = vsel %vm2857_vm2, %v4305_v16, %v4301_v43  ;;  %v4315_v59 = vrot.slane %v8698_v4, %v6665_v44  ;;  %6087 = vmatpush3.msra.mxu0 %v2139_v49  ;;  %v2138_v4 = vld [vmem:[%s10654_s1 + $0x250] sm:$0xff]  ;;  %v382_v23 = vld [vmem:[%s10653_s0 + $0xb78] sm:$0xff] }
 0x2ee   :  { %v1533_v49 = vsel %vm527_vm0, %v350_v12, 0.0  ;;  %6088 = vmatprep.subr.mxu0 %v2154_v39 }
 0x2ef   :  { %1582 = vadd.xlane.f32.xlu1 %v1581_v58  ;;  %1669 = vadd.xlane.f32.xlu0 %v1668_v8  ;;  %v4380_v8 = vsel %vm2850_vm1, %v4379_v37, %v4375_v29  ;;  %v4311_v37 = vsel %vm2864_vm3, %v4310_v18, %v4306_v33  ;;  %v397_v18 = vld [vmem:[%s10653_s0 + $0xbf0] sm:$0xff] }
 0x2f0   :  { %v1451_v50 = vpop.xlane.xlu1 %1450  ;;  %v1448_v63 = vpop.xlane.xlu0 %1447  ;;  %v4316_v43 = vsel %vm2871_vm4, %v4315_v59, %v4311_v37  ;;  %6089 = vmatpush3.msra.mxu0 %v2138_v4  ;;  %v1674_v4 = vsel %vm527_vm0, %v397_v18, 0.0 }
 0x2f1   :  { %v4384_v58 = vrot.slane %v1448_v63, %v6646_v31  ;;  %v4389_v16 = vrot.slane %v1451_v50, %v6636_v27  ;;  %v4325_v50 = vrot.slane %v8710_v30, %v6676_v53  ;;  %6090 = vmatprep.subr.mxu0 %v2153_v22  ;;  %v2152_v30 = vld [vmem:[%s10654_s1 + $0x2c0] sm:$0xff]  ;;  %v4321_v12 = vsel %vm2878_vm5, %v4320_v56, %v4316_v43  ;;  %v398_v56 = vld [vmem:[%s10653_s0 + $0xbf8] sm:$0xff]  ;;  %v2150_v43 = vld [vmem:[%s10654_s1 + $0x2b0] sm:$0xff] }
 0x2f2   :  { %v4335_v22 = vrot.slane %v8722_v45, %v6706_v9  ;;  %v2135_v45 = vld [vmem:[%s10654_s1 + $0x238] sm:$0xff] }
 0x2f3   :  { %v4385_v24 = vsel %vm2857_vm2, %v4384_v58, %v4380_v8  ;;  %1672 = vadd.xlane.f32.xlu1 %v1671_v14  ;;  %1621 = vadd.xlane.f32.xlu0 %v1620_v2  ;;  %v2137_v14 = vld [vmem:[%s10654_s1 + $0x248] sm:$0xff]  ;;  %v2136_v58 = vld [vmem:[%s10654_s1 + $0x240] sm:$0xff] }
 0x2f4   :  { %v1457_v29 = vpop.xlane.xlu1 %1456  ;;  %v1454_v35 = vpop.xlane.xlu0 %1453  ;;  %v4390_v33 = vsel %vm2864_vm3, %v4389_v16, %v4385_v24  ;;  %v1626_v16 = vsel %vm527_vm0, %v381_v13, 0.0  ;;  %6091 = vmatpush3.msra.mxu0 %v2137_v14  ;;  %v4326_v24 = vsel %vm2885_vm6, %v4325_v50, %v4321_v12  ;;  %v4340_v50 = vrot.slane %v8720_v11, %v6694_v3  ;;  %v416_v11 = vld [vmem:[%s10653_s0 + $0xc88] sm:$0xff] }
 0x2f5   :  { %v4394_v63 = vrot.slane %v1454_v35, %v6665_v44  ;;  %v4399_v2 = vrot.slane %v1457_v29, %v6651_v36  ;;  %6092 = vmatprep.subr.mxu0 %v2152_v30  ;;  %v2151_v29 = vld [vmem:[%s10654_s1 + $0x2b8] sm:$0xff]  ;;  %v1629_v14 = vsel %vm527_vm0, %v382_v23, 0.0  ;;  %v4345_v30 = vrot.slane %v8734_v0, %v6726_v25  ;;  %v2149_v0 = vld [vmem:[%s10654_s1 + $0x2a8] sm:$0xff] }
 0x2f6   :  { %6093 = vmatpush3.msra.mxu0 %v2136_v58  ;;  %v415_v58 = vld [vmem:[%s10653_s0 + $0xc80] sm:$0xff]  ;;  %v1731_v23 = vsel %vm527_vm0, %v416_v11, 0.0 }
 0x2f7   :  { %v4395_v59 = vsel %vm2871_vm4, %v4394_v63, %v4390_v33  ;;  %1624 = vadd.xlane.f32.xlu1 %v1623_v32  ;;  %1534 = vadd.xlane.f32.xlu0 %v1533_v49  ;;  %v4331_v63 = vsel %vm10661_vm7, %v4330_v7, %v4326_v24  ;;  %v2134_v7 = vld [vmem:[%s10654_s1 + $0x230] sm:$0xff] }
 0x2f8   :  { %v1463_v39 = vpop.xlane.xlu1 %1462  ;;  %v1460_v8 = vpop.xlane.xlu0 %1459  ;;  %v4400_v32 = vsel %vm2878_vm5, %v4399_v2, %v4395_v59  ;;  %v1677_v2 = vsel %vm527_vm0, %v398_v56, 0.0  ;;  %6094 = vmatprep.subr.mxu0 %v2151_v29  ;;  %v4336_v33 = vsel %vm2899_vm8, %v4335_v22, %v4331_v63  ;;  %v1728_v56 = vsel %vm527_vm0, %v415_v58, 0.0 }
 0x2f9   :  { %v4404_v37 = vrot.slane %v1460_v8, %v6676_v53  ;;  %v4409_v35 = vrot.slane %v1463_v39, %v6673_v52  ;;  %6095 = vmatpush3.msra.mxu0 %v2135_v45  ;;  %v4341_v24 = vsel %vm10658_vm9, %v4340_v50, %v4336_v33  ;;  %v399_v45 = vld [vmem:[%s10653_s0 + $0xc00] sm:$0xff]  ;;  %v4365_v58 = vrot.slane %v8767_v60, %v6754_v55  ;;  %v2146_v60 = vld [vmem:[%s10654_s1 + $0x290] sm:$0xff] }
 0x2fa   :  { %6096 = vmatprep.subr.mxu0 %v2150_v43  ;;  %v4346_v29 = vsel %vm2913_vm10, %v4345_v30, %v4341_v24  ;;  %v4370_v24 = vrot.slane %v8765_v20, %v6759_v57  ;;  %v418_v20 = vld [vmem:[%s10653_s0 + $0xc98] sm:$0xff] }
 0x2fb   :  { %v4405_v49 = vsel %vm2885_vm6, %v4404_v37, %v4400_v32  ;;  %1627 = vadd.xlane.f32.xlu1 %v1626_v16  ;;  %1675 = vadd.xlane.f32.xlu0 %v1674_v4  ;;  %v2133_v16 = vld [vmem:[%s10654_s1 + $0x228] sm:$0xff]  ;;  %v4350_v4 = vrot.slane %v8732_v10, %v6714_v19 }
 0x2fc   :  { %v1469_v13 = vpop.xlane.xlu1 %1468  ;;  %v1466_v18 = vpop.xlane.xlu0 %1465  ;;  %v4410_v39 = vsel %vm10661_vm7, %v4409_v35, %v4405_v49  ;;  %6097 = vmatpush3.msra.mxu0 %v2134_v7  ;;  %v4355_v35 = vrot.slane %v8746_v17, %v6740_v42  ;;  %v400_v10 = vld [vmem:[%s10653_s0 + $0xc08] sm:$0xff]  ;;  %v2148_v49 = vld [vmem:[%s10654_s1 + $0x2a0] sm:$0xff] }
 0x2fd   :  { %v4414_v59 = vrot.slane %v1466_v18, %v6706_v9  ;;  %v4419_v12 = vrot.slane %v1469_v13, %v6694_v3  ;;  %6098 = vmatprep.subr.mxu0 %v2149_v0  ;;  %v2132_v17 = vld [vmem:[%s10654_s1 + $0x220] sm:$0xff]  ;;  %v2147_v13 = vld [vmem:[%s10654_s1 + $0x298] sm:$0xff]  ;;  %v4360_v18 = vrot.slane %v8744_v15, %v6734_v38  ;;  %v1683_v30 = vsel %vm527_vm0, %v400_v10, 0.0  ;;  %v401_v15 = vld [vmem:[%s10653_s0 + $0xc10] sm:$0xff] }
 0x2fe   :  { %6099 = vmatpush3.msra.mxu0 %v2133_v16  ;;  %v447_v10 = vld [vmem:[%s10653_s0 + $0xd80] sm:$0xff] }
 0x2ff   :  { %v4415_v8 = vsel %vm2899_vm8, %v4414_v59, %v4410_v39  ;;  %1630 = vadd.xlane.f32.xlu1 %v1629_v14  ;;  %1678 = vadd.xlane.f32.xlu0 %v1677_v2  ;;  %v4351_v14 = vsel %vm2920_vm11, %v4350_v4, %v4346_v29  ;;  %v1680_v59 = vsel %vm527_vm0, %v399_v45, 0.0  ;;  %v2131_v39 = vld [vmem:[%s10654_s1 + $0x218] sm:$0xff]  ;;  %v2130_v4 = vld [vmem:[%s10654_s1 + $0x210] sm:$0xff] }
 0x300   :  { %v1475_v22 = vpop.xlane.xlu1 %1474  ;;  %v1472_v37 = vpop.xlane.xlu0 %1471  ;;  %v4420_v50 = vsel %vm10658_vm9, %v4419_v12, %v4415_v8  ;;  %6100 = vmatprep.subr.mxu0 %v2148_v49  ;;  %vm10671_vm9 = vcmask 851712   ;;  %v417_v12 = vld [vmem:[%s10653_s0 + $0xc90] sm:$0xff]  ;;  %v2145_v49 = vld [vmem:[%s10654_s1 + $0x288] sm:$0xff] }
 0x301   :  { %v4424_v32 = vrot.slane %v1472_v37, %v6726_v25  ;;  %v4429_v43 = vrot.slane %v1475_v22, %v6714_v19  ;;  %v4356_v11 = vsel %vm10671_vm9, %v4355_v35, %v4351_v14  ;;  %6101 = vmatpush3.msra.mxu0 %v2132_v17 }
 0x302   :  { %6102 = vmatprep.subr.mxu0 %v2147_v13  ;;  %v4361_v29 = vsel %vm2934_vm13, %v4360_v18, %v4356_v11 }
 0x303   :  { %v4425_v63 = vsel %vm2913_vm10, %v4424_v32, %v4420_v50  ;;  %1732 = vadd.xlane.f32.xlu1 %v1731_v23  ;;  %1729 = vadd.xlane.f32.xlu0 %v1728_v56  ;;  %v1686_v23 = vsel %vm527_vm0, %v401_v15, 0.0  ;;  %v1734_v56 = vsel %vm527_vm0, %v417_v12, 0.0  ;;  %v4366_v45 = vsel %vm2941_vm14, %v4365_v58, %v4361_v29  ;;  %v2129_v50 = vld [vmem:[%s10654_s1 + $0x208] sm:$0xff]  ;;  %v2128_v12 = vld [vmem:[%s10654_s1 + $0x200] sm:$0xff] }
 0x304   :  { %v1481_v2 = vpop.xlane.xlu1 %1480  ;;  %v1478_v33 = vpop.xlane.xlu0 %1477  ;;  %v4430_v8 = vsel %vm2920_vm11, %v4429_v43, %v4425_v63  ;;  %6103 = vmatpush3.msra.mxu0 %v2131_v39  ;;  %v2144_v63 = vld [vmem:[%s10654_s1 + $0x280] sm:$0xff]  ;;  %v448_v15 = vld [vmem:[%s10653_s0 + $0xd88] sm:$0xff]  ;;  %v2175_v39 = vld [vmem:[%s10654_s1 + $0x378] sm:$0xff] }
 0x305   :  { %v4434_v7 = vrot.slane %v1478_v33, %v6740_v42  ;;  %v4439_v0 = vrot.slane %v1481_v2, %v6734_v38  ;;  %6104 = vmatprep.subr.mxu0 %v2146_v60  ;;  %v1824_v2 = vsel %vm527_vm0, %v447_v10, 0.0  ;;  %v1737_v33 = vsel %vm527_vm0, %v418_v20, 0.0  ;;  %v2189_v29 = vld [vmem:[%s10654_s1 + $0x3e8] sm:$0xff] }
 0x306   :  { %6105 = vmatpush3.msra.mxu0 %v2130_v4 }
 0x307   :  { %v4435_v16 = vsel %vm10671_vm9, %v4434_v7, %v4430_v8  ;;  %1684 = vadd.xlane.f32.xlu1 %v1683_v30  ;;  %1681 = vadd.xlane.f32.xlu0 %v1680_v59  ;;  %v4371_v30 = vsel %vm2948_vm15, %v4370_v24, %v4366_v45  ;;  %v402_v7 = vld [vmem:[%s10653_s0 + $0xc18] sm:$0xff]  ;;  %v2190_v8 = vld [vmem:[%s10654_s1 + $0x3f0] sm:$0xff]  ;;  %v1827_v24 = vsel %vm527_vm0, %v448_v15, 0.0  ;;  %vm10672_vm9 = vcmask 654912  }
 0x308   :  { %v1487_v22 = vpop.xlane.xlu1 %1486  ;;  %v1484_v37 = vpop.xlane.xlu0 %1483  ;;  %v4440_v43 = vsel %vm2934_vm13, %v4439_v0, %v4435_v16  ;;  %6106 = vmatprep.subr.mxu0 %v2145_v49  ;;  %v5402_v0 = vsel %vm5399_vm12, %v4371_v30, %v6977_v40  ;;  %v1689_v4 = vsel %vm527_vm0, %v402_v7, 0.0  ;;  %v431_v40 = vld [vmem:[%s10653_s0 + $0xd00] sm:$0xff] }
 0x309   :  { %v4449_v35 = vrot.slane %v1487_v22, %v6759_v57  ;;  %v4444_v32 = vrot.slane %v1484_v37, %v6754_v55  ;;  %6107 = vmatpush3.msra.mxu0 %v2129_v50  ;;  %v1776_v49 = vsel %vm527_vm0, %v431_v40, 0.0 }
 0x30a   :  { %6108 = vmatprep.subr.mxu0 %v2144_v63  ;;  %v449_v63 = vld [vmem:[%s10653_s0 + $0xd90] sm:$0xff] }
 0x30b   :  { %1687 = vadd.xlane.f32.xlu1 %v1686_v23  ;;  %1735 = vadd.xlane.f32.xlu0 %v1734_v56  ;;  %v4445_v17 = vsel %vm2941_vm14, %v4444_v32, %v4440_v43  ;;  %v419_v23 = vld [vmem:[%s10653_s0 + $0xca0] sm:$0xff]  ;;  %v2174_v56 = vld [vmem:[%s10654_s1 + $0x370] sm:$0xff]  ;;  %v2173_v32 = vld [vmem:[%s10654_s1 + $0x368] sm:$0xff] }
 0x30c   :  { %v1493_v13 = vpop.xlane.xlu1 %1492  ;;  %v1490_v18 = vpop.xlane.xlu0 %1489  ;;  %v4450_v14 = vsel %vm2948_vm15, %v4449_v35, %v4445_v17  ;;  %6109 = vmatpush3.msra.mxu0 %v2128_v12  ;;  %v1740_v43 = vsel %vm527_vm0, %v419_v23, 0.0 }
 0x30d   :  { %v4458_v59 = vrot.slane %v1493_v13, %v6639_v28  ;;  %v4454_v11 = vrot.slane %v1490_v18, %v6633_v26  ;;  %v5403_v58 = vsel %vm5399_vm12, %v4450_v14, %v7074_v21  ;;  %v432_v13 = vld [vmem:[%s10653_s0 + $0xd08] sm:$0xff]  ;;  %v2188_v18 = vld [vmem:[%s10654_s1 + $0x3e0] sm:$0xff] }
 0x30e   :  { %5566 = vmatprep.mubr.f32.mxu1 %v5403_v58  ;;  %v2172_v14 = vld [vmem:[%s10654_s1 + $0x360] sm:$0xff]  ;;  %v1830_v58 = vsel %vm527_vm0, %v449_v63, 0.0  ;;  %v1779_v7 = vsel %vm527_vm0, %v432_v13, 0.0 }
 0x30f   :  { %v4459_v21 = vsel %vm2850_vm1, %v4458_v59, %v4454_v11  ;;  %1825 = vadd.xlane.f32.xlu1 %v1824_v2  ;;  %1738 = vadd.xlane.f32.xlu0 %v1737_v33  ;;  %v2187_v33 = vld [vmem:[%s10654_s1 + $0x3d8] sm:$0xff] }
 0x310   :  { %5567 = vmatmul.mubr.f32.vlgmr.msra.gmra.mxu1 %v5402_v0  ;;  %v1499_v60 = vpop.xlane.xlu1 %1498  ;;  %v1496_v16 = vpop.xlane.xlu0 %1495  ;;  %v2171_v0 = vld [vmem:[%s10654_s1 + $0x358] sm:$0xff] }
 0x311   :  { %v4468_v22 = vrot.slane %v1499_v60, %v6636_v27  ;;  %v4463_v37 = vrot.slane %v1496_v16, %v6646_v31  ;;  %6114 = vmatpush3.msra.mxu1 %v2175_v39  ;;  %v420_v39 = vld [vmem:[%s10653_s0 + $0xca8] sm:$0xff]  ;;  %v2170_v16 = vld [vmem:[%s10654_s1 + $0x350] sm:$0xff] }
 0x312   :  { %6115 = vmatprep.subr.mxu1 %v2190_v8  ;;  %v2186_v8 = vld [vmem:[%s10654_s1 + $0x3d0] sm:$0xff] }
 0x313   :  { %v4464_v35 = vsel %vm2857_vm2, %v4463_v37, %v4459_v21  ;;  %1690 = vadd.xlane.f32.xlu1 %v1689_v4  ;;  %1828 = vadd.xlane.f32.xlu0 %v1827_v24  ;;  %v403_v21 = vld [vmem:[%s10653_s0 + $0xc20] sm:$0xff]  ;;  %v1743_v37 = vsel %vm527_vm0, %v420_v39, 0.0 }
 0x314   :  { %v1505_v10 = vpop.xlane.xlu1 %1504  ;;  %v4469_v20 = vsel %vm2864_vm3, %v4468_v22, %v4464_v35  ;;  %v1502_v45 = vpop.xlane.xlu0 %1501  ;;  %6116 = vmatpush3.msra.mxu1 %v2174_v56  ;;  %v1692_v40 = vsel %vm527_vm0, %v403_v21, 0.0  ;;  %v433_v35 = vld [vmem:[%s10653_s0 + $0xd10] sm:$0xff] }
 0x315   :  { %v4478_v50 = vrot.slane %v1505_v10, %v6651_v36  ;;  %v4473_v17 = vrot.slane %v1502_v45, %v6665_v44  ;;  %6117 = vmatprep.subr.mxu1 %v2189_v29  ;;  %v450_v29 = vld [vmem:[%s10653_s0 + $0xd98] sm:$0xff]  ;;  %v2169_v10 = vld [vmem:[%s10654_s1 + $0x348] sm:$0xff]  ;;  %v2184_v45 = vld [vmem:[%s10654_s1 + $0x3c0] sm:$0xff]  ;;  %v1782_v63 = vsel %vm527_vm0, %v433_v35, 0.0 }
 0x316   :  { %6118 = vmatpush3.msra.mxu1 %v2173_v32  ;;  %v2185_v32 = vld [vmem:[%s10654_s1 + $0x3c8] sm:$0xff] }
 0x317   :  { %v4474_v2 = vsel %vm2871_vm4, %v4473_v17, %v4469_v20  ;;  %1777 = vadd.xlane.f32.xlu1 %v1776_v49  ;;  %1741 = vadd.xlane.f32.xlu0 %v1740_v43  ;;  %v1833_v17 = vsel %vm527_vm0, %v450_v29, 0.0 }
 0x318   :  { %v1511_v30 = vpop.xlane.xlu1 %1510  ;;  %v4479_v59 = vsel %vm2878_vm5, %v4478_v50, %v4474_v2  ;;  %v1508_v11 = vpop.xlane.xlu0 %1507  ;;  %6119 = vmatprep.subr.mxu1 %v2188_v18  ;;  %v404_v2 = vld [vmem:[%s10653_s0 + $0xc28] sm:$0xff] }
 0x319   :  { %v4488_v15 = vrot.slane %v1511_v30, %v6673_v52  ;;  %v4483_v12 = vrot.slane %v1508_v11, %v6676_v53  ;;  %6120 = vmatpush3.msra.mxu1 %v2172_v14  ;;  %v421_v14 = vld [vmem:[%s10653_s0 + $0xcb0] sm:$0xff]  ;;  %v2183_v30 = vld [vmem:[%s10654_s1 + $0x3b8] sm:$0xff]  ;;  %v1695_v39 = vsel %vm527_vm0, %v404_v2, 0.0 }
 0x31a   :  { %6121 = vmatprep.subr.mxu1 %v2187_v33  ;;  %v2168_v33 = vld [vmem:[%s10654_s1 + $0x340] sm:$0xff]  ;;  %v2167_v11 = vld [vmem:[%s10654_s1 + $0x338] sm:$0xff] }
 0x31b   :  { %v4484_v60 = vsel %vm2885_vm6, %v4483_v12, %v4479_v59  ;;  %1831 = vadd.xlane.f32.xlu1 %v1830_v58  ;;  %1780 = vadd.xlane.f32.xlu0 %v1779_v7  ;;  %v1746_v12 = vsel %vm527_vm0, %v421_v14, 0.0  ;;  %v435_v14 = vld [vmem:[%s10653_s0 + $0xd20] sm:$0xff]  ;;  %v2179_v2 = vld [vmem:[%s10654_s1 + $0x398] sm:$0xff] }
 0x31c   :  { %v1517_v4 = vpop.xlane.xlu1 %1516  ;;  %v4489_v24 = vsel %vm10661_vm7, %v4488_v15, %v4484_v60  ;;  %v1514_v22 = vpop.xlane.xlu0 %1513  ;;  %6122 = vmatpush3.msra.mxu1 %v2171_v0  ;;  %v434_v60 = vld [vmem:[%s10653_s0 + $0xd18] sm:$0xff] }
 0x31d   :  { %v4498_v23 = vrot.slane %v1517_v4, %v6694_v3  ;;  %v4493_v56 = vrot.slane %v1514_v22, %v6706_v9  ;;  %6123 = vmatprep.subr.mxu1 %v2186_v8  ;;  %v451_v8 = vld [vmem:[%s10653_s0 + $0xda0] sm:$0xff]  ;;  %v2166_v4 = vld [vmem:[%s10654_s1 + $0x330] sm:$0xff]  ;;  %v2181_v22 = vld [vmem:[%s10654_s1 + $0x3a8] sm:$0xff]  ;;  %v1785_v29 = vsel %vm527_vm0, %v434_v60, 0.0 }
 0x31e   :  { %6124 = vmatpush3.msra.mxu1 %v2170_v16  ;;  %v2182_v16 = vld [vmem:[%s10654_s1 + $0x3b0] sm:$0xff] }
 0x31f   :  { %v4494_v20 = vsel %vm2899_vm8, %v4493_v56, %v4489_v24  ;;  %1744 = vadd.xlane.f32.xlu1 %v1743_v37  ;;  %1693 = vadd.xlane.f32.xlu0 %v1692_v40  ;;  %v1836_v56 = vsel %vm527_vm0, %v451_v8, 0.0 }
 0x320   :  { %v1523_v49 = vpop.xlane.xlu1 %1522  ;;  %v4499_v43 = vsel %vm10672_vm9, %v4498_v23, %v4494_v20  ;;  %v1520_v50 = vpop.xlane.xlu0 %1519  ;;  %6125 = vmatprep.subr.mxu1 %v2185_v32  ;;  %vm10673_vm9 = vcmask 851712   ;;  %v422_v32 = vld [vmem:[%s10653_s0 + $0xcb8] sm:$0xff]  ;;  %v2165_v20 = vld [vmem:[%s10654_s1 + $0x328] sm:$0xff] }
 0x321   :  { %v4508_v13 = vrot.slane %v1523_v49, %v6714_v19  ;;  %v4503_v18 = vrot.slane %v1520_v50, %v6726_v25  ;;  %6126 = vmatpush3.msra.mxu1 %v2169_v10  ;;  %v405_v10 = vld [vmem:[%s10653_s0 + $0xc30] sm:$0xff] }
 0x322   :  { %6127 = vmatprep.subr.mxu1 %v2184_v45  ;;  %v2180_v45 = vld [vmem:[%s10654_s1 + $0x3a0] sm:$0xff] }
 0x323   :  { %v4504_v59 = vsel %vm2913_vm10, %v4503_v18, %v4499_v43  ;;  %1834 = vadd.xlane.f32.xlu1 %v1833_v17  ;;  %1783 = vadd.xlane.f32.xlu0 %v1782_v63  ;;  %v2164_v43 = vld [vmem:[%s10654_s1 + $0x320] sm:$0xff]  ;;  %v1749_v63 = vsel %vm527_vm0, %v422_v32, 0.0  ;;  %v452_v18 = vld [vmem:[%s10653_s0 + $0xda8] sm:$0xff] }
 0x324   :  { %v1529_v58 = vpop.xlane.xlu1 %1528  ;;  %v4509_v7 = vsel %vm2920_vm11, %v4508_v13, %v4504_v59  ;;  %v1526_v15 = vpop.xlane.xlu0 %1525  ;;  %6128 = vmatpush3.msra.mxu1 %v2168_v33  ;;  %v1698_v13 = vsel %vm527_vm0, %v405_v10, 0.0  ;;  %v2163_v33 = vld [vmem:[%s10654_s1 + $0x318] sm:$0xff] }
 0x325   :  { %v4518_v21 = vrot.slane %v1529_v58, %v6734_v38  ;;  %v4513_v0 = vrot.slane %v1526_v15, %v6740_v42  ;;  %6129 = vmatprep.subr.mxu1 %v2183_v30  ;;  %v2178_v30 = vld [vmem:[%s10654_s1 + $0x390] sm:$0xff]  ;;  %v1839_v58 = vsel %vm527_vm0, %v452_v18, 0.0  ;;  %v423_v15 = vld [vmem:[%s10653_s0 + $0xcc0] sm:$0xff] }
 0x326   :  { %6130 = vmatpush3.msra.mxu1 %v2167_v11  ;;  %v407_v18 = vld [vmem:[%s10653_s0 + $0xc40] sm:$0xff] }
 0x327   :  { %v4514_v24 = vsel %vm10673_vm9, %v4513_v0, %v4509_v7  ;;  %1747 = vadd.xlane.f32.xlu1 %v1746_v12  ;;  %1696 = vadd.xlane.f32.xlu0 %v1695_v39  ;;  %v1788_v7 = vsel %vm527_vm0, %v435_v14, 0.0  ;;  %v406_v12 = vld [vmem:[%s10653_s0 + $0xc38] sm:$0xff]  ;;  %v2162_v39 = vld [vmem:[%s10654_s1 + $0x310] sm:$0xff]  ;;  %v2161_v0 = vld [vmem:[%s10654_s1 + $0x308] sm:$0xff]  ;;  %vm10674_vm9 = vcmask 654912  }
 0x328   :  { %v9155_v37 = vpop.xlane.xlu1 %1537  ;;  %v4519_v40 = vsel %vm2934_vm13, %v4518_v21, %v4514_v24  ;;  %v1532_v23 = vpop.xlane.xlu0 %1531  ;;  %6131 = vmatprep.subr.mxu1 %v2182_v16  ;;  %v2177_v21 = vld [vmem:[%s10654_s1 + $0x388] sm:$0xff]  ;;  %v1752_v16 = vsel %vm527_vm0, %v423_v15, 0.0 }
 0x329   :  { %v4523_v35 = vrot.slane %v1532_v23, %v6754_v55  ;;  %6132 = vmatpush3.msra.mxu1 %v2166_v4  ;;  %v1701_v4 = vsel %vm527_vm0, %v406_v12, 0.0  ;;  %v436_v23 = vld [vmem:[%s10653_s0 + $0xd28] sm:$0xff]  ;;  %v4533_v61 = vrot.slane %v9155_v37, %v6633_v26 }
 0x32a   :  { %6133 = vmatprep.subr.mxu1 %v2181_v22 }
 0x32b   :  { %v9174_v49 = vsel %vm2941_vm14, %v4523_v35, %v4519_v40  ;;  %1837 = vadd.xlane.f32.xlu1 %v1836_v56  ;;  %1786 = vadd.xlane.f32.xlu0 %v1785_v29  ;;  %v453_v40 = vld [vmem:[%s10653_s0 + $0xdb0] sm:$0xff]  ;;  %v2176_v56 = vld [vmem:[%s10654_s1 + $0x380] sm:$0xff] }
 0x32c   :  { %v9179_v50 = vpop.xlane.xlu1 %1543  ;;  %v9181_v17 = vpop.xlane.xlu0 %1540  ;;  %6134 = vmatpush3.msra.mxu1 %v2165_v20  ;;  %v2160_v29 = vld [vmem:[%s10654_s1 + $0x300] sm:$0xff]  ;;  %v1842_v20 = vsel %vm527_vm0, %v453_v40, 0.0 }
 0x32d   :  { %6135 = vmatprep.subr.mxu1 %v2180_v45  ;;  %v1791_v45 = vsel %vm527_vm0, %v436_v23, 0.0  ;;  %v455_v40 = vld [vmem:[%s10653_s0 + $0xdc0] sm:$0xff]  ;;  %v438_v23 = vld [vmem:[%s10653_s0 + $0xd38] sm:$0xff] }
 0x32e   :  { %6136 = vmatpush3.msra.mxu1 %v2164_v43 }
 0x32f   :  { %1750 = vadd.xlane.f32.xlu1 %v1749_v63  ;;  %1699 = vadd.xlane.f32.xlu0 %v1698_v13  ;;  %v424_v13 = vld [vmem:[%s10653_s0 + $0xcc8] sm:$0xff] }
 0x330   :  { %v1634_v59 = vpop.xlane.xlu1 %1633  ;;  %v9200_v11 = vpop.xlane.xlu0 %1546  ;;  %6137 = vmatprep.subr.mxu1 %v2179_v2 }
 0x331   :  { %6138 = vmatpush3.msra.mxu1 %v2163_v33  ;;  %v4691_v24 = vrot.slane %v1634_v59, %v6633_v26  ;;  %v1704_v59 = vsel %vm527_vm0, %v407_v18, 0.0 }
 0x332   :  { %6139 = vmatprep.subr.mxu1 %v2178_v30  ;;  %v1755_v30 = vsel %vm527_vm0, %v424_v13, 0.0 }
 0x333   :  { %1840 = vadd.xlane.f32.xlu1 %v1839_v58  ;;  %1789 = vadd.xlane.f32.xlu0 %v1788_v7  ;;  %v454_v58 = vld [vmem:[%s10653_s0 + $0xdb8] sm:$0xff]  ;;  %v437_v7 = vld [vmem:[%s10653_s0 + $0xd30] sm:$0xff] }
 0x334   :  { %v9219_v8 = vpop.xlane.xlu1 %1549  ;;  %v1637_v60 = vpop.xlane.xlu0 %1636  ;;  %6140 = vmatpush3.msra.mxu1 %v2162_v39  ;;  %v1845_v39 = vsel %vm527_vm0, %v454_v58, 0.0 }
 0x335   :  { %v4695_v22 = vrot.slane %v1637_v60, %v6639_v28  ;;  %6141 = vmatprep.subr.mxu1 %v2177_v21  ;;  %v1794_v21 = vsel %vm527_vm0, %v437_v7, 0.0  ;;  %v408_v60 = vld [vmem:[%s10653_s0 + $0xc48] sm:$0xff]  ;;  %v4552_v34 = vrot.slane %v9219_v8, %v6665_v44  ;;  %v2255_v8 = vld [vmem:[%s10654_s1 + $0x5f8] sm:$0xff] }
 0x336   :  { %6142 = vmatpush3.msra.mxu1 %v2161_v0  ;;  %v425_v0 = vld [vmem:[%s10653_s0 + $0xcd0] sm:$0xff] }
 0x337   :  { %v9238_v35 = vsel %vm2850_vm1, %v4695_v22, %v4691_v24  ;;  %1753 = vadd.xlane.f32.xlu1 %v1752_v16  ;;  %1702 = vadd.xlane.f32.xlu0 %v1701_v4  ;;  %v1758_v24 = vsel %vm527_vm0, %v425_v0, 0.0  ;;  %v1707_v22 = vsel %vm527_vm0, %v408_v60, 0.0  ;;  %v427_v0 = vld [vmem:[%s10653_s0 + $0xce0] sm:$0xff]  ;;  %v410_v60 = vld [vmem:[%s10653_s0 + $0xc58] sm:$0xff] }
 0x338   :  { %v1589_v32 = vpop.xlane.xlu1 %1588  ;;  %v1586_v10 = vpop.xlane.xlu0 %1585  ;;  %6143 = vmatprep.subr.mxu1 %v2176_v56 }
 0x339   :  { %v4616_v43 = vrot.slane %v1589_v32, %v6639_v28  ;;  %v4612_v63 = vrot.slane %v1586_v10, %v6633_v26  ;;  %6144 = vmatpush3.msra.mxu1 %v2160_v29  ;;  %v1848_v32 = vsel %vm527_vm0, %v455_v40, 0.0  ;;  %v1797_v10 = vsel %vm527_vm0, %v438_v23, 0.0 }
 0x33a   :  { %v1764_v40 = vsel %vm527_vm0, %v427_v0, 0.0  ;;  %v1713_v23 = vsel %vm527_vm0, %v410_v60, 0.0  ;;  %6183 = vmatprep.subr.mxu1 %v2255_v8 }
 0x33b   :  { %v9251_v14 = vsel %vm2850_vm1, %v4616_v43, %v4612_v63  ;;  %1843 = vadd.xlane.f32.xlu1 %v1842_v20  ;;  %1792 = vadd.xlane.f32.xlu0 %v1791_v45  ;;  %v426_v20 = vld [vmem:[%s10653_s0 + $0xcd8] sm:$0xff]  ;;  %v409_v45 = vld [vmem:[%s10653_s0 + $0xc50] sm:$0xff] }
 0x33c   :  { %v9253_v2 = vpop.xlane.xlu1 %1552  ;;  %v9255_v33 = vpop.xlane.xlu0 %1639  ;;  %v1761_v13 = vsel %vm527_vm0, %v426_v20, 0.0  ;;  %v1710_v18 = vsel %vm527_vm0, %v409_v45, 0.0 }
 0x33f   :  { %1756 = vadd.xlane.f32.xlu1 %v1755_v30  ;;  %1705 = vadd.xlane.f32.xlu0 %v1704_v59  ;;  %v456_v30 = vld [vmem:[%s10653_s0 + $0xdc8] sm:$0xff]  ;;  %v439_v59 = vld [vmem:[%s10653_s0 + $0xd40] sm:$0xff] }
 0x340   :  { %v9265_v15 = vpop.xlane.xlu1 %1642  ;;  %v9267_v12 = vpop.xlane.xlu0 %1591 }
 0x343   :  { %1846 = vadd.xlane.f32.xlu1 %v1845_v39  ;;  %1795 = vadd.xlane.f32.xlu0 %v1794_v21  ;;  %v1851_v39 = vsel %vm527_vm0, %v456_v30, 0.0  ;;  %v1800_v21 = vsel %vm527_vm0, %v439_v59, 0.0  ;;  %v428_v30 = vld [vmem:[%s10653_s0 + $0xce8] sm:$0xff]  ;;  %v411_v59 = vld [vmem:[%s10653_s0 + $0xc60] sm:$0xff] }
 0x344   :  { %v9277_v16 = vpop.xlane.xlu1 %1594  ;;  %v9279_v4 = vpop.xlane.xlu0 %1555  ;;  %v1767_v0 = vsel %vm527_vm0, %v428_v30, 0.0  ;;  %v1716_v60 = vsel %vm527_vm0, %v411_v59, 0.0  ;;  %v429_v30 = vld [vmem:[%s10653_s0 + $0xcf0] sm:$0xff]  ;;  %v412_v59 = vld [vmem:[%s10653_s0 + $0xc68] sm:$0xff] }
 0x345   :  { %v1770_v41 = vsel %vm527_vm0, %v429_v30, 0.0 }
 0x347   :  { %1759 = vadd.xlane.f32.xlu1 %v1758_v24  ;;  %1708 = vadd.xlane.f32.xlu0 %v1707_v22 }
 0x348   :  { %v9289_v56 = vpop.xlane.xlu1 %1558  ;;  %v9291_v29 = vpop.xlane.xlu0 %1645 }
 0x34b   :  { %1849 = vadd.xlane.f32.xlu1 %v1848_v32  ;;  %1798 = vadd.xlane.f32.xlu0 %v1797_v10  ;;  %v457_v32 = vld [vmem:[%s10653_s0 + $0xdd0] sm:$0xff]  ;;  %v440_v10 = vld [vmem:[%s10653_s0 + $0xd48] sm:$0xff] }
 0x34c   :  { %v9301_v43 = vpop.xlane.xlu1 %1648  ;;  %v9303_v63 = vpop.xlane.xlu0 %1597 }
 0x34f   :  { %1762 = vadd.xlane.f32.xlu1 %v1761_v13  ;;  %1711 = vadd.xlane.f32.xlu0 %v1710_v18  ;;  %v1854_v13 = vsel %vm527_vm0, %v457_v32, 0.0  ;;  %v1803_v18 = vsel %vm527_vm0, %v440_v10, 0.0 }
 0x350   :  { %v9313_v58 = vpop.xlane.xlu1 %1600  ;;  %v9315_v7 = vpop.xlane.xlu0 %1561 }
 0x353   :  { %1852 = vadd.xlane.f32.xlu1 %v1851_v39  ;;  %1801 = vadd.xlane.f32.xlu0 %v1800_v21 }
 0x354   :  { %v9325_v24 = vpop.xlane.xlu1 %1564  ;;  %v9327_v22 = vpop.xlane.xlu0 %1651 }
 0x357   :  { %1765 = vadd.xlane.f32.xlu1 %v1764_v40  ;;  %1714 = vadd.xlane.f32.xlu0 %v1713_v23  ;;  %v458_v40 = vld [vmem:[%s10653_s0 + $0xdd8] sm:$0xff]  ;;  %v441_v23 = vld [vmem:[%s10653_s0 + $0xd50] sm:$0xff] }
 0x358   :  { %v9337_v20 = vpop.xlane.xlu1 %1654  ;;  %v9339_v45 = vpop.xlane.xlu0 %1603 }
 0x35b   :  { %1855 = vadd.xlane.f32.xlu1 %v1854_v13  ;;  %1804 = vadd.xlane.f32.xlu0 %v1803_v18  ;;  %v1857_v13 = vsel %vm527_vm0, %v458_v40, 0.0  ;;  %v1806_v18 = vsel %vm527_vm0, %v441_v23, 0.0  ;;  %v1719_v40 = vsel %vm527_vm0, %v412_v59, 0.0  ;;  %v459_v23 = vld [vmem:[%s10653_s0 + $0xde0] sm:$0xff] }
 0x35c   :  { %v9349_v39 = vpop.xlane.xlu1 %1606  ;;  %v9351_v21 = vpop.xlane.xlu0 %1567  ;;  %v1860_v5 = vsel %vm527_vm0, %v459_v23, 0.0  ;;  %v4547_v23 = vrot.slane %v9200_v11, %v6636_v27  ;;  %v4562_v11 = vrot.slane %v9279_v4, %v6676_v53 }
 0x35f   :  { %1768 = vadd.xlane.f32.xlu1 %v1767_v0  ;;  %1717 = vadd.xlane.f32.xlu0 %v1716_v60 }
 0x360   :  { %v9361_v32 = vpop.xlane.xlu1 %1570  ;;  %v9363_v10 = vpop.xlane.xlu0 %1657 }
 0x363   :  { %1858 = vadd.xlane.f32.xlu1 %v1857_v13  ;;  %1807 = vadd.xlane.f32.xlu0 %v1806_v18  ;;  %v2223_v13 = vld [vmem:[%s10654_s1 + $0x4f8] sm:$0xff]  ;;  %v4537_v18 = vrot.slane %v9181_v17, %v6639_v28  ;;  %v4542_v17 = vrot.slane %v9179_v50, %v6646_v31  ;;  %v4557_v50 = vrot.slane %v9253_v2, %v6651_v36 }
 0x364   :  { %v9373_v0 = vpop.xlane.xlu1 %1660  ;;  %v9375_v60 = vpop.xlane.xlu0 %1609  ;;  %6148 = vmatprep.subr.mxu0 %v2223_v13  ;;  %v430_v13 = vld [vmem:[%s10653_s0 + $0xcf8] sm:$0xff]  ;;  %v4567_v2 = vrot.slane %v9289_v56, %v6673_v52 }
 0x365   :  { %v1773_v46 = vsel %vm527_vm0, %v430_v13, 0.0  ;;  %v414_v56 = vld [vmem:[%s10653_s0 + $0xc78] sm:$0xff] }
 0x367   :  { %1771 = vadd.xlane.f32.xlu1 %v1770_v41  ;;  %1720 = vadd.xlane.f32.xlu0 %v1719_v40  ;;  %v413_v41 = vld [vmem:[%s10653_s0 + $0xc70] sm:$0xff]  ;;  %v4538_v40 = vsel %vm2850_vm1, %v4537_v18, %v4533_v61  ;;  %v460_v61 = vld [vmem:[%s10653_s0 + $0xde8] sm:$0xff] }
 0x368   :  { %v9390_v30 = vpop.xlane.xlu1 %1612  ;;  %v9392_v59 = vpop.xlane.xlu0 %1573  ;;  %v1722_v47 = vsel %vm527_vm0, %v413_v41, 0.0  ;;  %v4572_v41 = vrot.slane %v9315_v7, %v6706_v9  ;;  %v1863_v4 = vsel %vm527_vm0, %v460_v61, 0.0 }
 0x36b   :  { %1861 = vadd.xlane.f32.xlu1 %v1860_v5  ;;  %1810 = vadd.xlane.f32.xlu0 %v1809_v1  ;;  %v443_v5 = vld [vmem:[%s10653_s0 + $0xd60] sm:$0xff]  ;;  %v4543_v1 = vsel %vm2857_vm2, %v4542_v17, %v4538_v40 }
 0x36c   :  { %v1577_v37 = vpop.xlane.xlu1 %1576  ;;  %v9411_v51 = vpop.xlane.xlu0 %1663  ;;  %v4548_v18 = vsel %vm2864_vm3, %v4547_v23, %v4543_v1  ;;  %v1812_v26 = vsel %vm527_vm0, %v443_v5, 0.0  ;;  %v4592_v5 = vrot.slane %v9392_v59, %v6740_v42  ;;  %v446_v59 = vld [vmem:[%s10653_s0 + $0xd78] sm:$0xff] }
 0x36d   :  { %v4553_v13 = vsel %vm2871_vm4, %v4552_v34, %v4548_v18  ;;  %v4582_v34 = vrot.slane %v9351_v21, %v6726_v25  ;;  %v1725_v18 = vsel %vm527_vm0, %v414_v56, 0.0  ;;  %v445_v21 = vld [vmem:[%s10653_s0 + $0xd70] sm:$0xff] }
 0x36e   :  { %v4558_v23 = vsel %vm2878_vm5, %v4557_v50, %v4553_v13  ;;  %v4587_v50 = vrot.slane %v9361_v32, %v6714_v19  ;;  %v4700_v13 = vrot.slane %v9255_v33, %v6646_v31 }
 0x36f   :  { %1774 = vadd.xlane.f32.xlu1 %v1773_v46  ;;  %1723 = vadd.xlane.f32.xlu0 %v1722_v47  ;;  %v4577_v46 = vrot.slane %v9325_v24, %v6694_v3  ;;  %v444_v47 = vld [vmem:[%s10653_s0 + $0xd68] sm:$0xff]  ;;  %v4563_v7 = vsel %vm2885_vm6, %v4562_v11, %v4558_v23 }
 0x370   :  { %v9435_v17 = vpop.xlane.xlu1 %1666  ;;  %v9437_v40 = vpop.xlane.xlu0 %1615  ;;  %v4568_v61 = vsel %vm10661_vm7, %v4567_v2, %v4563_v7  ;;  %v1815_v11 = vsel %vm527_vm0, %v444_v47, 0.0  ;;  %v461_v2 = vld [vmem:[%s10653_s0 + $0xdf0] sm:$0xff] }
 0x371   :  { %v4573_v24 = vsel %vm2899_vm8, %v4572_v41, %v4568_v61  ;;  %v1866_v33 = vsel %vm527_vm0, %v461_v2, 0.0  ;;  %v462_v61 = vld [vmem:[%s10653_s0 + $0xdf8] sm:$0xff] }
 0x372   :  { %v4578_v32 = vsel %vm10674_vm9, %v4577_v46, %v4573_v24  ;;  %v4705_v46 = vrot.slane %v9265_v15, %v6636_v27  ;;  %vm10675_vm9 = vcmask 851712   ;;  %v4710_v24 = vrot.slane %v9291_v29, %v6665_v44 }
 0x373   :  { %1864 = vadd.xlane.f32.xlu1 %v1863_v4  ;;  %1813 = vadd.xlane.f32.xlu0 %v1812_v26  ;;  %v4597_v26 = vrot.slane %v1577_v37, %v6734_v38  ;;  %v4583_v41 = vsel %vm2913_vm10, %v4582_v34, %v4578_v32  ;;  %v1818_v37 = vsel %vm527_vm0, %v445_v21, 0.0  ;;  %v1821_v34 = vsel %vm527_vm0, %v446_v59, 0.0  ;;  %v480_v59 = vld [vmem:[%s10653_s0 + $0xe88] sm:$0xff] }
 0x374   :  { %v9459_v1 = vpop.xlane.xlu1 %1618  ;;  %v1580_v8 = vpop.xlane.xlu0 %1579  ;;  %v4588_v23 = vsel %vm2920_vm11, %v4587_v50, %v4583_v41  ;;  %v4621_v50 = vrot.slane %v9267_v12, %v6646_v31  ;;  %v4631_v12 = vrot.slane %v9303_v63, %v6665_v44  ;;  %v4720_v29 = vrot.slane %v9327_v22, %v6676_v53 }
 0x375   :  { %v4602_v4 = vrot.slane %v1580_v8, %v6754_v55  ;;  %v4593_v47 = vsel %vm10675_vm9, %v4592_v5, %v4588_v23  ;;  %v4701_v8 = vsel %vm2857_vm2, %v4700_v13, %v9238_v35  ;;  %v1869_v35 = vsel %vm527_vm0, %v462_v61, 0.0  ;;  %v479_v13 = vld [vmem:[%s10653_s0 + $0xe80] sm:$0xff] }
 0x376   :  { %v4598_v15 = vsel %vm2934_vm13, %v4597_v26, %v4593_v47  ;;  %v4706_v26 = vsel %vm2864_vm3, %v4705_v46, %v4701_v8  ;;  %v4641_v41 = vrot.slane %v9339_v45, %v6676_v53  ;;  %v1923_v45 = vsel %vm527_vm0, %v480_v59, 0.0 }
 0x377   :  { %1816 = vadd.xlane.f32.xlu1 %v1815_v11  ;;  %1726 = vadd.xlane.f32.xlu0 %v1725_v18  ;;  %v4626_v11 = vrot.slane %v9277_v16, %v6636_v27  ;;  %v4715_v18 = vrot.slane %v9301_v43, %v6651_v36  ;;  %v4603_v21 = vsel %vm2941_vm14, %v4602_v4, %v4598_v15  ;;  %vm10676_vm9 = vcmask 654912  }
 0x378   :  { %v1583_v56 = vpop.xlane.xlu1 %1582  ;;  %v9483_v7 = vpop.xlane.xlu0 %1669  ;;  %v4636_v16 = vrot.slane %v9313_v58, %v6651_v36  ;;  %v4725_v43 = vrot.slane %v9337_v20, %v6673_v52  ;;  %v4622_v58 = vsel %vm2857_vm2, %v4621_v50, %v9251_v14  ;;  %v4711_v20 = vsel %vm2871_vm4, %v4710_v24, %v4706_v26 }
 0x379   :  { %v4607_v5 = vrot.slane %v1583_v56, %v6759_v57  ;;  %v4627_v4 = vsel %vm2864_vm3, %v4626_v11, %v4622_v58  ;;  %v4716_v23 = vsel %vm2878_vm5, %v4715_v18, %v4711_v20  ;;  %v4730_v14 = vrot.slane %v9363_v10, %v6706_v9 }
 0x37a   :  { %v4632_v46 = vsel %vm2871_vm4, %v4631_v12, %v4627_v4  ;;  %v4721_v47 = vsel %vm2885_vm6, %v4720_v29, %v4716_v23  ;;  %v1920_v56 = vsel %vm527_vm0, %v479_v13, 0.0  ;;  %v4656_v8 = vrot.slane %v9390_v30, %v6694_v3  ;;  %v2221_v23 = vld [vmem:[%s10654_s1 + $0x4e8] sm:$0xff] }
 0x37b   :  { %1819 = vadd.xlane.f32.xlu1 %v1818_v37  ;;  %1867 = vadd.xlane.f32.xlu0 %v1866_v33  ;;  %v4608_v32 = vsel %vm2948_vm15, %v4607_v5, %v4603_v21  ;;  %v4646_v37 = vrot.slane %v9349_v39, %v6673_v52  ;;  %v4637_v33 = vsel %vm2878_vm5, %v4636_v16, %v4632_v46 }
 0x37c   :  { %v9514_v2 = vpop.xlane.xlu1 %1672  ;;  %v9516_v63 = vpop.xlane.xlu0 %1621  ;;  %v5405_v22 = vsel %vm5399_vm12, %v4608_v32, %v7268_v62  ;;  %v464_v62 = vld [vmem:[%s10653_s0 + $0xe08] sm:$0xff]  ;;  %v4726_v61 = vsel %vm10661_vm7, %v4725_v43, %v4721_v47  ;;  %v4651_v39 = vrot.slane %v9375_v60, %v6706_v9  ;;  %v4642_v15 = vsel %vm2885_vm6, %v4641_v41, %v4637_v33  ;;  %v2206_v41 = vld [vmem:[%s10654_s1 + $0x470] sm:$0xff] }
 0x37d   :  { %5636 = vmatprep.mubr.f32.mxu0 %v5405_v22  ;;  %v1875_v10 = vsel %vm527_vm0, %v464_v62, 0.0  ;;  %v4735_v5 = vrot.slane %v9373_v0, %v6694_v3  ;;  %v4647_v60 = vsel %vm10661_vm7, %v4646_v37, %v4642_v15  ;;  %v4731_v18 = vsel %vm2899_vm8, %v4730_v14, %v4726_v61  ;;  %vm10677_vm7 = vmmov %vm10676_vm9 }
 0x37e   :  { %v4740_v21 = vrot.slane %v9411_v51, %v6726_v25  ;;  %v4661_v12 = vrot.slane %v9437_v40, %v6726_v25  ;;  %v4745_v29 = vrot.slane %v9435_v17, %v6714_v19  ;;  %v4666_v0 = vrot.slane %v9459_v1, %v6714_v19  ;;  %v2207_v51 = vld [vmem:[%s10654_s1 + $0x478] sm:$0xff] }
 0x37f   :  { %1822 = vadd.xlane.f32.xlu1 %v1821_v34  ;;  %1870 = vadd.xlane.f32.xlu0 %v1869_v35  ;;  %v463_v34 = vld [vmem:[%s10653_s0 + $0xe00] sm:$0xff]  ;;  %v4652_v35 = vsel %vm2899_vm8, %v4651_v39, %v4647_v60  ;;  %v4750_v40 = vrot.slane %v9483_v7, %v6740_v42  ;;  %v4671_v17 = vrot.slane %v9516_v63, %v6740_v42  ;;  %v465_v7 = vld [vmem:[%s10653_s0 + $0xe10] sm:$0xff] }
 0x380   :  { %v1625_v50 = vpop.xlane.xlu1 %1624  ;;  %v1535_v24 = vpop.xlane.xlu0 %1534  ;;  %v1872_v32 = vsel %vm527_vm0, %v463_v34, 0.0  ;;  %v4657_v43 = vsel %vm10677_vm7, %v4656_v8, %v4652_v35  ;;  %v4755_v22 = vrot.slane %v9514_v2, %v6734_v38  ;;  %v481_v63 = vld [vmem:[%s10653_s0 + $0xe90] sm:$0xff]  ;;  %vm10678_vm7 = vcmask 851712   ;;  %v2205_v34 = vld [vmem:[%s10654_s1 + $0x468] sm:$0xff]  ;;  %v2220_v8 = vld [vmem:[%s10654_s1 + $0x4e0] sm:$0xff] }
 0x381   :  { %v4528_v11 = vrot.slane %v1535_v24, %v6759_v57  ;;  %v4676_v59 = vrot.slane %v1625_v50, %v6734_v38  ;;  %v4662_v58 = vsel %vm2913_vm10, %v4661_v12, %v4657_v43  ;;  %v511_v24 = vld [vmem:[%s10653_s0 + $0xf80] sm:$0xff]  ;;  %v2218_v43 = vld [vmem:[%s10654_s1 + $0x4d0] sm:$0xff] }
 0x382   :  { %v4667_v4 = vsel %vm2920_vm11, %v4666_v0, %v4662_v58 }
 0x383   :  { %1924 = vadd.xlane.f32.xlu1 %v1923_v45  ;;  %1921 = vadd.xlane.f32.xlu0 %v1920_v56  ;;  %v4529_v30 = vsel %vm2948_vm15, %v4528_v11, %v9174_v49  ;;  %v4736_v49 = vsel %vm10676_vm9, %v4735_v5, %v4731_v18  ;;  %vm10679_vm9 = vmmov %vm10678_vm7  ;;  %v1878_v45 = vsel %vm527_vm0, %v465_v7, 0.0  ;;  %v1926_v56 = vsel %vm527_vm0, %v481_v63, 0.0  ;;  %v2204_v18 = vld [vmem:[%s10654_s1 + $0x460] sm:$0xff] }
 0x384   :  { %v1628_v1 = vpop.xlane.xlu1 %1627  ;;  %v1676_v26 = vpop.xlane.xlu0 %1675  ;;  %v5404_v16 = vsel %vm5399_vm12, %v4529_v30, %v7171_v6  ;;  %v2222_v6 = vld [vmem:[%s10654_s1 + $0x4f0] sm:$0xff]  ;;  %v4741_v13 = vsel %vm2913_vm10, %v4740_v21, %v4736_v49  ;;  %v4672_v14 = vsel %vm10679_vm9, %v4671_v17, %v4667_v4  ;;  %v2016_v30 = vsel %vm527_vm0, %v511_v24, 0.0  ;;  %v2217_v4 = vld [vmem:[%s10654_s1 + $0x4c8] sm:$0xff]  ;;  %v2216_v24 = vld [vmem:[%s10654_s1 + $0x4c0] sm:$0xff] }
 0x385   :  { %5637 = vmatmul.mubr.f32.vlgmr.msra.gmra.mxu0 %v5404_v16  ;;  %v4681_v2 = vrot.slane %v1628_v1, %v6754_v55  ;;  %v4760_v20 = vrot.slane %v1676_v26, %v6754_v55  ;;  %v4746_v62 = vsel %vm2920_vm11, %v4745_v29, %v4741_v13  ;;  %v4677_v61 = vsel %vm2934_vm13, %v4676_v59, %v4672_v14  ;;  %v2239_v1 = vld [vmem:[%s10654_s1 + $0x578] sm:$0xff]  ;;  %v2254_v16 = vld [vmem:[%s10654_s1 + $0x5f0] sm:$0xff]  ;;  %v2252_v14 = vld [vmem:[%s10654_s1 + $0x5e0] sm:$0xff] }
 0x386   :  { %6149 = vmatpush3.msra.mxu0 %v2207_v51  ;;  %v4751_v37 = vsel %vm10678_vm7, %v4750_v40, %v4746_v62  ;;  %v466_v51 = vld [vmem:[%s10653_s0 + $0xe18] sm:$0xff]  ;;  %v10680_v40 = vld [vmem:[#allocation5_spill] sm:$0xff]  ;;  %vm10681_vm7 = vcmask 523712   ;;  %vm10682_vm9 = vcmask 654912  }
 0x387   :  { %1876 = vadd.xlane.f32.xlu1 %v1875_v10  ;;  %1873 = vadd.xlane.f32.xlu0 %v1872_v32  ;;  %v4756_v33 = vsel %vm2934_vm13, %v4755_v22, %v4751_v37  ;;  %v482_v10 = vld [vmem:[%s10653_s0 + $0xe98] sm:$0xff]  ;;  %v4682_v15 = vsel %vm2941_vm14, %v4681_v2, %v4677_v61  ;;  %v2238_v22 = vld [vmem:[%s10654_s1 + $0x570] sm:$0xff]  ;;  %v1881_v7 = vsel %vm527_vm0, %v466_v51, 0.0  ;;  %v483_v2 = vld [vmem:[%s10653_s0 + $0xea0] sm:$0xff] }
 0x388   :  { %v1631_v46 = vpop.xlane.xlu1 %1630  ;;  %v1679_v47 = vpop.xlane.xlu0 %1678  ;;  %6150 = vmatprep.subr.mxu0 %v2222_v6  ;;  %v4761_v5 = vsel %vm2941_vm14, %v4760_v20, %v4756_v33  ;;  %v1929_v32 = vsel %vm527_vm0, %v482_v10, 0.0  ;;  %v2203_v26 = vld [vmem:[%s10654_s1 + $0x458] sm:$0xff]  ;;  %v495_v6 = vld [vmem:[%s10653_s0 + $0xf00] sm:$0xff]  ;;  %v2202_v20 = vld [vmem:[%s10654_s1 + $0x450] sm:$0xff] }
 0x389   :  { %v4686_v39 = vrot.slane %v1631_v46, %v6759_v57  ;;  %v4765_v50 = vrot.slane %v1679_v47, %v6759_v57  ;;  %6151 = vmatpush3.msra.mxu0 %v2206_v41  ;;  %v2253_v41 = vld [vmem:[%s10654_s1 + $0x5e8] sm:$0xff]  ;;  %v513_v33 = vld [vmem:[%s10653_s0 + $0xf90] sm:$0xff]  ;;  %v2236_v10 = vld [vmem:[%s10654_s1 + $0x560] sm:$0xff] }
 0x38a   :  { %6152 = vmatprep.subr.mxu0 %v2221_v23  ;;  %v2237_v23 = vld [vmem:[%s10654_s1 + $0x568] sm:$0xff]  ;;  %v2199_v51 = vld [vmem:[%s10654_s1 + $0x438] sm:$0xff] }
 0x38b   :  { %1879 = vadd.xlane.f32.xlu1 %v1878_v45  ;;  %1927 = vadd.xlane.f32.xlu0 %v1926_v56  ;;  %v4766_v11 = vsel %vm2948_vm15, %v4765_v50, %v4761_v5  ;;  %v4687_v60 = vsel %vm2948_vm15, %v4686_v39, %v4682_v15  ;;  %v2201_v37 = vld [vmem:[%s10654_s1 + $0x448] sm:$0xff]  ;;  %v1968_v45 = vsel %vm527_vm0, %v495_v6, 0.0  ;;  %v1932_v56 = vsel %vm527_vm0, %v483_v2, 0.0  ;;  %v2200_v15 = vld [vmem:[%s10654_s1 + $0x440] sm:$0xff]  ;;  %v2251_v5 = vld [vmem:[%s10654_s1 + $0x5d8] sm:$0xff] }
 0x38c   :  { %v1733_v21 = vpop.xlane.xlu1 %1732  ;;  %v1730_v12 = vpop.xlane.xlu0 %1729  ;;  %v5407_v29 = vsel %vm5399_vm12, %v4766_v11, %v7462_v48  ;;  %v5406_v0 = vsel %vm5399_vm12, %v4687_v60, %v7365_v54  ;;  %6153 = vmatpush3.msra.mxu0 %v2205_v34  ;;  %v512_v48 = vld [vmem:[%s10653_s0 + $0xf88] sm:$0xff]  ;;  %v2219_v54 = vld [vmem:[%s10654_s1 + $0x4d8] sm:$0xff]  ;;  %v497_v6 = vld [vmem:[%s10653_s0 + $0xf10] sm:$0xff] }
 0x38d   :  { %v4853_v35 = vrot.slane %v1733_v21, %v6639_v28  ;;  %v4849_v17 = vrot.slane %v1730_v12, %v10680_v40  ;;  %5706 = vmatprep.mubr.f32.mxu1 %v5407_v29  ;;  %6154 = vmatprep.subr.mxu0 %v2220_v8  ;;  %v2019_v63 = vsel %vm527_vm0, %v512_v48, 0.0  ;;  %v496_v50 = vld [vmem:[%s10653_s0 + $0xf08] sm:$0xff]  ;;  %v2215_v11 = vld [vmem:[%s10654_s1 + $0x4b8] sm:$0xff]  ;;  %v2022_v12 = vsel %vm527_vm0, %v513_v33, 0.0  ;;  %v2214_v48 = vld [vmem:[%s10654_s1 + $0x4b0] sm:$0xff] }
 0x38e   :  { %5707 = vmatmul.mubr.f32.vlgmr.msra.gmra.mxu1 %v5406_v0  ;;  %6155 = vmatpush3.msra.mxu0 %v2204_v18  ;;  %v2235_v60 = vld [vmem:[%s10654_s1 + $0x558] sm:$0xff]  ;;  %v1971_v29 = vsel %vm527_vm0, %v496_v50, 0.0  ;;  %v484_v0 = vld [vmem:[%s10653_s0 + $0xea8] sm:$0xff] }
 0x38f   :  { %v4854_v49 = vsel %vm2850_vm1, %v4853_v35, %v4849_v17  ;;  %2017 = vadd.xlane.f32.xlu1 %v2016_v30  ;;  %1930 = vadd.xlane.f32.xlu0 %v1929_v32  ;;  %v467_v32 = vld [vmem:[%s10653_s0 + $0xe20] sm:$0xff]  ;;  %v2250_v35 = vld [vmem:[%s10654_s1 + $0x5d0] sm:$0xff]  ;;  %v2247_v50 = vld [vmem:[%s10654_s1 + $0x5b8] sm:$0xff] }
 0x390   :  { %v1685_v59 = vpop.xlane.xlu1 %1684  ;;  %6156 = vmatprep.subr.mxu0 %v2219_v54  ;;  %6184 = vmatpush3.msra.mxu1 %v2239_v1  ;;  %v1682_v58 = vpop.xlane.xlu0 %1681  ;;  %v2234_v54 = vld [vmem:[%s10654_s1 + $0x550] sm:$0xff] }
 0x391   :  { %v4774_v13 = vrot.slane %v1685_v59, %v6639_v28  ;;  %6157 = vmatpush3.msra.mxu0 %v2203_v26  ;;  %6185 = vmatprep.subr.mxu1 %v2254_v16  ;;  %v4770_v62 = vrot.slane %v1682_v58, %v10680_v40  ;;  %v2198_v1 = vld [vmem:[%s10654_s1 + $0x430] sm:$0xff]  ;;  %v2249_v26 = vld [vmem:[%s10654_s1 + $0x5c8] sm:$0xff]  ;;  %v514_v59 = vld [vmem:[%s10653_s0 + $0xf98] sm:$0xff] }
 0x392   :  { %6158 = vmatprep.subr.mxu0 %v2218_v43  ;;  %6186 = vmatpush3.msra.mxu1 %v2238_v22  ;;  %v1935_v43 = vsel %vm527_vm0, %v484_v0, 0.0  ;;  %v1884_v22 = vsel %vm527_vm0, %v467_v32, 0.0  ;;  %v2233_v58 = vld [vmem:[%s10654_s1 + $0x548] sm:$0xff]  ;;  %v498_v0 = vld [vmem:[%s10653_s0 + $0xf18] sm:$0xff]  ;;  %v2230_v32 = vld [vmem:[%s10654_s1 + $0x530] sm:$0xff] }
 0x393   :  { %1882 = vadd.xlane.f32.xlu1 %v1881_v7  ;;  %2020 = vadd.xlane.f32.xlu0 %v2019_v63  ;;  %v4775_v46 = vsel %vm2850_vm1, %v4774_v13, %v4770_v62  ;;  %v2213_v13 = vld [vmem:[%s10654_s1 + $0x4a8] sm:$0xff]  ;;  %v2248_v62 = vld [vmem:[%s10654_s1 + $0x5c0] sm:$0xff] }
 0x394   :  { %v1688_v47 = vpop.xlane.xlu1 %1687  ;;  %6159 = vmatpush3.msra.mxu0 %v2202_v20  ;;  %6187 = vmatprep.subr.mxu1 %v2253_v41  ;;  %v1736_v39 = vpop.xlane.xlu0 %1735  ;;  %v2197_v41 = vld [vmem:[%s10654_s1 + $0x428] sm:$0xff] }
 0x395   :  { %v4779_v61 = vrot.slane %v1688_v47, %v6646_v31  ;;  %6160 = vmatprep.subr.mxu0 %v2217_v4  ;;  %6188 = vmatpush3.msra.mxu1 %v2237_v23  ;;  %v4858_v34 = vrot.slane %v1736_v39, %v6646_v31  ;;  %v2212_v23 = vld [vmem:[%s10654_s1 + $0x4a0] sm:$0xff]  ;;  %v2025_v47 = vsel %vm527_vm0, %v514_v59, 0.0  ;;  %v486_v59 = vld [vmem:[%s10653_s0 + $0xeb8] sm:$0xff] }
 0x396   :  { %6161 = vmatpush3.msra.mxu0 %v2201_v37  ;;  %6189 = vmatprep.subr.mxu1 %v2252_v14  ;;  %v2232_v37 = vld [vmem:[%s10654_s1 + $0x540] sm:$0xff] }
 0x397   :  { %v4780_v8 = vsel %vm2857_vm2, %v4779_v61, %v4775_v46  ;;  %1969 = vadd.xlane.f32.xlu1 %v1968_v45  ;;  %1933 = vadd.xlane.f32.xlu0 %v1932_v56  ;;  %v4859_v18 = vsel %vm2857_vm2, %v4858_v34, %v4854_v49  ;;  %v1974_v45 = vsel %vm527_vm0, %v497_v6, 0.0  ;;  %v485_v56 = vld [vmem:[%s10653_s0 + $0xeb0] sm:$0xff]  ;;  %v468_v61 = vld [vmem:[%s10653_s0 + $0xe28] sm:$0xff]  ;;  %v2196_v39 = vld [vmem:[%s10654_s1 + $0x420] sm:$0xff] }
 0x398   :  { %v1826_v21 = vpop.xlane.xlu1 %1825  ;;  %6162 = vmatprep.subr.mxu0 %v2216_v24  ;;  %6190 = vmatpush3.msra.mxu1 %v2236_v10  ;;  %v1739_v30 = vpop.xlane.xlu0 %1738  ;;  %v2211_v10 = vld [vmem:[%s10654_s1 + $0x498] sm:$0xff]  ;;  %v469_v6 = vld [vmem:[%s10653_s0 + $0xe30] sm:$0xff] }
 0x399   :  { %6163 = vmatpush3.msra.mxu0 %v2200_v15  ;;  %6191 = vmatprep.subr.mxu1 %v2251_v5  ;;  %v4863_v17 = vrot.slane %v1739_v30, %v6636_v27  ;;  %v5007_v2 = vrot.slane %v1826_v21, %v10680_v40  ;;  %v2231_v34 = vld [vmem:[%s10654_s1 + $0x538] sm:$0xff]  ;;  %v2246_v5 = vld [vmem:[%s10654_s1 + $0x5b0] sm:$0xff]  ;;  %v515_v21 = vld [vmem:[%s10653_s0 + $0xfa0] sm:$0xff] }
 0x39a   :  { %6164 = vmatprep.subr.mxu0 %v2215_v11  ;;  %6192 = vmatpush3.msra.mxu1 %v2235_v60  ;;  %v2195_v15 = vld [vmem:[%s10654_s1 + $0x418] sm:$0xff]  ;;  %v1938_v60 = vsel %vm527_vm0, %v485_v56, 0.0  ;;  %v2210_v30 = vld [vmem:[%s10654_s1 + $0x490] sm:$0xff] }
 0x39b   :  { %2023 = vadd.xlane.f32.xlu1 %v2022_v12  ;;  %1972 = vadd.xlane.f32.xlu0 %v1971_v29  ;;  %v4864_v16 = vsel %vm2864_vm3, %v4863_v17, %v4859_v18  ;;  %v1887_v18 = vsel %vm527_vm0, %v468_v61, 0.0  ;;  %v2194_v17 = vld [vmem:[%s10654_s1 + $0x410] sm:$0xff]  ;;  %v516_v61 = vld [vmem:[%s10653_s0 + $0xfa8] sm:$0xff] }
 0x39c   :  { %v1691_v49 = vpop.xlane.xlu1 %1690  ;;  %6165 = vmatpush3.msra.mxu0 %v2199_v51  ;;  %6193 = vmatprep.subr.mxu1 %v2250_v35  ;;  %v1829_v63 = vpop.xlane.xlu0 %1828 }
 0x39d   :  { %v4784_v7 = vrot.slane %v1691_v49, %v6636_v27  ;;  %6166 = vmatprep.subr.mxu0 %v2214_v48  ;;  %6194 = vmatpush3.msra.mxu1 %v2234_v54  ;;  %v5011_v20 = vrot.slane %v1829_v63, %v6639_v28  ;;  %v2245_v48 = vld [vmem:[%s10654_s1 + $0x5a8] sm:$0xff] }
 0x39e   :  { %6167 = vmatpush3.msra.mxu0 %v2198_v1  ;;  %6195 = vmatprep.subr.mxu1 %v2249_v26  ;;  %v2209_v1 = vld [vmem:[%s10654_s1 + $0x488] sm:$0xff] }
 0x39f   :  { %v9778_v4 = vsel %vm2864_vm3, %v4784_v7, %v4780_v8  ;;  %1936 = vadd.xlane.f32.xlu1 %v1935_v43  ;;  %1885 = vadd.xlane.f32.xlu0 %v1884_v22  ;;  %v5012_v14 = vsel %vm2850_vm1, %v5011_v20, %v5007_v2  ;;  %v2229_v26 = vld [vmem:[%s10654_s1 + $0x528] sm:$0xff]  ;;  %v2028_v43 = vsel %vm527_vm0, %v515_v21, 0.0  ;;  %v1977_v22 = vsel %vm527_vm0, %v498_v0, 0.0  ;;  %v2208_v20 = vld [vmem:[%s10654_s1 + $0x480] sm:$0xff]  ;;  %v470_v21 = vld [vmem:[%s10653_s0 + $0xe38] sm:$0xff] }
 0x3a0   :  { %v1778_v46 = vpop.xlane.xlu1 %1777  ;;  %6168 = vmatprep.subr.mxu0 %v2213_v13  ;;  %6196 = vmatpush3.msra.mxu1 %v2233_v58  ;;  %v1742_v33 = vpop.xlane.xlu0 %1741  ;;  %v2193_v13 = vld [vmem:[%s10654_s1 + $0x408] sm:$0xff]  ;;  %v2244_v58 = vld [vmem:[%s10654_s1 + $0x5a0] sm:$0xff] }
 0x3a1   :  { %6169 = vmatpush3.msra.mxu0 %v2197_v41  ;;  %6197 = vmatprep.subr.mxu1 %v2248_v62  ;;  %v4868_v24 = vrot.slane %v1742_v33, %v6665_v44  ;;  %v4928_v51 = vrot.slane %v1778_v46, %v10680_v40  ;;  %v2228_v41 = vld [vmem:[%s10654_s1 + $0x520] sm:$0xff]  ;;  %v2225_v0 = vld [vmem:[%s10654_s1 + $0x508] sm:$0xff] }
 0x3a2   :  { %6170 = vmatprep.subr.mxu0 %v2212_v23  ;;  %6198 = vmatpush3.msra.mxu1 %v2232_v37  ;;  %v2192_v23 = vld [vmem:[%s10654_s1 + $0x400] sm:$0xff]  ;;  %v2243_v37 = vld [vmem:[%s10654_s1 + $0x598] sm:$0xff] }
 0x3a3   :  { %2026 = vadd.xlane.f32.xlu1 %v2025_v47  ;;  %1975 = vadd.xlane.f32.xlu0 %v1974_v45  ;;  %v4869_v8 = vsel %vm2871_vm4, %v4868_v24, %v4864_v16  ;;  %v1941_v47 = vsel %vm527_vm0, %v486_v59, 0.0  ;;  %v1890_v45 = vsel %vm527_vm0, %v469_v6, 0.0  ;;  %v2242_v24 = vld [vmem:[%s10654_s1 + $0x590] sm:$0xff] }
 0x3a4   :  { %v1832_v11 = vpop.xlane.xlu1 %1831  ;;  %6171 = vmatpush3.msra.mxu0 %v2196_v39  ;;  %6199 = vmatprep.subr.mxu1 %v2247_v50  ;;  %v1781_v29 = vpop.xlane.xlu0 %1780  ;;  %v499_v39 = vld [vmem:[%s10653_s0 + $0xf20] sm:$0xff] }
 0x3a5   :  { %v5016_v12 = vrot.slane %v1832_v11, %v6646_v31  ;;  %6172 = vmatprep.subr.mxu0 %v2211_v10  ;;  %6200 = vmatpush3.msra.mxu1 %v2231_v34  ;;  %v4932_v35 = vrot.slane %v1781_v29, %v6639_v28  ;;  %v2226_v34 = vld [vmem:[%s10654_s1 + $0x510] sm:$0xff]  ;;  %v1980_v11 = vsel %vm527_vm0, %v499_v39, 0.0 }
 0x3a6   :  { %6173 = vmatpush3.msra.mxu0 %v2195_v15  ;;  %6201 = vmatprep.subr.mxu1 %v2246_v5 }
 0x3a7   :  { %v5017_v54 = vsel %vm2857_vm2, %v5016_v12, %v5012_v14  ;;  %1939 = vadd.xlane.f32.xlu1 %v1938_v60  ;;  %1888 = vadd.xlane.f32.xlu0 %v1887_v18  ;;  %v4933_v16 = vsel %vm2850_vm1, %v4932_v35, %v4928_v51  ;;  %v487_v18 = vld [vmem:[%s10653_s0 + $0xec0] sm:$0xff]  ;;  %v2241_v12 = vld [vmem:[%s10654_s1 + $0x588] sm:$0xff] }
 0x3a8   :  { %v1745_v49 = vpop.xlane.xlu1 %1744  ;;  %6174 = vmatprep.subr.mxu0 %v2210_v30  ;;  %6202 = vmatpush3.msra.mxu1 %v2230_v32  ;;  %v1694_v63 = vpop.xlane.xlu0 %1693  ;;  %v2240_v30 = vld [vmem:[%s10654_s1 + $0x580] sm:$0xff]  ;;  %v1944_v35 = vsel %vm527_vm0, %v487_v18, 0.0 }
 0x3a9   :  { %v4873_v7 = vrot.slane %v1745_v49, %v6651_v36  ;;  %6175 = vmatpush3.msra.mxu0 %v2194_v17  ;;  %6203 = vmatprep.subr.mxu1 %v2245_v48  ;;  %v4789_v2 = vrot.slane %v1694_v63, %v6665_v44  ;;  %v1893_v17 = vsel %vm527_vm0, %v470_v21, 0.0 }
 0x3aa   :  { %6176 = vmatprep.subr.mxu0 %v2209_v1  ;;  %6204 = vmatpush3.msra.mxu1 %v2229_v26  ;;  %v517_v1 = vld [vmem:[%s10653_s0 + $0xfb0] sm:$0xff]  ;;  %v500_v26 = vld [vmem:[%s10653_s0 + $0xf28] sm:$0xff] }
 0x3ab   :  { %v9869_v62 = vsel %vm2878_vm5, %v4873_v7, %v4869_v8  ;;  %2029 = vadd.xlane.f32.xlu1 %v2028_v43  ;;  %1978 = vadd.xlane.f32.xlu0 %v1977_v22  ;;  %v4790_v14 = vsel %vm2871_vm4, %v4789_v2, %v9778_v4  ;;  %v2227_v4 = vld [vmem:[%s10654_s1 + $0x518] sm:$0xff]  ;;  %v2031_v8 = vsel %vm527_vm0, %v516_v61, 0.0  ;;  %v2034_v7 = vsel %vm527_vm0, %v517_v1, 0.0  ;;  %v503_v1 = vld [vmem:[%s10653_s0 + $0xf40] sm:$0xff] }
 0x3ac   :  { %v1835_v46 = vpop.xlane.xlu1 %1834  ;;  %6177 = vmatpush3.msra.mxu0 %v2193_v13  ;;  %6205 = vmatprep.subr.mxu1 %v2244_v58  ;;  %v1784_v33 = vpop.xlane.xlu0 %1783  ;;  %v1983_v63 = vsel %vm527_vm0, %v500_v26, 0.0  ;;  %v488_v13 = vld [vmem:[%s10653_s0 + $0xec8] sm:$0xff]  ;;  %v471_v58 = vld [vmem:[%s10653_s0 + $0xe40] sm:$0xff] }
 0x3ad   :  { %v5021_v56 = vrot.slane %v1835_v46, %v6636_v27  ;;  %6178 = vmatprep.subr.mxu0 %v2208_v20  ;;  %6206 = vmatpush3.msra.mxu1 %v2228_v41  ;;  %v4937_v50 = vrot.slane %v1784_v33, %v6646_v31  ;;  %v1947_v20 = vsel %vm527_vm0, %v488_v13, 0.0  ;;  %v1896_v41 = vsel %vm527_vm0, %v471_v58, 0.0  ;;  %v501_v46 = vld [vmem:[%s10653_s0 + $0xf30] sm:$0xff] }
 0x3ae   :  { %6179 = vmatpush3.msra.mxu0 %v2192_v23  ;;  %6207 = vmatprep.subr.mxu1 %v2243_v37  ;;  %v1986_v39 = vsel %vm527_vm0, %v501_v46, 0.0 }
 0x3af   :  { %v5022_v10 = vsel %vm2864_vm3, %v5021_v56, %v5017_v54  ;;  %1942 = vadd.xlane.f32.xlu1 %v1941_v47  ;;  %1891 = vadd.xlane.f32.xlu0 %v1890_v45  ;;  %v4938_v15 = vsel %vm2857_vm2, %v4937_v50, %v4933_v16  ;;  %v2224_v16 = vld [vmem:[%s10654_s1 + $0x500] sm:$0xff]  ;;  %v489_v50 = vld [vmem:[%s10653_s0 + $0xed0] sm:$0xff] }
 0x3b0   :  { %v9900_v5 = vpop.xlane.xlu1 %1747  ;;  %6208 = vmatpush3.msra.mxu1 %v2227_v4  ;;  %v1697_v60 = vpop.xlane.xlu0 %1696 }
 0x3b1   :  { %6209 = vmatprep.subr.mxu1 %v2242_v24  ;;  %v4794_v29 = vrot.slane %v1697_v60, %v6651_v36  ;;  %v472_v24 = vld [vmem:[%s10653_s0 + $0xe48] sm:$0xff]  ;;  %v502_v60 = vld [vmem:[%s10653_s0 + $0xf38] sm:$0xff] }
 0x3b2   :  { %6210 = vmatpush3.msra.mxu1 %v2226_v34  ;;  %v1950_v34 = vsel %vm527_vm0, %v489_v50, 0.0 }
 0x3b3   :  { %2032 = vadd.xlane.f32.xlu1 %v2031_v8  ;;  %1981 = vadd.xlane.f32.xlu0 %v1980_v11  ;;  %v9921_v32 = vsel %vm2878_vm5, %v4794_v29, %v4790_v14  ;;  %v518_v14 = vld [vmem:[%s10653_s0 + $0xfb8] sm:$0xff]  ;;  %v519_v11 = vld [vmem:[%s10653_s0 + $0xfc0] sm:$0xff] }
 0x3b4   :  { %v1838_v51 = vpop.xlane.xlu1 %1837  ;;  %6211 = vmatprep.subr.mxu1 %v2241_v12  ;;  %v1787_v54 = vpop.xlane.xlu0 %1786  ;;  %v2037_v61 = vsel %vm527_vm0, %v518_v14, 0.0  ;;  %v2040_v21 = vsel %vm527_vm0, %v519_v11, 0.0  ;;  %v1989_v12 = vsel %vm527_vm0, %v502_v60, 0.0  ;;  %v505_v11 = vld [vmem:[%s10653_s0 + $0xf50] sm:$0xff] }
 0x3b5   :  { %v5026_v48 = vrot.slane %v1838_v51, %v6665_v44  ;;  %6212 = vmatpush3.msra.mxu1 %v2225_v0  ;;  %v4942_v49 = vrot.slane %v1787_v54, %v6636_v27  ;;  %v490_v0 = vld [vmem:[%s10653_s0 + $0xed8] sm:$0xff]  ;;  %v520_v54 = vld [vmem:[%s10653_s0 + $0xfc8] sm:$0xff] }
 0x3b6   :  { %6213 = vmatprep.subr.mxu1 %v2240_v30  ;;  %v473_v30 = vld [vmem:[%s10653_s0 + $0xe50] sm:$0xff] }
 0x3b7   :  { %v5027_v43 = vsel %vm2871_vm4, %v5026_v48, %v5022_v10  ;;  %1945 = vadd.xlane.f32.xlu1 %v1944_v35  ;;  %1894 = vadd.xlane.f32.xlu0 %v1893_v17  ;;  %v4943_v22 = vsel %vm2864_vm3, %v4942_v49, %v4938_v15  ;;  %v1899_v15 = vsel %vm527_vm0, %v472_v24, 0.0  ;;  %v1953_v35 = vsel %vm527_vm0, %v490_v0, 0.0 }
 0x3b8   :  { %v9938_v59 = vpop.xlane.xlu1 %1750  ;;  %6214 = vmatpush3.msra.mxu1 %v2224_v16  ;;  %v9942_v6 = vpop.xlane.xlu0 %1699  ;;  %v1902_v17 = vsel %vm527_vm0, %v473_v30, 0.0  ;;  %v2043_v16 = vsel %vm527_vm0, %v520_v54, 0.0  ;;  %v1992_v49 = vsel %vm527_vm0, %v503_v1, 0.0  ;;  %v493_v30 = vld [vmem:[%s10653_s0 + $0xef0] sm:$0xff] }
 0x3b9   :  { %v1962_v54 = vsel %vm527_vm0, %v493_v30, 0.0  ;;  %v4883_v30 = vrot.slane %v9938_v59, %v6673_v52  ;;  %v508_v59 = vld [vmem:[%s10653_s0 + $0xf68] sm:$0xff] }
 0x3bb   :  { %2035 = vadd.xlane.f32.xlu1 %v2034_v7  ;;  %1984 = vadd.xlane.f32.xlu0 %v1983_v63  ;;  %v474_v7 = vld [vmem:[%s10653_s0 + $0xe58] sm:$0xff] }
 0x3bc   :  { %v1841_v2 = vpop.xlane.xlu1 %1840  ;;  %v1790_v37 = vpop.xlane.xlu0 %1789  ;;  %v1905_v58 = vsel %vm527_vm0, %v474_v7, 0.0  ;;  %v2287_v7 = vld [vmem:[%s10654_s1 + $0x6f8] sm:$0xff] }
 0x3bd   :  { %v5031_v23 = vrot.slane %v1841_v2, %v6651_v36  ;;  %v4947_v47 = vrot.slane %v1790_v37, %v6665_v44  ;;  %6218 = vmatprep.subr.mxu0 %v2287_v7  ;;  %v478_v7 = vld [vmem:[%s10653_s0 + $0xe78] sm:$0xff] }
 0x3bf   :  { %v9961_v45 = vsel %vm2878_vm5, %v5031_v23, %v5027_v43  ;;  %1948 = vadd.xlane.f32.xlu1 %v1947_v20  ;;  %1897 = vadd.xlane.f32.xlu0 %v1896_v41  ;;  %v9964_v56 = vsel %vm2871_vm4, %v4947_v47, %v4943_v22  ;;  %v491_v22 = vld [vmem:[%s10653_s0 + $0xee0] sm:$0xff]  ;;  %v521_v20 = vld [vmem:[%s10653_s0 + $0xfd0] sm:$0xff]  ;;  %v504_v41 = vld [vmem:[%s10653_s0 + $0xf48] sm:$0xff] }
 0x3c0   :  { %v9966_v33 = vpop.xlane.xlu1 %1753  ;;  %v9970_v4 = vpop.xlane.xlu0 %1702  ;;  %v1956_v13 = vsel %vm527_vm0, %v491_v22, 0.0  ;;  %v2046_v37 = vsel %vm527_vm0, %v521_v20, 0.0  ;;  %v1995_v14 = vsel %vm527_vm0, %v504_v41, 0.0  ;;  %v492_v47 = vld [vmem:[%s10653_s0 + $0xee8] sm:$0xff]  ;;  %v506_v22 = vld [vmem:[%s10653_s0 + $0xf58] sm:$0xff] }
 0x3c1   :  { %v1959_v50 = vsel %vm527_vm0, %v492_v47, 0.0  ;;  %v2001_v20 = vsel %vm527_vm0, %v506_v22, 0.0 }
 0x3c3   :  { %2038 = vadd.xlane.f32.xlu1 %v2037_v61  ;;  %1987 = vadd.xlane.f32.xlu0 %v1986_v39  ;;  %v475_v61 = vld [vmem:[%s10653_s0 + $0xe60] sm:$0xff] }
 0x3c4   :  { %v9978_v10 = vpop.xlane.xlu1 %1843  ;;  %v9982_v8 = vpop.xlane.xlu0 %1792  ;;  %v1908_v24 = vsel %vm527_vm0, %v475_v61, 0.0 }
 0x3c7   :  { %1951 = vadd.xlane.f32.xlu1 %v1950_v34  ;;  %1900 = vadd.xlane.f32.xlu0 %v1899_v15  ;;  %v522_v15 = vld [vmem:[%s10653_s0 + $0xfd8] sm:$0xff] }
 0x3c8   :  { %v9990_v18 = vpop.xlane.xlu1 %1756  ;;  %v9994_v29 = vpop.xlane.xlu0 %1705 }
 0x3cb   :  { %2041 = vadd.xlane.f32.xlu1 %v2040_v21  ;;  %1990 = vadd.xlane.f32.xlu0 %v1989_v12  ;;  %v2049_v21 = vsel %vm527_vm0, %v522_v15, 0.0  ;;  %v1998_v12 = vsel %vm527_vm0, %v505_v11, 0.0  ;;  %v524_v15 = vld [vmem:[%s10653_s0 + $0xfe8] sm:$0xff]  ;;  %v507_v11 = vld [vmem:[%s10653_s0 + $0xf60] sm:$0xff] }
 0x3cc   :  { %v10002_v51 = vpop.xlane.xlu1 %1846  ;;  %v10006_v48 = vpop.xlane.xlu0 %1795 }
 0x3cf   :  { %1954 = vadd.xlane.f32.xlu1 %v1953_v35  ;;  %1903 = vadd.xlane.f32.xlu0 %v1902_v17  ;;  %v476_v35 = vld [vmem:[%s10653_s0 + $0xe68] sm:$0xff] }
 0x3d0   :  { %v10014_v26 = vpop.xlane.xlu1 %1759  ;;  %v10018_v43 = vpop.xlane.xlu0 %1708  ;;  %v1911_v1 = vsel %vm527_vm0, %v476_v35, 0.0  ;;  %v4888_v35 = vrot.slane %v9966_v33, %v6706_v9 }
 0x3d3   :  { %2044 = vadd.xlane.f32.xlu1 %v2043_v16  ;;  %1993 = vadd.xlane.f32.xlu0 %v1992_v49  ;;  %v523_v49 = vld [vmem:[%s10653_s0 + $0xfe0] sm:$0xff] }
 0x3d4   :  { %v10026_v63 = vpop.xlane.xlu1 %1849  ;;  %v10030_v2 = vpop.xlane.xlu0 %1798 }
 0x3d7   :  { %1957 = vadd.xlane.f32.xlu1 %v1956_v13  ;;  %1906 = vadd.xlane.f32.xlu0 %v1905_v58  ;;  %v2052_v58 = vsel %vm527_vm0, %v523_v49, 0.0  ;;  %v2004_v49 = vsel %vm527_vm0, %v507_v11, 0.0 }
 0x3d8   :  { %v10038_v23 = vpop.xlane.xlu1 %1762  ;;  %v10042_v46 = vpop.xlane.xlu0 %1711 }
 0x3db   :  { %2047 = vadd.xlane.f32.xlu1 %v2046_v37  ;;  %1996 = vadd.xlane.f32.xlu0 %v1995_v14  ;;  %v494_v37 = vld [vmem:[%s10653_s0 + $0xef8] sm:$0xff]  ;;  %v477_v14 = vld [vmem:[%s10653_s0 + $0xe70] sm:$0xff] }
 0x3dc   :  { %v10050_v39 = vpop.xlane.xlu1 %1852  ;;  %v10054_v34 = vpop.xlane.xlu0 %1801  ;;  %v1965_v61 = vsel %vm527_vm0, %v494_v37, 0.0 }
 0x3df   :  { %1960 = vadd.xlane.f32.xlu1 %v1959_v50  ;;  %1909 = vadd.xlane.f32.xlu0 %v1908_v24  ;;  %v1914_v50 = vsel %vm527_vm0, %v477_v14, 0.0 }
 0x3e0   :  { %v10062_v60 = vpop.xlane.xlu1 %1765  ;;  %v10066_v0 = vpop.xlane.xlu0 %1714 }
 0x3e1   :  { %v4908_v14 = vrot.slane %v10062_v60, %v6740_v42  ;;  %v525_v60 = vld [vmem:[%s10653_s0 + $0xff0] sm:$0xff] }
 0x3e3   :  { %2050 = vadd.xlane.f32.xlu1 %v2049_v21  ;;  %1999 = vadd.xlane.f32.xlu0 %v1998_v12  ;;  %v4878_v21 = vrot.slane %v9900_v5, %v6676_v53  ;;  %v2319_v12 = vld [vmem:[%s10654_s1 + $0x7f8] sm:$0xff]  ;;  %v4893_v5 = vrot.slane %v9990_v18, %v6694_v3  ;;  %v4903_v18 = vrot.slane %v10038_v23, %v6714_v19  ;;  %v509_v23 = vld [vmem:[%s10653_s0 + $0xf70] sm:$0xff] }
 0x3e4   :  { %v10074_v17 = vpop.xlane.xlu1 %1855  ;;  %v10078_v16 = vpop.xlane.xlu0 %1804  ;;  %6253 = vmatprep.subr.mxu1 %v2319_v12 }
 0x3e5   :  { %v4879_v33 = vsel %vm2885_vm6, %v4878_v21, %v9869_v62  ;;  %v1917_v62 = vsel %vm527_vm0, %v478_v7, 0.0  ;;  %v4799_v21 = vrot.slane %v9942_v6, %v6676_v53  ;;  %v2010_v6 = vsel %vm527_vm0, %v509_v23, 0.0 }
 0x3e6   :  { %v4809_v7 = vrot.slane %v9994_v29, %v6706_v9 }
 0x3e7   :  { %1963 = vadd.xlane.f32.xlu1 %v1962_v54  ;;  %1912 = vadd.xlane.f32.xlu0 %v1911_v1  ;;  %v2055_v1 = vsel %vm527_vm0, %v524_v15, 0.0 }
 0x3e8   :  { %v1769_v13 = vpop.xlane.xlu1 %1768  ;;  %v10091_v41 = vpop.xlane.xlu0 %1717 }
 0x3e9   :  { %v4913_v15 = vrot.slane %v1769_v13, %v6734_v38  ;;  %v510_v13 = vld [vmem:[%s10653_s0 + $0xf78] sm:$0xff] }
 0x3eb   :  { %2053 = vadd.xlane.f32.xlu1 %v2052_v58  ;;  %2002 = vadd.xlane.f32.xlu0 %v2001_v20  ;;  %v4898_v58 = vrot.slane %v10014_v26, %v6726_v25  ;;  %v4884_v20 = vsel %vm10681_vm7, %v4883_v30, %v4879_v33  ;;  %vm10683_vm7 = vcmask 851712  }
 0x3ec   :  { %v10099_v47 = vpop.xlane.xlu1 %1858  ;;  %v10103_v24 = vpop.xlane.xlu0 %1807  ;;  %v4889_v37 = vsel %vm2899_vm8, %v4888_v35, %v4884_v20  ;;  %v4804_v35 = vrot.slane %v9970_v4, %v6673_v52  ;;  %v2013_v20 = vsel %vm527_vm0, %v510_v13, 0.0 }
 0x3ed   :  { %v4894_v26 = vsel %vm10682_vm9, %v4893_v5, %v4889_v37  ;;  %v5036_v37 = vrot.slane %v9978_v10, %v6676_v53  ;;  %vm10684_vm9 = vcmask 523712   ;;  %v5041_v10 = vrot.slane %v10002_v51, %v6673_v52 }
 0x3ee   :  { %v4899_v12 = vsel %vm2913_vm10, %v4898_v58, %v4894_v26 }
 0x3ef   :  { %1966 = vadd.xlane.f32.xlu1 %v1965_v61  ;;  %1915 = vadd.xlane.f32.xlu0 %v1914_v50  ;;  %v2007_v50 = vsel %vm527_vm0, %v508_v59, 0.0  ;;  %v2058_v59 = vsel %vm527_vm0, %v525_v60, 0.0  ;;  %v10685_v60 = vld [vmem:[#allocation7_spill] sm:$0xff] }
 0x3f0   :  { %v1772_v54 = vpop.xlane.xlu1 %1771  ;;  %v10124_v22 = vpop.xlane.xlu0 %1720 }
 0x3f1   :  { %v4918_v30 = vrot.slane %v1772_v54, %v6754_v55  ;;  %v526_v54 = vld [vmem:[%s10653_s0 + $0xff8] sm:$0xff] }
 0x3f3   :  { %2056 = vadd.xlane.f32.xlu1 %v2055_v1  ;;  %2005 = vadd.xlane.f32.xlu0 %v2004_v49  ;;  %v4904_v1 = vsel %vm2920_vm11, %v4903_v18, %v4899_v12  ;;  %v4800_v18 = vsel %vm2885_vm6, %v4799_v21, %v9921_v32  ;;  %v4952_v32 = vrot.slane %v9982_v8, %v6651_v36 }
 0x3f4   :  { %v10142_v61 = vpop.xlane.xlu1 %1861  ;;  %v10148_v11 = vpop.xlane.xlu0 %1810  ;;  %v4909_v49 = vsel %vm10683_vm7, %v4908_v14, %v4904_v1  ;;  %v4814_v14 = vrot.slane %v10018_v43, %v6694_v3  ;;  %v4805_v29 = vsel %vm10684_vm9, %v4804_v35, %v4800_v18  ;;  %v4824_v43 = vrot.slane %v10066_v0, %v6714_v19  ;;  %vm10687_vm7 = vmmov %vm10684_vm9 }
 0x3f5   :  { %v4914_v4 = vsel %vm2934_vm13, %v4913_v15, %v4909_v49  ;;  %v2061_v15 = vsel %vm527_vm0, %v526_v54, 0.0  ;;  %v4810_v21 = vsel %vm2899_vm8, %v4809_v7, %v4805_v29  ;;  %v4957_v12 = vrot.slane %v10006_v48, %v6676_v53  ;;  %v2271_v29 = vld [vmem:[%s10654_s1 + $0x678] sm:$0xff] }
 0x3f6   :  { %v4829_v8 = vrot.slane %v10091_v41, %v6740_v42  ;;  %v5037_v0 = vsel %vm2885_vm6, %v5036_v37, %v9961_v45  ;;  %vm10686_vm0 = vcmask 654912   ;;  %v4834_v35 = vrot.slane %v10124_v22, %v6734_v38 }
 0x3f7   :  { %2008 = vadd.xlane.f32.xlu1 %v2007_v50  ;;  %1918 = vadd.xlane.f32.xlu0 %v1917_v62  ;;  %v4919_v50 = vsel %vm2941_vm14, %v4918_v30, %v4914_v4  ;;  %v4819_v62 = vrot.slane %v10042_v46, %v6726_v25  ;;  %v5046_v30 = vrot.slane %v10026_v63, %v6706_v9  ;;  %vm10688_vm9 = vcmask 851712  }
 0x3f8   :  { %v1775_v5 = vpop.xlane.xlu1 %1774  ;;  %v1724_v58 = vpop.xlane.xlu0 %1723  ;;  %v4815_v13 = vsel %vm10686_vm0, %v4814_v14, %v4810_v21  ;;  %v4962_v1 = vrot.slane %v10030_v2, %v6673_v52  ;;  %v4953_v41 = vsel %vm2878_vm5, %v4952_v32, %v9964_v56  ;;  %v5042_v49 = vsel %vm10687_vm7, %v5041_v10, %v5037_v0  ;;  %vm10689_vm0 = vmmov %vm10687_vm7  ;;  %v2286_v32 = vld [vmem:[%s10654_s1 + $0x6f0] sm:$0xff] }
 0x3f9   :  { %v4923_v33 = vrot.slane %v1775_v5, %v6759_v57  ;;  %v4820_v48 = vsel %vm2913_vm10, %v4819_v62, %v4815_v13  ;;  %v4839_v63 = vrot.slane %v1724_v58, %v6754_v55  ;;  %v4967_v45 = vrot.slane %v10054_v34, %v6706_v9  ;;  %v2269_v13 = vld [vmem:[%s10654_s1 + $0x668] sm:$0xff] }
 0x3fa   :  { %v4825_v5 = vsel %vm2920_vm11, %v4824_v43, %v4820_v48  ;;  %v5047_v2 = vsel %vm2899_vm8, %v5046_v30, %v5042_v49  ;;  %v5051_v56 = vrot.slane %v10050_v39, %v6694_v3  ;;  %v4977_v4 = vrot.slane %v10103_v24, %v6726_v25 }
 0x3fb   :  { %2011 = vadd.xlane.f32.xlu1 %v2010_v6  ;;  %2059 = vadd.xlane.f32.xlu0 %v2058_v59  ;;  %v4924_v26 = vsel %vm2948_vm15, %v4923_v33, %v4919_v50  ;;  %v4958_v6 = vsel %vm2885_vm6, %v4957_v12, %v4953_v41  ;;  %v4972_v59 = vrot.slane %v10078_v16, %v6694_v3  ;;  %vm10690_vm7 = vcmask 654912   ;;  %v2284_v41 = vld [vmem:[%s10654_s1 + $0x6e0] sm:$0xff] }
 0x3fc   :  { %v10195_v23 = vpop.xlane.xlu1 %1864  ;;  %v5409_v46 = vsel %vm5399_vm12, %v4924_v26, %v10685_v60  ;;  %v1814_v51 = vpop.xlane.xlu0 %1813  ;;  %v4830_v54 = vsel %vm10688_vm9, %v4829_v8, %v4825_v5  ;;  %v4963_v58 = vsel %vm10689_vm0, %v4962_v1, %v4958_v6  ;;  %v4982_v16 = vrot.slane %v10148_v11, %v6714_v19  ;;  %vm10692_vm9 = vmmov %vm10690_vm7  ;;  %v2285_v8 = vld [vmem:[%s10654_s1 + $0x6e8] sm:$0xff] }
 0x3fd   :  { %5776 = vmatprep.mubr.f32.mxu0 %v5409_v46  ;;  %v4835_v34 = vsel %vm2934_vm13, %v4834_v35, %v4830_v54  ;;  %v4968_v37 = vsel %vm2899_vm8, %v4967_v45, %v4963_v58  ;;  %v5061_v39 = vrot.slane %v10099_v47, %v6714_v19  ;;  %v4987_v24 = vrot.slane %v1814_v51, %v6740_v42 }
 0x3fe   :  { %v4840_v18 = vsel %vm2941_vm14, %v4839_v63, %v4835_v34  ;;  %v5066_v11 = vrot.slane %v10142_v61, %v6740_v42  ;;  %v5052_v10 = vsel %vm10692_vm9, %v5051_v56, %v5047_v2  ;;  %v5071_v60 = vrot.slane %v10195_v23, %v6734_v38  ;;  %v2270_v61 = vld [vmem:[%s10654_s1 + $0x670] sm:$0xff]  ;;  %v10695_v56 = vld [vmem:[#allocation8_spill] sm:$0xff] }
 0x3ff   :  { %2014 = vadd.xlane.f32.xlu1 %v2013_v20  ;;  %2062 = vadd.xlane.f32.xlu0 %v2061_v15  ;;  %v5056_v20 = vrot.slane %v10074_v17, %v6726_v25  ;;  %v4973_v17 = vsel %vm10690_vm7, %v4972_v59, %v4968_v37  ;;  %v10691_v15 = vld [vmem:[#allocation6_spill] sm:$0xff]  ;;  %vm10693_vm0 = vcmask 851712   ;;  %v2283_v59 = vld [vmem:[%s10654_s1 + $0x6d8] sm:$0xff] }
 0x400   :  { %v1817_v22 = vpop.xlane.xlu1 %1816  ;;  %v1727_v7 = vpop.xlane.xlu0 %1726  ;;  %v4978_v43 = vsel %vm2913_vm10, %v4977_v4, %v4973_v17  ;;  %vm10694_vm7 = vmmov %vm10693_vm0  ;;  %v2267_v34 = vld [vmem:[%s10654_s1 + $0x658] sm:$0xff] }
 0x401   :  { %v4844_v33 = vrot.slane %v1727_v7, %v6759_v57  ;;  %v4992_v62 = vrot.slane %v1817_v22, %v6734_v38  ;;  %v5057_v21 = vsel %vm2913_vm10, %v5056_v20, %v5052_v10  ;;  %v4983_v12 = vsel %vm2920_vm11, %v4982_v16, %v4978_v43  ;;  %v2268_v22 = vld [vmem:[%s10654_s1 + $0x660] sm:$0xff]  ;;  %v2303_v37 = vld [vmem:[%s10654_s1 + $0x778] sm:$0xff]  ;;  %v2301_v10 = vld [vmem:[%s10654_s1 + $0x768] sm:$0xff] }
 0x402   :  { %v5062_v23 = vsel %vm2920_vm11, %v5061_v39, %v5057_v21  ;;  %v4988_v51 = vsel %vm10693_vm0, %v4987_v24, %v4983_v12  ;;  %v10696_v20 = vld [vmem:[#allocation9_spill] sm:$0xff]  ;;  %v2266_v24 = vld [vmem:[%s10654_s1 + $0x650] sm:$0xff] }
 0x403   :  { %v4845_v14 = vsel %vm2948_vm15, %v4844_v33, %v4840_v18  ;;  %v5067_v35 = vsel %vm10694_vm7, %v5066_v11, %v5062_v23  ;;  %v4993_v1 = vsel %vm2934_vm13, %v4992_v62, %v4988_v51  ;;  %v2282_v18 = vld [vmem:[%s10654_s1 + $0x6d0] sm:$0xff]  ;;  %v2265_v62 = vld [vmem:[%s10654_s1 + $0x648] sm:$0xff]  ;;  %v2300_v21 = vld [vmem:[%s10654_s1 + $0x760] sm:$0xff] }
 0x404   :  { %v1820_v50 = vpop.xlane.xlu1 %1819  ;;  %v1868_v26 = vpop.xlane.xlu0 %1867  ;;  %v5408_v47 = vsel %vm5399_vm12, %v4845_v14, %v10691_v15  ;;  %v5072_v49 = vsel %vm2934_vm13, %v5071_v60, %v5067_v35  ;;  %v2318_v14 = vld [vmem:[%s10654_s1 + $0x7f0] sm:$0xff]  ;;  %v2264_v60 = vld [vmem:[%s10654_s1 + $0x640] sm:$0xff]  ;;  %v2315_v23 = vld [vmem:[%s10654_s1 + $0x7d8] sm:$0xff] }
 0x405   :  { %v4997_v46 = vrot.slane %v1820_v50, %v6754_v55  ;;  %5777 = vmatmul.mubr.f32.vlgmr.msra.gmra.mxu0 %v5408_v47  ;;  %v5076_v30 = vrot.slane %v1868_v26, %v6754_v55  ;;  %v2281_v50 = vld [vmem:[%s10654_s1 + $0x6c8] sm:$0xff]  ;;  %v2299_v35 = vld [vmem:[%s10654_s1 + $0x758] sm:$0xff] }
 0x406   :  { %6219 = vmatpush3.msra.mxu0 %v2271_v29  ;;  %v2302_v29 = vld [vmem:[%s10654_s1 + $0x770] sm:$0xff]  ;;  %v2317_v26 = vld [vmem:[%s10654_s1 + $0x7e8] sm:$0xff] }
 0x407   :  { %6220 = vmatprep.subr.mxu0 %v2286_v32  ;;  %v4998_v45 = vsel %vm2941_vm14, %v4997_v46, %v4993_v1  ;;  %v5077_v6 = vsel %vm2941_vm14, %v5076_v30, %v5072_v49  ;;  %v2280_v32 = vld [vmem:[%s10654_s1 + $0x6c0] sm:$0xff]  ;;  %v2277_v49 = vld [vmem:[%s10654_s1 + $0x6a8] sm:$0xff] }
 0x408   :  { %v1823_v0 = vpop.xlane.xlu1 %1822  ;;  %v1871_v63 = vpop.xlane.xlu0 %1870  ;;  %6221 = vmatpush3.msra.mxu0 %v2270_v61  ;;  %v2316_v46 = vld [vmem:[%s10654_s1 + $0x7e0] sm:$0xff]  ;;  %v2279_v61 = vld [vmem:[%s10654_s1 + $0x6b8] sm:$0xff] }
 0x409   :  { %v5002_v48 = vrot.slane %v1823_v0, %v6759_v57  ;;  %v5081_v5 = vrot.slane %v1871_v63, %v6759_v57  ;;  %6222 = vmatprep.subr.mxu0 %v2285_v8  ;;  %v2263_v8 = vld [vmem:[%s10654_s1 + $0x638] sm:$0xff]  ;;  %v2314_v63 = vld [vmem:[%s10654_s1 + $0x7d0] sm:$0xff] }
 0x40a   :  { %6223 = vmatpush3.msra.mxu0 %v2269_v13  ;;  %v2278_v13 = vld [vmem:[%s10654_s1 + $0x6b0] sm:$0xff] }
 0x40b   :  { %v5003_v2 = vsel %vm2948_vm15, %v5002_v48, %v4998_v45  ;;  %v5082_v7 = vsel %vm2948_vm15, %v5081_v5, %v5077_v6  ;;  %6224 = vmatprep.subr.mxu0 %v2284_v41  ;;  %v2262_v48 = vld [vmem:[%s10654_s1 + $0x630] sm:$0xff]  ;;  %v2261_v6 = vld [vmem:[%s10654_s1 + $0x628] sm:$0xff] }
 0x40c   :  { %v1925_v54 = vpop.xlane.xlu1 %1924  ;;  %v5410_v4 = vsel %vm5399_vm12, %v5003_v2, %v10695_v56  ;;  %v1922_v58 = vpop.xlane.xlu0 %1921  ;;  %v5411_v16 = vsel %vm5399_vm12, %v5082_v7, %v10696_v20  ;;  %6225 = vmatpush3.msra.mxu0 %v2268_v22  ;;  %v2298_v45 = vld [vmem:[%s10654_s1 + $0x750] sm:$0xff]  ;;  %v2313_v2 = vld [vmem:[%s10654_s1 + $0x7c8] sm:$0xff] }
 0x40d   :  { %v5169_v33 = vrot.slane %v1925_v54, %v6639_v28  ;;  %v5165_v39 = vrot.slane %v1922_v58, %v10680_v40  ;;  %5846 = vmatprep.mubr.f32.mxu1 %v5411_v16  ;;  %6226 = vmatprep.subr.mxu0 %v2283_v59  ;;  %v2276_v54 = vld [vmem:[%s10654_s1 + $0x6a0] sm:$0xff]  ;;  %v2297_v7 = vld [vmem:[%s10654_s1 + $0x748] sm:$0xff] }
 0x40e   :  { %5847 = vmatmul.mubr.f32.vlgmr.msra.gmra.mxu1 %v5410_v4  ;;  %6227 = vmatpush3.msra.mxu0 %v2267_v34  ;;  %v2260_v4 = vld [vmem:[%s10654_s1 + $0x620] sm:$0xff] }
 0x40f   :  { %v5170_v17 = vsel %vm2850_vm1, %v5169_v33, %v5165_v39  ;;  %6228 = vmatprep.subr.mxu0 %v2282_v18  ;;  %6254 = vmatpush3.msra.mxu1 %v2303_v37  ;;  %v2312_v34 = vld [vmem:[%s10654_s1 + $0x7c0] sm:$0xff]  ;;  %v2275_v33 = vld [vmem:[%s10654_s1 + $0x698] sm:$0xff] }
 0x410   :  { %v1877_v11 = vpop.xlane.xlu1 %1876  ;;  %v1874_v47 = vpop.xlane.xlu0 %1873  ;;  %6229 = vmatpush3.msra.mxu0 %v2266_v24  ;;  %6255 = vmatprep.subr.mxu1 %v2318_v14  ;;  %v2296_v58 = vld [vmem:[%s10654_s1 + $0x740] sm:$0xff]  ;;  %v2259_v18 = vld [vmem:[%s10654_s1 + $0x618] sm:$0xff]  ;;  %v2274_v14 = vld [vmem:[%s10654_s1 + $0x690] sm:$0xff] }
 0x411   :  { %v5090_v15 = vrot.slane %v1877_v11, %v6639_v28  ;;  %v5086_v43 = vrot.slane %v1874_v47, %v10680_v40  ;;  %6230 = vmatprep.subr.mxu0 %v2281_v50  ;;  %6256 = vmatpush3.msra.mxu1 %v2302_v29  ;;  %v2311_v37 = vld [vmem:[%s10654_s1 + $0x7b8] sm:$0xff]  ;;  %v2258_v11 = vld [vmem:[%s10654_s1 + $0x610] sm:$0xff] }
 0x412   :  { %6231 = vmatpush3.msra.mxu0 %v2265_v62  ;;  %6257 = vmatprep.subr.mxu1 %v2317_v26  ;;  %v2295_v50 = vld [vmem:[%s10654_s1 + $0x738] sm:$0xff]  ;;  %v2310_v62 = vld [vmem:[%s10654_s1 + $0x7b0] sm:$0xff] }
 0x413   :  { %v5091_v12 = vsel %vm2850_vm1, %v5090_v15, %v5086_v43  ;;  %6232 = vmatprep.subr.mxu0 %v2280_v32  ;;  %6258 = vmatpush3.msra.mxu1 %v2301_v10  ;;  %v2273_v15 = vld [vmem:[%s10654_s1 + $0x688] sm:$0xff]  ;;  %v2294_v47 = vld [vmem:[%s10654_s1 + $0x730] sm:$0xff] }
 0x414   :  { %v1880_v30 = vpop.xlane.xlu1 %1879  ;;  %v1928_v0 = vpop.xlane.xlu0 %1927  ;;  %6233 = vmatpush3.msra.mxu0 %v2264_v60  ;;  %6259 = vmatprep.subr.mxu1 %v2316_v46  ;;  %v2257_v43 = vld [vmem:[%s10654_s1 + $0x608] sm:$0xff] }
 0x415   :  { %v5095_v51 = vrot.slane %v1880_v30, %v6646_v31  ;;  %v5174_v1 = vrot.slane %v1928_v0, %v6646_v31  ;;  %6234 = vmatprep.subr.mxu0 %v2279_v61  ;;  %6260 = vmatpush3.msra.mxu1 %v2300_v21  ;;  %v2309_v60 = vld [vmem:[%s10654_s1 + $0x7a8] sm:$0xff]  ;;  %v2272_v61 = vld [vmem:[%s10654_s1 + $0x680] sm:$0xff] }
 0x416   :  { %6235 = vmatpush3.msra.mxu0 %v2263_v8  ;;  %6261 = vmatprep.subr.mxu1 %v2315_v23  ;;  %v2293_v21 = vld [vmem:[%s10654_s1 + $0x728] sm:$0xff]  ;;  %v2256_v30 = vld [vmem:[%s10654_s1 + $0x600] sm:$0xff] }
 0x417   :  { %v5096_v41 = vsel %vm2857_vm2, %v5095_v51, %v5091_v12  ;;  %v5175_v5 = vsel %vm2857_vm2, %v5174_v1, %v5170_v17  ;;  %6236 = vmatprep.subr.mxu0 %v2278_v13  ;;  %6262 = vmatpush3.msra.mxu1 %v2299_v35  ;;  %v2308_v8 = vld [vmem:[%s10654_s1 + $0x7a0] sm:$0xff]  ;;  %v2307_v13 = vld [vmem:[%s10654_s1 + $0x798] sm:$0xff] }
 0x418   :  { %v2018_v22 = vpop.xlane.xlu1 %2017  ;;  %v1931_v59 = vpop.xlane.xlu0 %1930  ;;  %6237 = vmatpush3.msra.mxu0 %v2262_v48  ;;  %6263 = vmatprep.subr.mxu1 %v2314_v63  ;;  %v2292_v23 = vld [vmem:[%s10654_s1 + $0x720] sm:$0xff]  ;;  %v2291_v48 = vld [vmem:[%s10654_s1 + $0x718] sm:$0xff] }
 0x419   :  { %v5179_v56 = vrot.slane %v1931_v59, %v6636_v27  ;;  %6238 = vmatprep.subr.mxu0 %v2277_v49  ;;  %6264 = vmatpush3.msra.mxu1 %v2298_v45  ;;  %v5323_v29 = vrot.slane %v2018_v22, %v10680_v40  ;;  %v2306_v49 = vld [vmem:[%s10654_s1 + $0x790] sm:$0xff]  ;;  %v2289_v59 = vld [vmem:[%s10654_s1 + $0x708] sm:$0xff] }
 0x41a   :  { %6239 = vmatpush3.msra.mxu0 %v2261_v6  ;;  %6265 = vmatprep.subr.mxu1 %v2313_v2 }
 0x41b   :  { %v5180_v20 = vsel %vm2864_vm3, %v5179_v56, %v5175_v5  ;;  %6240 = vmatprep.subr.mxu0 %v2276_v54  ;;  %6266 = vmatpush3.msra.mxu1 %v2297_v7  ;;  %v2290_v5 = vld [vmem:[%s10654_s1 + $0x710] sm:$0xff]  ;;  %v2304_v7 = vld [vmem:[%s10654_s1 + $0x780] sm:$0xff] }
 0x41c   :  { %v1883_v16 = vpop.xlane.xlu1 %1882  ;;  %v2021_v24 = vpop.xlane.xlu0 %2020  ;;  %6241 = vmatpush3.msra.mxu0 %v2260_v4  ;;  %6267 = vmatprep.subr.mxu1 %v2312_v34  ;;  %v2288_v4 = vld [vmem:[%s10654_s1 + $0x700] sm:$0xff] }
 0x41d   :  { %v5100_v39 = vrot.slane %v1883_v16, %v6636_v27  ;;  %v5327_v17 = vrot.slane %v2021_v24, %v6639_v28  ;;  %6242 = vmatprep.subr.mxu0 %v2275_v33  ;;  %6268 = vmatpush3.msra.mxu1 %v2296_v58 }
 0x41e   :  { %6243 = vmatpush3.msra.mxu0 %v2259_v18  ;;  %6269 = vmatprep.subr.mxu1 %v2311_v37 }
 0x41f   :  { %v5101_v26 = vsel %vm2864_vm3, %v5100_v39, %v5096_v41  ;;  %v5328_v32 = vsel %vm2850_vm1, %v5327_v17, %v5323_v29  ;;  %6244 = vmatprep.subr.mxu0 %v2274_v14  ;;  %6270 = vmatpush3.msra.mxu1 %v2295_v50 }
 0x420   :  { %v1970_v10 = vpop.xlane.xlu1 %1969  ;;  %v1934_v46 = vpop.xlane.xlu0 %1933  ;;  %6245 = vmatpush3.msra.mxu0 %v2258_v11  ;;  %6271 = vmatprep.subr.mxu1 %v2310_v62 }
 0x421   :  { %v5184_v12 = vrot.slane %v1934_v46, %v6665_v44  ;;  %6246 = vmatprep.subr.mxu0 %v2273_v15  ;;  %6272 = vmatpush3.msra.mxu1 %v2294_v47  ;;  %v5244_v63 = vrot.slane %v1970_v10, %v10680_v40 }
 0x422   :  { %6247 = vmatpush3.msra.mxu0 %v2257_v43  ;;  %6273 = vmatprep.subr.mxu1 %v2309_v60 }
 0x423   :  { %v5185_v51 = vsel %vm2871_vm4, %v5184_v12, %v5180_v20  ;;  %6248 = vmatprep.subr.mxu0 %v2272_v61  ;;  %6274 = vmatpush3.msra.mxu1 %v2293_v21 }
 0x424   :  { %v2024_v0 = vpop.xlane.xlu1 %2023  ;;  %v1973_v1 = vpop.xlane.xlu0 %1972  ;;  %6249 = vmatpush3.msra.mxu0 %v2256_v30  ;;  %6275 = vmatprep.subr.mxu1 %v2308_v8 }
 0x425   :  { %v5332_v35 = vrot.slane %v2024_v0, %v6646_v31  ;;  %v5248_v41 = vrot.slane %v1973_v1, %v6639_v28  ;;  %6276 = vmatpush3.msra.mxu1 %v2292_v23  ;;  %v2305_v28 = vld [vmem:[%s10654_s1 + $0x788] sm:$0xff] }
 0x426   :  { %6277 = vmatprep.subr.mxu1 %v2307_v13 }
 0x427   :  { %v5333_v45 = vsel %vm2857_vm2, %v5332_v35, %v5328_v32  ;;  %v5249_v22 = vsel %vm2850_vm1, %v5248_v41, %v5244_v63  ;;  %6278 = vmatpush3.msra.mxu1 %v2291_v48  ;;  %vm10697_vm1 = vcmask 523712  }
 0x428   :  { %v1937_v6 = vpop.xlane.xlu1 %1936  ;;  %v1886_v2 = vpop.xlane.xlu0 %1885  ;;  %6279 = vmatprep.subr.mxu1 %v2306_v49 }
 0x429   :  { %v5189_v40 = vrot.slane %v1937_v6, %v6651_v36  ;;  %v5105_v54 = vrot.slane %v1886_v2, %v6665_v44  ;;  %6280 = vmatpush3.msra.mxu1 %v2290_v5 }
 0x42a   :  { %6281 = vmatprep.subr.mxu1 %v2305_v28 }
 0x42b   :  { %v5190_v56 = vsel %vm2878_vm5, %v5189_v40, %v5185_v51  ;;  %v5106_v34 = vsel %vm2871_vm4, %v5105_v54, %v5101_v26  ;;  %6282 = vmatpush3.msra.mxu1 %v2289_v59 }
 0x42c   :  { %v2027_v33 = vpop.xlane.xlu1 %2026  ;;  %v1976_v20 = vpop.xlane.xlu0 %1975  ;;  %6283 = vmatprep.subr.mxu1 %v2304_v7 }
 0x42d   :  { %v5337_v58 = vrot.slane %v2027_v33, %v6636_v27  ;;  %v5253_v16 = vrot.slane %v1976_v20, %v6646_v31  ;;  %6284 = vmatpush3.msra.mxu1 %v2288_v4 }
 0x42f   :  { %v5338_v18 = vsel %vm2864_vm3, %v5337_v58, %v5333_v45  ;;  %v5254_v37 = vsel %vm2857_vm2, %v5253_v16, %v5249_v22  ;;  %vm10698_vm2 = vmmov %vm10692_vm9 }
 0x430   :  { %v1940_v39 = vpop.xlane.xlu1 %1939  ;;  %v1889_v24 = vpop.xlane.xlu0 %1888  ;;  %vm10702_vm9 = vmmov %vm10698_vm2 }
 0x431   :  { %v5110_v14 = vrot.slane %v1889_v24, %v6651_v36  ;;  %v5194_v54 = vrot.slane %v1940_v39, %v6676_v53 }
 0x433   :  { %v10492_v50 = vsel %vm2878_vm5, %v5110_v14, %v5106_v34  ;;  %v5195_v20 = vsel %vm2885_vm6, %v5194_v54, %v5190_v56 }
 0x434   :  { %v2030_v29 = vpop.xlane.xlu1 %2029  ;;  %v1979_v11 = vpop.xlane.xlu0 %1978 }
 0x435   :  { %v5342_v17 = vrot.slane %v2030_v29, %v6665_v44  ;;  %v5258_v62 = vrot.slane %v1979_v11, %v6636_v27 }
 0x437   :  { %v5343_v31 = vsel %vm2871_vm4, %v5342_v17, %v5338_v18  ;;  %v5259_v26 = vsel %vm2864_vm3, %v5258_v62, %v5254_v37  ;;  %vm10699_vm3 = vmmov %vm10693_vm0 }
 0x438   :  { %v1943_v15 = vpop.xlane.xlu1 %1942  ;;  %v1892_v47 = vpop.xlane.xlu0 %1891  ;;  %vm10703_vm0 = vmmov %vm10697_vm1 }
 0x439   :  { %v5199_v7 = vrot.slane %v1943_v15, %v6673_v52  ;;  %v5115_v56 = vrot.slane %v1892_v47, %v6676_v53  ;;  %vm10704_vm7 = vmmov %vm10699_vm3 }
 0x43b   :  { %v5200_v18 = vsel %vm10697_vm1, %v5199_v7, %v5195_v20  ;;  %v5116_v47 = vsel %vm2885_vm6, %v5115_v56, %v10492_v50 }
 0x43c   :  { %v2033_v32 = vpop.xlane.xlu1 %2032  ;;  %v1982_v43 = vpop.xlane.xlu0 %1981 }
 0x43d   :  { %v5347_v10 = vrot.slane %v2033_v32, %v6651_v36  ;;  %v5263_v60 = vrot.slane %v1982_v43, %v6665_v44 }
 0x43f   :  { %v10501_v46 = vsel %vm2878_vm5, %v5347_v10, %v5343_v31  ;;  %v10504_v61 = vsel %vm2871_vm4, %v5263_v60, %v5259_v26  ;;  %vm10700_vm4 = vmmov %vm10697_vm1 }
 0x440   :  { %v1946_v21 = vpop.xlane.xlu1 %1945  ;;  %v1895_v27 = vpop.xlane.xlu0 %1894  ;;  %vm10709_vm1 = vmmov %vm10699_vm3 }
 0x441   :  { %v5204_v4 = vrot.slane %v1946_v21, %v6706_v9  ;;  %v5120_v26 = vrot.slane %v1895_v27, %v6673_v52 }
 0x443   :  { %v5205_v24 = vsel %vm2899_vm8, %v5204_v4, %v5200_v18  ;;  %v5121_v27 = vsel %vm10700_vm4, %v5120_v26, %v5116_v47  ;;  %v10701_v4 = vld [vmem:[#allocation11_spill] sm:$0xff] }
 0x444   :  { %v10506_v12 = vpop.xlane.xlu1 %2035  ;;  %v10508_v30 = vpop.xlane.xlu0 %1984 }
 0x445   :  { %v5268_v54 = vrot.slane %v10508_v30, %v6651_v36 }
 0x448   :  { %v1949_v8 = vpop.xlane.xlu1 %1948  ;;  %v1898_v23 = vpop.xlane.xlu0 %1897 }
 0x449   :  { %v5209_v33 = vrot.slane %v1949_v8, %v6694_v3  ;;  %v5125_v43 = vrot.slane %v1898_v23, %v6706_v9 }
 0x44b   :  { %v5210_v29 = vsel %vm10698_vm2, %v5209_v33, %v5205_v24  ;;  %v5126_v33 = vsel %vm2899_vm8, %v5125_v43, %v5121_v27 }
 0x44c   :  { %v10510_v51 = vpop.xlane.xlu1 %2038  ;;  %v10512_v0 = vpop.xlane.xlu0 %1987 }
 0x44d   :  { %v5357_v7 = vrot.slane %v10510_v51, %v6673_v52 }
 0x450   :  { %v1952_v13 = vpop.xlane.xlu1 %1951  ;;  %v1901_v44 = vpop.xlane.xlu0 %1900 }
 0x451   :  { %v5214_v16 = vrot.slane %v1952_v13, %v6726_v25  ;;  %v5130_v13 = vrot.slane %v1901_v44, %v6694_v3 }
 0x453   :  { %v5215_v62 = vsel %vm2913_vm10, %v5214_v16, %v5210_v29  ;;  %v5131_v51 = vsel %vm10702_vm9, %v5130_v13, %v5126_v33 }
 0x454   :  { %v10514_v35 = vpop.xlane.xlu1 %2041  ;;  %v10516_v1 = vpop.xlane.xlu0 %1990 }
 0x455   :  { %v5278_v16 = vrot.slane %v10516_v1, %v6673_v52 }
 0x458   :  { %v1955_v48 = vpop.xlane.xlu1 %1954  ;;  %v1904_v63 = vpop.xlane.xlu0 %1903 }
 0x459   :  { %v5219_v37 = vrot.slane %v1955_v48, %v6714_v19 }
 0x45b   :  { %v5220_v15 = vsel %vm2920_vm11, %v5219_v37, %v5215_v62 }
 0x45c   :  { %v10518_v41 = vpop.xlane.xlu1 %2044  ;;  %v10520_v49 = vpop.xlane.xlu0 %1993 }
 0x45d   :  { %v5283_v18 = vrot.slane %v10520_v49, %v6706_v9 }
 0x460   :  { %v1958_v45 = vpop.xlane.xlu1 %1957  ;;  %v10522_v5 = vpop.xlane.xlu0 %1906 }
 0x461   :  { %v5224_v39 = vrot.slane %v1958_v45, %v6740_v42  ;;  %v5352_v45 = vrot.slane %v10506_v12, %v6676_v53  ;;  %v5140_v50 = vrot.slane %v10522_v5, %v6714_v19  ;;  %v5273_v12 = vrot.slane %v10512_v0, %v6676_v53 }
 0x463   :  { %v5225_v32 = vsel %vm10699_vm3, %v5224_v39, %v5220_v15  ;;  %v5353_v20 = vsel %vm2885_vm6, %v5352_v45, %v10501_v46 }
 0x464   :  { %v10524_v22 = vpop.xlane.xlu1 %2047  ;;  %v10526_v6 = vpop.xlane.xlu0 %1996 }
 0x465   :  { %v5288_v52 = vrot.slane %v10526_v6, %v6694_v3  ;;  %v5372_v56 = vrot.slane %v10524_v22, %v6726_v25 }
 0x468   :  { %v1961_v28 = vpop.xlane.xlu1 %1960  ;;  %v10528_v40 = vpop.xlane.xlu0 %1909 }
 0x469   :  { %v5229_v17 = vrot.slane %v1961_v28, %v6734_v38  ;;  %v5135_v28 = vrot.slane %v1904_v63, %v6726_v25  ;;  %v5362_v63 = vrot.slane %v10514_v35, %v6706_v9  ;;  %v5145_v36 = vrot.slane %v10528_v40, %v6740_v42 }
 0x46a   :  { %v5269_v35 = vsel %vm2878_vm5, %v5268_v54, %v10504_v61  ;;  %v5358_v40 = vsel %vm10703_vm0, %v5357_v7, %v5353_v20  ;;  %v5367_v61 = vrot.slane %v10518_v41, %v6694_v3  ;;  %vm10705_vm5 = vmmov %vm10703_vm0 }
 0x46b   :  { %v5230_v60 = vsel %vm2934_vm13, %v5229_v17, %v5225_v32  ;;  %v5136_v53 = vsel %vm2913_vm10, %v5135_v28, %v5131_v51  ;;  %v5274_v46 = vsel %vm2885_vm6, %v5273_v12, %v5269_v35  ;;  %v5363_v24 = vsel %vm2899_vm8, %v5362_v63, %v5358_v40  ;;  %vm10706_vm6 = vmmov %vm10698_vm2  ;;  %v10707_v32 = vld [vmem:[#allocation10_spill] sm:$0xff]  ;;  %v6040_v12 = vpop.f32.mrf.mxu0 }
 0x46c   :  { %v10530_v2 = vpop.xlane.xlu1 %2050  ;;  %v10532_v59 = vpop.xlane.xlu0 %1999  ;;  %v5279_v17 = vsel %vm10705_vm5, %v5278_v16, %v5274_v46 }
 0x46d   :  { %v5293_v29 = vrot.slane %v10532_v59, %v6726_v25  ;;  %v5377_v3 = vrot.slane %v10530_v2, %v6714_v19  ;;  %v6041_v63 = vpop.f32.mrf.mxu0 }
 0x46e   :  { %v6042_v16 = vadd.f32 %v6041_v63, %v6040_v12 }
 0x470   :  { %v1964_v34 = vpop.xlane.xlu1 %1963  ;;  %v1913_v58 = vpop.xlane.xlu0 %1912 }
 0x471   :  { %v5234_v31 = vrot.slane %v1964_v34, %v6754_v55  ;;  %v5150_v5 = vrot.slane %v1913_v58, %v6734_v38  ;;  %v5141_v58 = vsel %vm2920_vm11, %v5140_v50, %v5136_v53  ;;  %v6007_v53 = vld [vmem:[%s10655_s2] ss:$0 sm:$0xff]  ;;  %s6311_s2 = smov [#allocation2]  }
 0x472   :  { %v5146_v1 = vsel %vm10704_vm7, %v5145_v36, %v5141_v58  ;;  %v6075_v36 = vpop.f32.mrf.mxu1  ;;  %v5499_v58 = vadd.f32 %v6042_v16, %v6007_v53  ;;  %s5999_s5 = sshll.u32 %s6311_s2, 4  ;;  %s6000_s5 = int_to_ptr.vmem [resolvable:$true] %s5999_s5 }
 0x473   :  { %v5235_v48 = vsel %vm2941_vm14, %v5234_v31, %v5230_v60  ;;  %v5151_v9 = vsel %vm2934_vm13, %v5150_v5, %v5146_v1  ;;  %v5284_v31 = vsel %vm2899_vm8, %v5283_v18, %v5279_v17  ;;  %vm10708_vm8 = vmmov %vm10698_vm2  ;;  %s6289_s6 = scalar_lea.vmem %s6000_s5, 32  ;;  %p6294_p1 = scmp.lt.s32.totalorder %s6000_s5, %s6000_s5 }
 0x474   :  { %v10544_v14 = vpop.xlane.xlu1 %2053  ;;  %v10548_v11 = vpop.xlane.xlu0 %2002  ;;  %v5289_v15 = vsel %vm10706_vm6, %v5288_v52, %v5284_v31  ;;  %v5368_v43 = vsel %vm10708_vm8, %v5367_v61, %v5363_v24  ;;  %vm10710_vm2 = vmmov %vm10709_vm1  ;;  %p6290_p0 = scmp.ne.s32.totalorder %s6000_s5, %s6289_s6  ;;  %p6295_p2 = scmp.lt.s32.totalorder %s6289_s6, %s6289_s6 }
 0x475   :  { %v5298_v6 = vrot.slane %v10548_v11, %v6714_v19  ;;  %v5382_v25 = vrot.slane %v10544_v14, %v6740_v42  ;;  %v5294_v19 = vsel %vm2913_vm10, %v5293_v29, %v5289_v15  ;;  %v6076_v51 = vpop.f32.mrf.mxu1 }
 0x476   :  { %v6077_v35 = vadd.f32 %v6076_v51, %v6075_v36  ;;  %p6296_p3 = por %p6295_p2, %p6294_p1 }
 0x477   :  { %v6145_v5 = vpop.f32.mrf.mxu1 }
 0x478   :  { %v1967_v10 = vpop.xlane.xlu1 %1966  ;;  %v1916_v8 = vpop.xlane.xlu0 %1915  ;;  %v5569_v24 = vadd.f32 %v6077_v35, %v5499_v58  ;;  %p6297_p4 = pnand %p6296_p3, %p6290_p0 }
 0x479   :  { %v5239_v21 = vrot.slane %v1967_v10, %v6759_v57  ;;  %v5155_v0 = vrot.slane %v1916_v8, %v6754_v55  ;;  %v5299_v8 = vsel %vm2920_vm11, %v5298_v6, %v5294_v19 }
 0x47b   :  { %v5240_v23 = vsel %vm2948_vm15, %v5239_v21, %v5235_v48  ;;  %v5156_v62 = vsel %vm2941_vm14, %v5155_v0, %v5151_v9  ;;  %v5373_v21 = vsel %vm2913_vm10, %v5372_v56, %v5368_v43  ;;  %v6146_v0 = vpop.f32.mrf.mxu1 }
 0x47c   :  { %v2057_v44 = vpop.xlane.xlu1 %2056  ;;  %v5413_v34 = vsel %vm5399_vm12, %v5240_v23, %v10701_v4  ;;  %v2006_v30 = vpop.xlane.xlu0 %2005  ;;  %v5378_v14 = vsel %vm2920_vm11, %v5377_v3, %v5373_v21  ;;  %v6147_v52 = vadd.f32 %v6146_v0, %v6145_v5 }
 0x47d   :  { %5916 = vmatprep.mubr.f32.mxu0 %v5413_v34  ;;  %v5303_v41 = vrot.slane %v2006_v30, %v6740_v42  ;;  %v5387_v2 = vrot.slane %v2057_v44, %v6734_v38  ;;  %v5383_v48 = vsel %vm10710_vm2, %v5382_v25, %v5378_v14  ;;  %v10711_v44 = vld [vmem:[#allocation12_spill] sm:$0xff]  ;;  %v10712_v34 = vld [vmem:[#allocation13_spill] sm:$0xff]  ;;  %v6110_v30 = vpop.f32.mrf.mxu0 }
 0x47f   :  { %v5304_v47 = vsel %vm10709_vm1, %v5303_v41, %v5299_v8  ;;  %v5388_v28 = vsel %vm2934_vm13, %v5387_v2, %v5383_v48 }
 0x480   :  { %v2009_v37 = vpop.xlane.xlu1 %2008  ;;  %v1919_v39 = vpop.xlane.xlu0 %1918 }
 0x481   :  { %v5160_v49 = vrot.slane %v1919_v39, %v6759_v57  ;;  %v5308_v22 = vrot.slane %v2009_v37, %v6734_v38 }
 0x483   :  { %v5161_v59 = vsel %vm2948_vm15, %v5160_v49, %v5156_v62  ;;  %v5309_v27 = vsel %vm2934_vm13, %v5308_v22, %v5304_v47 }
 0x484   :  { %v2012_v26 = vpop.xlane.xlu1 %2011  ;;  %v2060_v11 = vpop.xlane.xlu0 %2059  ;;  %v5412_v10 = vsel %vm5399_vm12, %v5161_v59, %v10707_v32 }
 0x485   :  { %v5313_v60 = vrot.slane %v2012_v26, %v6754_v55  ;;  %5917 = vmatmul.mubr.f32.vlgmr.msra.gmra.mxu0 %v5412_v10  ;;  %v5392_v42 = vrot.slane %v2060_v11, %v6754_v55 }
 0x487   :  { %v5314_v23 = vsel %vm2941_vm14, %v5313_v60, %v5309_v27  ;;  %v5393_v55 = vsel %vm2941_vm14, %v5392_v42, %v5388_v28 }
 0x488   :  { %v2015_v13 = vpop.xlane.xlu1 %2014  ;;  %v2063_v45 = vpop.xlane.xlu0 %2062 }
 0x489   :  { %v5318_v38 = vrot.slane %v2015_v13, %v6759_v57  ;;  %v5397_v54 = vrot.slane %v2063_v45, %v6759_v57  ;;  %v6111_v57 = vpop.f32.mrf.mxu0 }
 0x48a   :  { %v6112_v37 = vadd.f32 %v6111_v57, %v6110_v30 }
 0x48b   :  { %v5319_v7 = vsel %vm2948_vm15, %v5318_v38, %v5314_v23  ;;  %v5398_v50 = vsel %vm2948_vm15, %v5397_v54, %v5393_v55 }
 0x48c   :  { %v5414_v4 = vsel %vm5399_vm12, %v5319_v7, %v10711_v44  ;;  %v5415_v33 = vsel %vm5399_vm12, %v5398_v50, %v10712_v34  ;;  %v5639_v39 = vadd.f32 %v6112_v37, %v5569_v24 }
 0x48d   :  { %5986 = vmatprep.mubr.f32.mxu1 %v5415_v33 }
 0x48e   :  { %5987 = vmatmul.mubr.f32.vlgmr.msra.gmra.mxu1 %v5414_v4  ;;  %v5709_v9 = vadd.f32 %v6147_v52, %v5639_v39 }
 0x4c5   :  { %v6180_v20 = vpop.f32.mrf.mxu0 }
 0x4c7   :  { %v6181_v40 = vpop.f32.mrf.mxu0 }
 0x4c8   :  { %v6182_v61 = vadd.f32 %v6181_v40, %v6180_v20 }
 0x4ca   :  { %v5779_v17 = vadd.f32 %v6182_v61, %v5709_v9 }
 0x4ce   :  { %v6215_v18 = vpop.f32.mrf.mxu1 }
 0x4d0   :  { %v6216_v1 = vpop.f32.mrf.mxu1 }
 0x4d1   :  { %v6217_v49 = vadd.f32 %v6216_v1, %v6215_v18 }
 0x4d3   :  { %v5849_v62 = vadd.f32 %v6217_v49, %v5779_v17 }
 0x545   :  { %v6250_v46 = vpop.f32.mrf.mxu0 }
 0x547   :  { %v6251_v29 = vpop.f32.mrf.mxu0 }
 0x548   :  { %v6252_v56 = vadd.f32 %v6251_v29, %v6250_v46 }
 0x54a   :  { %v5919_v3 = vadd.f32 %v6252_v56, %v5849_v62 }
 0x54e   :  { %v6285_v6 = vpop.f32.mrf.mxu1 }
 0x550   :  { %v6286_v31 = vpop.f32.mrf.mxu1 }
 0x551   :  { %v6287_v41 = vadd.f32 %v6286_v31, %v6285_v6 }
 0x553   :  { %v5989_v59 = vadd.f32 %v6287_v41, %v5919_v3 }
 0x555   :  { %5992 = vst [vmem:[#allocation2] sm:$0x3] %v5989_v59 }
 0x556   :  { %6300 = shalt.err (!%p6297_p4)
}
 0x557   :  { %6002 = dma.vmem_to_hbm [thread:$0]  %s6000_s5, 32, %s10656_s3, [#allocation3]  }
 0x558   :  { %6309 = dma.done.wait [#allocation3], 32  }
 0x559   :  { %6310 = vsyncadd [#allocation3], 4294967264 }
 0x55a   :  { %6006 = vsyncpa [#allocation3], 1 }

</bundles_post_ra>
